<compile_context>
chip_gen: v5e
topology: v5e:2x2
jax: 0.10.0
libtpu: 0.0.40
codegen_flags: <defaults>
</compile_context>

<pallas_src>
import functools

import jax
import jax.numpy as jnp
from jax.experimental import pallas as pl
from jax.experimental.pallas import tpu as pltpu

_EPS = 1e-5


def _row_tile(n, target=256):
    """Largest row count <= target that divides n and is a multiple of 8 (sublane rule)."""
    if n <= target:
        return n
    for t in range(target, 7, -1):
        if n % t == 0 and t % 8 == 0:
            return t
    return n


def _col_chunk(n, target=1536):
    """Largest column count <= target that divides n and is a multiple of 128 (lane rule)."""
    if n <= target:
        return n
    for t in range(target, 127, -128):
        if n % t == 0:
            return t
    return n


# ----------------------------- Pallas kernels ------------------------------ #

def _attn_kernel(xq_ref, xf_ref, objs_ref, lw_ref, lb_ref, n1w_ref, n1b_ref,
                 wq_ref, wkv_ref, wo_ref, bo_ref, ta_ref, o_ref,
                 k_scr, v_scr, o_scr, *, n_heads, d_head, n_visual,
                 kv_chunk, n_kv_chunks):
    """Fused: objs Linear + concat + LayerNorm(norm1) + MHA (visual queries only)
    + out projection + gated attention residual (x1 = x + tanh(a)*attn)."""
    inner = n_heads * d_head
    bf16 = jnp.bfloat16

    def ln(v):  # rowwise LayerNorm in f32 (LN of a concat == concat of LNs)
        m = jnp.mean(v, axis=-1, keepdims=True)
        var = jnp.mean((v - m) ** 2, axis=-1, keepdims=True)
        return (v - m) * jax.lax.rsqrt(var + _EPS) * n1w_ref[...] + n1b_ref[...]

    def write_kv(kv, row0, rows):
        # kv: (rows, 2*inner) f32 -> head-major bf16 K/V scratch slabs.
        for hd in range(n_heads):
            k_scr[hd, row0:row0 + rows, :] = kv[:, hd * d_head:(hd + 1) * d_head].astype(bf16)
            v_scr[hd, row0:row0 + rows, :] = (
                kv[:, inner + hd * d_head: inner + (hd + 1) * d_head].astype(bf16))

    # ---- once per batch element (first query tile): build head-major K/V over full S ----
    @pl.when(pl.program_id(1) == 0)
    def _():
        # object rows: context_dim -> query_dim projection, LN, fused K/V projection.
        objs_p = jnp.dot(objs_ref[0].astype(bf16), lw_ref[...],
                         preferred_element_type=jnp.float32) + lb_ref[...]
        kv_o = jnp.dot(ln(objs_p).astype(bf16), wkv_ref[...],
                       preferred_element_type=jnp.float32)
        write_kv(kv_o, n_visual, objs_ref.shape[1])
        # visual rows in chunks: bounds the live (chunk, 2*inner) f32 intermediate and
        # shortens the first-tile pipeline bubble.
        for c in range(n_kv_chunks):
            r0 = c * kv_chunk
            hv = ln(xf_ref[0, r0:r0 + kv_chunk, :].astype(jnp.float32)).astype(bf16)
            kv_v = jnp.dot(hv, wkv_ref[...], preferred_element_type=jnp.float32)
            write_kv(kv_v, r0, kv_chunk)

    # ---- per query tile: LN + Q projection + per-head attention + single Wo matmul ----
    hq = ln(xq_ref[0].astype(jnp.float32)).astype(bf16)                         # (TQ, D)
    # 1/sqrt(d_head) is folded into wq on the host.
    q = jnp.dot(hq, wq_ref[...], preferred_element_type=jnp.float32).astype(bf16)  # (TQ, inner)

    # Static per-head loop (n_heads is small here); switch to lax.fori_loop + pl.ds for 16+
    # heads to keep vreg pressure flat.
    for hd in range(n_heads):
        qh = q[:, hd * d_head:(hd + 1) * d_head]                                # (TQ, dh)
        s = jnp.einsum("qd,kd->qk", qh, k_scr[hd],
                       preferred_element_type=jnp.float32)                      # (TQ, S)
        s = s - jnp.max(s, axis=-1, keepdims=True)
        p = jnp.exp(s)
        r = pl.reciprocal(jnp.sum(p, axis=-1, keepdims=True), approx=True)      # EUP slot
        oh = jnp.einsum("qk,kd->qd", p.astype(bf16), v_scr[hd],
                        preferred_element_type=jnp.float32) * r                 # (TQ, dh)
        o_scr[:, hd * d_head:(hd + 1) * d_head] = oh.astype(bf16)

    attn = jnp.dot(o_scr[...], wo_ref[...],
                   preferred_element_type=jnp.float32) + bo_ref[...]            # (TQ, D)
    # Fused gated residual: write x1 = x + tanh(alpha_attn) * attn directly.
    o_ref[0] = (xq_ref[0].astype(jnp.float32) + ta_ref[0, 0] * attn).astype(o_ref.dtype)


def _ff_kernel(x1_ref, n2w_ref, n2b_ref, w1h_ref, b1h_ref, w1g_ref, b1g_ref,
               w2_ref, b2_ref, td_ref, o_ref, h_scr, acc_scr):
    """Fused: LayerNorm(norm2) + GEGLU FF (inner_ff tiled along grid axis 2) + gated residual."""
    bf16 = jnp.bfloat16
    c = pl.program_id(2)

    @pl.when(c == 0)
    def _():
        x1 = x1_ref[0].astype(jnp.float32)
        m = jnp.mean(x1, axis=-1, keepdims=True)
        var = jnp.mean((x1 - m) ** 2, axis=-1, keepdims=True)
        h_scr[...] = ((x1 - m) * jax.lax.rsqrt(var + _EPS) * n2w_ref[...]
                      + n2b_ref[...]).astype(bf16)
        acc_scr[...] = jnp.zeros_like(acc_scr)

    h = h_scr[...]                                                              # (TQ, D) bf16
    hid = jnp.dot(h, w1h_ref[...], preferred_element_type=jnp.float32) + b1h_ref[...]
    gate = jnp.dot(h, w1g_ref[...], preferred_element_type=jnp.float32) + b1g_ref[...]
    ff = (hid * jax.nn.gelu(gate, approximate=False)).astype(bf16)              # exact erf GELU
    acc_scr[...] += jnp.dot(ff, w2_ref[...], preferred_element_type=jnp.float32)

    @pl.when(c == pl.num_programs(2) - 1)
    def _():
        out = x1_ref[0].astype(jnp.float32) + td_ref[0, 0] * (acc_scr[...] + b2_ref[...])
        o_ref[0] = out.astype(o_ref.dtype)


# ------------------------------- Wrapper ----------------------------------- #

def gated_self_attention_dense(x, objs, p, *, n_heads, d_head):
    B, Nv, D = x.shape
    _, No, Cc = objs.shape
    S = Nv + No
    inner_attn = n_heads * d_head
    inner_ff = p["ff_w2"].shape[0]
    f32, bf16 = jnp.float32, jnp.bfloat16

    tile_q = _row_tile(Nv, target=256)       # sweep to 512 on v5e/v6e (128 MiB VMEM)
    nq = Nv // tile_q
    kv_chunk = _row_tile(Nv, target=512)     # K/V-build row chunk
    n_kv_chunks = Nv // kv_chunk
    ff_chunk = _col_chunk(inner_ff, target=1536)  # GEGLU reduction chunk
    nc = inner_ff // ff_chunk

    scale = 1.0 / float(d_head) ** 0.5

    # Host-side weight prep: bf16 MXU operands, fused K|V weight, softmax scale folded into
    # wq, GEGLU up-projection split into hid/gate halves so the reduction axis can be tiled.
    lin_w = p["lin_w"].astype(bf16)
    wq = (p["wq"] * scale).astype(bf16)
    wkv = jnp.concatenate([p["wk"], p["wv"]], axis=1).astype(bf16)   # (D, 2*inner_attn)
    wo = p["wo"].astype(bf16)
    w1_hid = p["ff_w1"][:, :inner_ff].astype(bf16)
    w1_gate = p["ff_w1"][:, inner_ff:].astype(bf16)
    b1_hid = p["ff_b1"][:, :inner_ff]
    b1_gate = p["ff_b1"][:, inner_ff:]
    ff_w2 = p["ff_w2"].astype(bf16)
    tanh_attn = jnp.tanh(p["alpha_attn"])     # (1, 1), precomputed once, passed via SMEM
    tanh_dense = jnp.tanh(p["alpha_dense"])   # (1, 1)

    # Explicit scoped-VMEM limits (defaults 16/32 MiB) sized from actual residency (+50%).
    attn_vmem = max(32 << 20, int(1.5 * (
        4 * tile_q * D * 4                               # xq in + x1 out (dbl-buffered f32)
        + (Nv * D + No * Cc) * 4                         # xf + objs (single-buffered)
        + 2 * (Cc * D + 4 * D * inner_attn + 4 * D)      # resident bf16 weights + biases
        + 2 * 2 * S * inner_attn + 2 * tile_q * inner_attn   # K/V + o_scr scratch (bf16)
        + 4 * (kv_chunk * 2 * inner_attn                 # live f32: K/V-build chunk
               + tile_q * (S + inner_attn + 2 * D)))))   # live f32: scores / q / LN / attn
    ff_vmem = max(32 << 20, int(1.5 * (
        4 * tile_q * D * 4                               # x1 in + out (dbl-buffered f32)
        + 2 * 2 * 3 * ff_chunk * D                       # w1h/w1g/w2 chunks (bf16, dbl-buf)
        + tile_q * D * 6                                 # h_scr (bf16) + acc (f32)
        + 4 * 3 * tile_q * ff_chunk)))                   # live f32: hid / gate / ff

    # ---- attention kernel: stage1 + concat + norm1 + MHA + gated residual ----
    def build_attn(single_buffer):
        def const(shape, imap):
            # Constant-index operands don't need double buffering.
            if single_buffer:
                return pl.BlockSpec(shape, imap, pipeline_mode=pl.Buffered(1))
            return pl.BlockSpec(shape, imap)

        c00 = lambda b, q: (0, 0)
        smem = pl.BlockSpec((1, 1), c00, memory_space=pltpu.MemorySpace.SMEM)
        return pl.pallas_call(
            functools.partial(_attn_kernel, n_heads=n_heads, d_head=d_head, n_visual=Nv,
                              kv_chunk=kv_chunk, n_kv_chunks=n_kv_chunks),
            out_shape=jax.ShapeDtypeStruct((B, Nv, D), f32),
            grid=(B, nq),
            in_specs=[
                pl.BlockSpec((1, tile_q, D), lambda b, q: (b, q, 0)),   # query rows of this tile
                const((1, Nv, D), lambda b, q: (b, 0, 0)),              # full visual rows (K/V)
                const((1, No, Cc), lambda b, q: (b, 0, 0)),             # objs
                const((Cc, D), c00),                                    # lin_w
                const((1, D), c00),                                     # lin_b
                const((1, D), c00),                                     # n1_w
                const((1, D), c00),                                     # n1_b
                const((D, inner_attn), c00),                            # wq (scale folded)
                const((D, 2 * inner_attn), c00),                        # wkv (fused K|V)
                const((inner_attn, D), c00),                            # wo
                const((1, D), c00),                                     # bo
                smem,                                                   # tanh(alpha_attn)
            ],
            out_specs=pl.BlockSpec((1, tile_q, D), lambda b, q: (b, q, 0)),
            scratch_shapes=[
                pltpu.VMEM((n_heads, S, d_head), bf16),   # K, head-major
                pltpu.VMEM((n_heads, S, d_head), bf16),   # V, head-major
                pltpu.VMEM((tile_q, inner_attn), bf16),   # per-head output staging
            ],
            compiler_params=pltpu.CompilerParams(
                dimension_semantics=("parallel", "arbitrary"),
                vmem_limit_bytes=attn_vmem),
        )

    attn_args = (x, x, objs, lin_w, p["lin_b"], p["n1_w"], p["n1_b"],
                 wq, wkv, wo, p["bo"], tanh_attn)
    try:
        x1 = build_attn(True)(*attn_args)
    except Exception:  # pipeline_mode=pl.Buffered(1) unsupported -> default buffering
        x1 = build_attn(False)(*attn_args)

    # ---- FF kernel: x1 + tanh(a_dense) * GEGLU(norm2(x1)), inner_ff tiled on grid axis 2 ----
    def build_ff(single_buffer):
        def const(shape, imap):
            if single_buffer:
                return pl.BlockSpec(shape, imap, pipeline_mode=pl.Buffered(1))
            return pl.BlockSpec(shape, imap)

        c00 = lambda b, q, c: (0, 0)
        smem = pl.BlockSpec((1, 1), c00, memory_space=pltpu.MemorySpace.SMEM)
        return pl.pallas_call(
            _ff_kernel,
            out_shape=jax.ShapeDtypeStruct((B, Nv, D), f32),
            grid=(B, nq, nc),
            in_specs=[
                pl.BlockSpec((1, tile_q, D), lambda b, q, c: (b, q, 0)),  # x1 (residual fused in)
                const((1, D), c00),                                       # n2_w
                const((1, D), c00),                                       # n2_b
                pl.BlockSpec((D, ff_chunk), lambda b, q, c: (0, c)),      # ff_w1 hid chunk
                pl.BlockSpec((1, ff_chunk), lambda b, q, c: (0, c)),      # ff_b1 hid chunk
                pl.BlockSpec((D, ff_chunk), lambda b, q, c: (0, c)),      # ff_w1 gate chunk
                pl.BlockSpec((1, ff_chunk), lambda b, q, c: (0, c)),      # ff_b1 gate chunk
                pl.BlockSpec((ff_chunk, D), lambda b, q, c: (c, 0)),      # ff_w2 row chunk
                const((1, D), c00),                                       # ff_b2
                smem,                                                     # tanh(alpha_dense)
            ],
            out_specs=pl.BlockSpec((1, tile_q, D), lambda b, q, c: (b, q, 0)),
            scratch_shapes=[
                pltpu.VMEM((tile_q, D), bf16),          # LN'd tile, reused across ff chunks
                pltpu.VMEM((tile_q, D), jnp.float32),   # FF accumulator
            ],
            # x1 is an internal intermediate (not the caller's x) -> safe to donate.
            input_output_aliases={0: 0},
            compiler_params=pltpu.CompilerParams(
                dimension_semantics=("parallel", "parallel", "arbitrary"),
                vmem_limit_bytes=ff_vmem),
        )

    ff_args = (x1, p["n2_w"], p["n2_b"], w1_hid, b1_hid, w1_gate, b1_gate,
               ff_w2, p["ff_b2"], tanh_dense)
    try:
        out = build_ff(True)(*ff_args)
    except Exception:
        out = build_ff(False)(*ff_args)
    return out


# ------------------------- Params & pure-JAX reference ---------------------- #

def init_params(key, query_dim, context_dim, n_heads, d_head):
    inner_attn = n_heads * d_head
    inner_ff = 4 * query_dim
    ks = jax.random.split(key, 16)
    s = 0.05
    f32 = jnp.float32
    n = lambda k, shape: (jax.random.normal(k, shape) * s).astype(f32)
    return dict(
        lin_w=n(ks[0], (context_dim, query_dim)),
        lin_b=n(ks[1], (1, query_dim)),
        n1_w=(jnp.ones((1, query_dim), f32) + n(ks[2], (1, query_dim))),
        n1_b=n(ks[3], (1, query_dim)),
        wq=n(ks[4], (query_dim, inner_attn)),
        wk=n(ks[5], (query_dim, inner_attn)),
        wv=n(ks[6], (query_dim, inner_attn)),
        wo=n(ks[7], (inner_attn, query_dim)),
        bo=n(ks[8], (1, query_dim)),
        n2_w=(jnp.ones((1, query_dim), f32) + n(ks[9], (1, query_dim))),
        n2_b=n(ks[10], (1, query_dim)),
        ff_w1=n(ks[11], (query_dim, 2 * inner_ff)),
        ff_b1=n(ks[12], (1, 2 * inner_ff)),
        ff_w2=n(ks[13], (inner_ff, query_dim)),
        ff_b2=n(ks[14], (1, query_dim)),
        # Module __init__ sets alpha_attn = alpha_dense = 0.0 (gates become no-ops); use
        # nonzero deterministic values so the full kernel path is exercised.
        alpha_attn=jnp.full((1, 1), 0.7, f32),
        alpha_dense=jnp.full((1, 1), -0.4, f32),
    )


def reference(x, objs, p, n_heads, d_head):
    def ln(v, w, b):
        m = jnp.mean(v, -1, keepdims=True)
        var = jnp.mean((v - m) ** 2, -1, keepdims=True)
        return (v - m) / jnp.sqrt(var + _EPS) * w[0] + b[0]

    B, Nv, D = x.shape
    objs_p = objs @ p["lin_w"] + p["lin_b"][0]
    xcat = jnp.concatenate([x, objs_p], axis=1)
    S = xcat.shape[1]
    h = ln(xcat, p["n1_w"], p["n1_b"])
    q = (h @ p["wq"]).reshape(B, S, n_heads, d_head).transpose(0, 2, 1, 3)
    k = (h @ p["wk"]).reshape(B, S, n_heads, d_head).transpose(0, 2, 1, 3)
    v = (h @ p["wv"]).reshape(B, S, n_heads, d_head).transpose(0, 2, 1, 3)
    s = jnp.einsum("bhqd,bhkd->bhqk", q, k) / jnp.sqrt(jnp.float32(d_head))
    a = jax.nn.softmax(s, axis=-1)
    o = jnp.einsum("bhqk,bhkd->bhqd", a, v).transpose(0, 2, 1, 3).reshape(B, S, n_heads * d_head)
    attn = o @ p["wo"] + p["bo"][0]
    x1 = x + jnp.tanh(p["alpha_attn"][0, 0]) * attn[:, :Nv, :]
    h2 = ln(x1, p["n2_w"], p["n2_b"])
    proj = h2 @ p["ff_w1"] + p["ff_b1"][0]
    inner = p["ff_w2"].shape[0]
    ff = proj[..., :inner] * jax.nn.gelu(proj[..., inner:], approximate=False)
    ff = ff @ p["ff_w2"] + p["ff_b2"][0]
    return x1 + jnp.tanh(p["alpha_dense"][0, 0]) * ff


# --------------------------------- Main ------------------------------------ #

if __name__ == "__main__":
    B, n_visual, n_objs = 2, 16, 8
    query_dim, context_dim = 32, 16
    n_heads, d_head = 2, 16

    key = jax.random.PRNGKey(0)
    kx, ko, kp = jax.random.split(key, 3)
    x = jax.random.normal(kx, (B, n_visual, query_dim), jnp.float32)
    objs = jax.random.normal(ko, (B, n_objs, context_dim), jnp.float32)
    params = init_params(kp, query_dim, context_dim, n_heads, d_head)

    out = gated_self_attention_dense(x, objs, params, n_heads=n_heads, d_head=d_head)
    out = jax.block_until_ready(out)

    ref = reference(x, objs, params, n_heads, d_head)
    assert out.shape == ref.shape == (B, n_visual, query_dim)
    # bf16 MXU operands (f32 accumulation) + approx reciprocal -> slightly looser tolerance.
    assert jnp.allclose(out, ref, rtol=1e-2, atol=1e-2), (
        f"max abs diff = {jnp.max(jnp.abs(out - ref))}")

    print("KERNEL_OK")
</pallas_src>

<mosaic_0001>
module attributes {stable_mosaic.version = 11 : i64} {
  func.func @_attn_kernel(%arg0: i32, %arg1: i32, %arg2: memref<1x16x32xf32, #tpu.memory_space<vmem>>, %arg3: memref<1x16x32xf32, #tpu.memory_space<vmem>>, %arg4: memref<1x8x16xf32, #tpu.memory_space<vmem>>, %arg5: memref<16x32xbf16, #tpu.memory_space<vmem>>, %arg6: memref<1x32xf32, #tpu.memory_space<vmem>>, %arg7: memref<1x32xf32, #tpu.memory_space<vmem>>, %arg8: memref<1x32xf32, #tpu.memory_space<vmem>>, %arg9: memref<32x32xbf16, #tpu.memory_space<vmem>>, %arg10: memref<32x64xbf16, #tpu.memory_space<vmem>>, %arg11: memref<32x32xbf16, #tpu.memory_space<vmem>>, %arg12: memref<1x32xf32, #tpu.memory_space<vmem>>, %arg13: memref<1x1xf32, #tpu.memory_space<smem>>, %arg14: memref<1x16x32xf32, #tpu.memory_space<vmem>>, %arg15: memref<2x24x16xbf16, #tpu.memory_space<vmem>>, %arg16: memref<2x24x16xbf16, #tpu.memory_space<vmem>>, %arg17: memref<16x32xbf16, #tpu.memory_space<vmem>>) attributes {dimension_semantics = [#tpu.dimension_semantics<parallel>, #tpu.dimension_semantics<arbitrary>], iteration_bounds = array<i64: 2, 1>, scalar_prefetch = 0 : i64, scratch_operands = 3 : i64, tpu.core_type = #tpu.core_type<tc>, window_params = [{transform_indices = @transform_0, window_bounds = array<i64: 1, 16, 32>}, {pipeline_mode = #tpu.pipeline_mode<synchronous>, transform_indices = @transform_1, window_bounds = array<i64: 1, 16, 32>}, {pipeline_mode = #tpu.pipeline_mode<synchronous>, transform_indices = @transform_2, window_bounds = array<i64: 1, 8, 16>}, {pipeline_mode = #tpu.pipeline_mode<synchronous>, transform_indices = @transform_3, window_bounds = array<i64: 16, 32>}, {pipeline_mode = #tpu.pipeline_mode<synchronous>, transform_indices = @transform_4, window_bounds = array<i64: 1, 32>}, {pipeline_mode = #tpu.pipeline_mode<synchronous>, transform_indices = @transform_5, window_bounds = array<i64: 1, 32>}, {pipeline_mode = #tpu.pipeline_mode<synchronous>, transform_indices = @transform_6, window_bounds = array<i64: 1, 32>}, {pipeline_mode = #tpu.pipeline_mode<synchronous>, transform_indices = @transform_7, window_bounds = array<i64: 32, 32>}, {pipeline_mode = #tpu.pipeline_mode<synchronous>, transform_indices = @transform_8, window_bounds = array<i64: 32, 64>}, {pipeline_mode = #tpu.pipeline_mode<synchronous>, transform_indices = @transform_9, window_bounds = array<i64: 32, 32>}, {pipeline_mode = #tpu.pipeline_mode<synchronous>, transform_indices = @transform_10, window_bounds = array<i64: 1, 32>}, {transform_indices = @transform_11, window_bounds = array<i64: 1, 1>}, {transform_indices = @transform_12, window_bounds = array<i64: 1, 16, 32>}]} {
    %c0_i32 = arith.constant 0 : i32
    %0 = arith.cmpi eq, %arg1, %c0_i32 : i32
    %1 = arith.extui %0 : i1 to i32
    %c0_i32_0 = arith.constant 0 : i32
    %2 = arith.cmpi ne, %1, %c0_i32_0 : i32
    scf.if %2 {
      %c0_51 = arith.constant 0 : index
      %c0_52 = arith.constant 0 : index
      %c0_53 = arith.constant 0 : index
      %88 = vector.load %arg4[%c0_51, %c0_52, %c0_53] : memref<1x8x16xf32, #tpu.memory_space<vmem>>, vector<1x8x16xf32>
      %89 = vector.shape_cast %88 : vector<1x8x16xf32> to vector<8x16xf32>
      %90 = arith.truncf %89 : vector<8x16xf32> to vector<8x16xbf16>
      %c0_54 = arith.constant 0 : index
      %c0_55 = arith.constant 0 : index
      %91 = vector.load %arg5[%c0_54, %c0_55] : memref<16x32xbf16, #tpu.memory_space<vmem>>, vector<16x32xbf16>
      %cst_56 = arith.constant dense<0.000000e+00> : vector<8x32xf32>
      %92 = tpu.matmul %90, %91, %cst_56 {dimension_numbers = #tpu.dot_dimension_numbers<[1], [0], [0], [1], [0, 0, 1, 1], [], []>} : vector<8x16xbf16>, vector<16x32xbf16>, vector<8x32xf32> -> vector<8x32xf32>
      %c0_57 = arith.constant 0 : index
      %c0_58 = arith.constant 0 : index
      %93 = vector.load %arg6[%c0_57, %c0_58] : memref<1x32xf32, #tpu.memory_space<vmem>>, vector<1x32xf32>
      %94 = vector.broadcast %93 : vector<1x32xf32> to vector<8x32xf32>
      %95 = arith.addf %92, %94 : vector<8x32xf32>
      %cst_59 = arith.constant dense<0.000000e+00> : vector<8xf32>
      %96 = vector.multi_reduction <add>, %95, %cst_59 [1] : vector<8x32xf32> to vector<8xf32>
      %97 = vector.shape_cast %96 : vector<8xf32> to vector<8x1xf32>
      %cst_60 = arith.constant 3.200000e+01 : f32
      %98 = vector.broadcast %cst_60 : f32 to vector<8x1xf32>
      %99 = arith.divf %97, %98 : vector<8x1xf32>
      %100 = vector.broadcast %99 : vector<8x1xf32> to vector<8x32xf32>
      %101 = arith.subf %95, %100 : vector<8x32xf32>
      %102 = arith.mulf %101, %101 : vector<8x32xf32>
      %cst_61 = arith.constant dense<0.000000e+00> : vector<8xf32>
      %103 = vector.multi_reduction <add>, %102, %cst_61 [1] : vector<8x32xf32> to vector<8xf32>
      %104 = vector.shape_cast %103 : vector<8xf32> to vector<8x1xf32>
      %cst_62 = arith.constant 3.200000e+01 : f32
      %105 = vector.broadcast %cst_62 : f32 to vector<8x1xf32>
      %106 = arith.divf %104, %105 : vector<8x1xf32>
      %107 = vector.broadcast %99 : vector<8x1xf32> to vector<8x32xf32>
      %108 = arith.subf %95, %107 : vector<8x32xf32>
      %cst_63 = arith.constant 9.99999974E-6 : f32
      %109 = vector.broadcast %cst_63 : f32 to vector<8x1xf32>
      %110 = arith.addf %106, %109 : vector<8x1xf32>
      %111 = math.rsqrt %110 : vector<8x1xf32>
      %112 = vector.broadcast %111 : vector<8x1xf32> to vector<8x32xf32>
      %113 = arith.mulf %108, %112 : vector<8x32xf32>
      %c0_64 = arith.constant 0 : index
      %c0_65 = arith.constant 0 : index
      %114 = vector.load %arg7[%c0_64, %c0_65] : memref<1x32xf32, #tpu.memory_space<vmem>>, vector<1x32xf32>
      %115 = vector.broadcast %114 : vector<1x32xf32> to vector<8x32xf32>
      %116 = arith.mulf %113, %115 : vector<8x32xf32>
      %c0_66 = arith.constant 0 : index
      %c0_67 = arith.constant 0 : index
      %117 = vector.load %arg8[%c0_66, %c0_67] : memref<1x32xf32, #tpu.memory_space<vmem>>, vector<1x32xf32>
      %118 = vector.broadcast %117 : vector<1x32xf32> to vector<8x32xf32>
      %119 = arith.addf %116, %118 : vector<8x32xf32>
      %120 = arith.truncf %119 : vector<8x32xf32> to vector<8x32xbf16>
      %c0_68 = arith.constant 0 : index
      %c0_69 = arith.constant 0 : index
      %121 = vector.load %arg10[%c0_68, %c0_69] : memref<32x64xbf16, #tpu.memory_space<vmem>>, vector<32x64xbf16>
      %cst_70 = arith.constant dense<0.000000e+00> : vector<8x64xf32>
      %122 = tpu.matmul %120, %121, %cst_70 {dimension_numbers = #tpu.dot_dimension_numbers<[1], [0], [0], [1], [0, 0, 1, 1], [], []>} : vector<8x32xbf16>, vector<32x64xbf16>, vector<8x64xf32> -> vector<8x64xf32>
      %123 = vector.extract_strided_slice %122 {offsets = [0, 0], sizes = [8, 16], strides = [1, 1]} : vector<8x64xf32> to vector<8x16xf32>
      %124 = arith.truncf %123 : vector<8x16xf32> to vector<8x16xbf16>
      %c0_71 = arith.constant 0 : index
      %c16_72 = arith.constant 16 : index
      %c0_73 = arith.constant 0 : index
      %125 = vector.load %arg15[%c0_71, %c16_72, %c0_73] : memref<2x24x16xbf16, #tpu.memory_space<vmem>>, vector<1x8x16xbf16>
      %126 = vector.shape_cast %125 : vector<1x8x16xbf16> to vector<8x16xbf16>
      %127 = vector.shape_cast %124 : vector<8x16xbf16> to vector<1x8x16xbf16>
      tpu.vector_store %arg15[%c0_71, %c16_72, %c0_73], %127 {strides = array<i32>} : memref<2x24x16xbf16, #tpu.memory_space<vmem>>, vector<1x8x16xbf16>,
      %128 = vector.extract_strided_slice %122 {offsets = [0, 32], sizes = [8, 16], strides = [1, 1]} : vector<8x64xf32> to vector<8x16xf32>
      %129 = arith.truncf %128 : vector<8x16xf32> to vector<8x16xbf16>
      %c0_74 = arith.constant 0 : index
      %c16_75 = arith.constant 16 : index
      %c0_76 = arith.constant 0 : index
      %130 = vector.load %arg16[%c0_74, %c16_75, %c0_76] : memref<2x24x16xbf16, #tpu.memory_space<vmem>>, vector<1x8x16xbf16>
      %131 = vector.shape_cast %130 : vector<1x8x16xbf16> to vector<8x16xbf16>
      %132 = vector.shape_cast %129 : vector<8x16xbf16> to vector<1x8x16xbf16>
      tpu.vector_store %arg16[%c0_74, %c16_75, %c0_76], %132 {strides = array<i32>} : memref<2x24x16xbf16, #tpu.memory_space<vmem>>, vector<1x8x16xbf16>,
      %133 = vector.extract_strided_slice %122 {offsets = [0, 16], sizes = [8, 16], strides = [1, 1]} : vector<8x64xf32> to vector<8x16xf32>
      %134 = arith.truncf %133 : vector<8x16xf32> to vector<8x16xbf16>
      %c1_77 = arith.constant 1 : index
      %c16_78 = arith.constant 16 : index
      %c0_79 = arith.constant 0 : index
      %135 = vector.load %arg15[%c1_77, %c16_78, %c0_79] : memref<2x24x16xbf16, #tpu.memory_space<vmem>>, vector<1x8x16xbf16>
      %136 = vector.shape_cast %135 : vector<1x8x16xbf16> to vector<8x16xbf16>
      %137 = vector.shape_cast %134 : vector<8x16xbf16> to vector<1x8x16xbf16>
      tpu.vector_store %arg15[%c1_77, %c16_78, %c0_79], %137 {strides = array<i32>} : memref<2x24x16xbf16, #tpu.memory_space<vmem>>, vector<1x8x16xbf16>,
      %138 = vector.extract_strided_slice %122 {offsets = [0, 48], sizes = [8, 16], strides = [1, 1]} : vector<8x64xf32> to vector<8x16xf32>
      %139 = arith.truncf %138 : vector<8x16xf32> to vector<8x16xbf16>
      %c1_80 = arith.constant 1 : index
      %c16_81 = arith.constant 16 : index
      %c0_82 = arith.constant 0 : index
      %140 = vector.load %arg16[%c1_80, %c16_81, %c0_82] : memref<2x24x16xbf16, #tpu.memory_space<vmem>>, vector<1x8x16xbf16>
      %141 = vector.shape_cast %140 : vector<1x8x16xbf16> to vector<8x16xbf16>
      %142 = vector.shape_cast %139 : vector<8x16xbf16> to vector<1x8x16xbf16>
      tpu.vector_store %arg16[%c1_80, %c16_81, %c0_82], %142 {strides = array<i32>} : memref<2x24x16xbf16, #tpu.memory_space<vmem>>, vector<1x8x16xbf16>,
      %c0_83 = arith.constant 0 : index
      %c0_84 = arith.constant 0 : index
      %c0_85 = arith.constant 0 : index
      %143 = vector.load %arg3[%c0_83, %c0_84, %c0_85] : memref<1x16x32xf32, #tpu.memory_space<vmem>>, vector<1x16x32xf32>
      %144 = vector.shape_cast %143 : vector<1x16x32xf32> to vector<16x32xf32>
      %cst_86 = arith.constant dense<0.000000e+00> : vector<16xf32>
      %145 = vector.multi_reduction <add>, %144, %cst_86 [1] : vector<16x32xf32> to vector<16xf32>
      %146 = vector.shape_cast %145 : vector<16xf32> to vector<16x1xf32>
      %cst_87 = arith.constant 3.200000e+01 : f32
      %147 = vector.broadcast %cst_87 : f32 to vector<16x1xf32>
      %148 = arith.divf %146, %147 : vector<16x1xf32>
      %149 = vector.broadcast %148 : vector<16x1xf32> to vector<16x32xf32>
      %150 = arith.subf %144, %149 : vector<16x32xf32>
      %151 = arith.mulf %150, %150 : vector<16x32xf32>
      %cst_88 = arith.constant dense<0.000000e+00> : vector<16xf32>
      %152 = vector.multi_reduction <add>, %151, %cst_88 [1] : vector<16x32xf32> to vector<16xf32>
      %153 = vector.shape_cast %152 : vector<16xf32> to vector<16x1xf32>
      %cst_89 = arith.constant 3.200000e+01 : f32
      %154 = vector.broadcast %cst_89 : f32 to vector<16x1xf32>
      %155 = arith.divf %153, %154 : vector<16x1xf32>
      %156 = vector.broadcast %148 : vector<16x1xf32> to vector<16x32xf32>
      %157 = arith.subf %144, %156 : vector<16x32xf32>
      %cst_90 = arith.constant 9.99999974E-6 : f32
      %158 = vector.broadcast %cst_90 : f32 to vector<16x1xf32>
      %159 = arith.addf %155, %158 : vector<16x1xf32>
      %160 = math.rsqrt %159 : vector<16x1xf32>
      %161 = vector.broadcast %160 : vector<16x1xf32> to vector<16x32xf32>
      %162 = arith.mulf %157, %161 : vector<16x32xf32>
      %c0_91 = arith.constant 0 : index
      %c0_92 = arith.constant 0 : index
      %163 = vector.load %arg7[%c0_91, %c0_92] : memref<1x32xf32, #tpu.memory_space<vmem>>, vector<1x32xf32>
      %164 = vector.broadcast %163 : vector<1x32xf32> to vector<16x32xf32>
      %165 = arith.mulf %162, %164 : vector<16x32xf32>
      %c0_93 = arith.constant 0 : index
      %c0_94 = arith.constant 0 : index
      %166 = vector.load %arg8[%c0_93, %c0_94] : memref<1x32xf32, #tpu.memory_space<vmem>>, vector<1x32xf32>
      %167 = vector.broadcast %166 : vector<1x32xf32> to vector<16x32xf32>
      %168 = arith.addf %165, %167 : vector<16x32xf32>
      %169 = arith.truncf %168 : vector<16x32xf32> to vector<16x32xbf16>
      %c0_95 = arith.constant 0 : index
      %c0_96 = arith.constant 0 : index
      %170 = vector.load %arg10[%c0_95, %c0_96] : memref<32x64xbf16, #tpu.memory_space<vmem>>, vector<32x64xbf16>
      %cst_97 = arith.constant dense<0.000000e+00> : vector<16x64xf32>
      %171 = tpu.matmul %169, %170, %cst_97 {dimension_numbers = #tpu.dot_dimension_numbers<[1], [0], [0], [1], [0, 0, 1, 1], [], []>} : vector<16x32xbf16>, vector<32x64xbf16>, vector<16x64xf32> -> vector<16x64xf32>
      %172 = vector.extract_strided_slice %171 {offsets = [0, 0], sizes = [16, 16], strides = [1, 1]} : vector<16x64xf32> to vector<16x16xf32>
      %173 = arith.truncf %172 : vector<16x16xf32> to vector<16x16xbf16>
      %c0_98 = arith.constant 0 : index
      %c0_99 = arith.constant 0 : index
      %c0_100 = arith.constant 0 : index
      %174 = vector.load %arg15[%c0_98, %c0_99, %c0_100] : memref<2x24x16xbf16, #tpu.memory_space<vmem>>, vector<1x16x16xbf16>
      %175 = vector.shape_cast %174 : vector<1x16x16xbf16> to vector<16x16xbf16>
      %176 = vector.shape_cast %173 : vector<16x16xbf16> to vector<1x16x16xbf16>
      tpu.vector_store %arg15[%c0_98, %c0_99, %c0_100], %176 {strides = array<i32>} : memref<2x24x16xbf16, #tpu.memory_space<vmem>>, vector<1x16x16xbf16>,
      %177 = vector.extract_strided_slice %171 {offsets = [0, 32], sizes = [16, 16], strides = [1, 1]} : vector<16x64xf32> to vector<16x16xf32>
      %178 = arith.truncf %177 : vector<16x16xf32> to vector<16x16xbf16>
      %c0_101 = arith.constant 0 : index
      %c0_102 = arith.constant 0 : index
      %c0_103 = arith.constant 0 : index
      %179 = vector.load %arg16[%c0_101, %c0_102, %c0_103] : memref<2x24x16xbf16, #tpu.memory_space<vmem>>, vector<1x16x16xbf16>
      %180 = vector.shape_cast %179 : vector<1x16x16xbf16> to vector<16x16xbf16>
      %181 = vector.shape_cast %178 : vector<16x16xbf16> to vector<1x16x16xbf16>
      tpu.vector_store %arg16[%c0_101, %c0_102, %c0_103], %181 {strides = array<i32>} : memref<2x24x16xbf16, #tpu.memory_space<vmem>>, vector<1x16x16xbf16>,
      %182 = vector.extract_strided_slice %171 {offsets = [0, 16], sizes = [16, 16], strides = [1, 1]} : vector<16x64xf32> to vector<16x16xf32>
      %183 = arith.truncf %182 : vector<16x16xf32> to vector<16x16xbf16>
      %c1_104 = arith.constant 1 : index
      %c0_105 = arith.constant 0 : index
      %c0_106 = arith.constant 0 : index
      %184 = vector.load %arg15[%c1_104, %c0_105, %c0_106] : memref<2x24x16xbf16, #tpu.memory_space<vmem>>, vector<1x16x16xbf16>
      %185 = vector.shape_cast %184 : vector<1x16x16xbf16> to vector<16x16xbf16>
      %186 = vector.shape_cast %183 : vector<16x16xbf16> to vector<1x16x16xbf16>
      tpu.vector_store %arg15[%c1_104, %c0_105, %c0_106], %186 {strides = array<i32>} : memref<2x24x16xbf16, #tpu.memory_space<vmem>>, vector<1x16x16xbf16>,
      %187 = vector.extract_strided_slice %171 {offsets = [0, 48], sizes = [16, 16], strides = [1, 1]} : vector<16x64xf32> to vector<16x16xf32>
      %188 = arith.truncf %187 : vector<16x16xf32> to vector<16x16xbf16>
      %c1_107 = arith.constant 1 : index
      %c0_108 = arith.constant 0 : index
      %c0_109 = arith.constant 0 : index
      %189 = vector.load %arg16[%c1_107, %c0_108, %c0_109] : memref<2x24x16xbf16, #tpu.memory_space<vmem>>, vector<1x16x16xbf16>
      %190 = vector.shape_cast %189 : vector<1x16x16xbf16> to vector<16x16xbf16>
      %191 = vector.shape_cast %188 : vector<16x16xbf16> to vector<1x16x16xbf16>
      tpu.vector_store %arg16[%c1_107, %c0_108, %c0_109], %191 {strides = array<i32>} : memref<2x24x16xbf16, #tpu.memory_space<vmem>>, vector<1x16x16xbf16>,
    } else {
    }
    %c0 = arith.constant 0 : index
    %c0_1 = arith.constant 0 : index
    %c0_2 = arith.constant 0 : index
    %3 = vector.load %arg2[%c0, %c0_1, %c0_2] : memref<1x16x32xf32, #tpu.memory_space<vmem>>, vector<1x16x32xf32>
    %4 = vector.shape_cast %3 : vector<1x16x32xf32> to vector<16x32xf32>
    %cst = arith.constant dense<0.000000e+00> : vector<16xf32>
    %5 = vector.multi_reduction <add>, %4, %cst [1] : vector<16x32xf32> to vector<16xf32>
    %6 = vector.shape_cast %5 : vector<16xf32> to vector<16x1xf32>
    %cst_3 = arith.constant 3.200000e+01 : f32
    %7 = vector.broadcast %cst_3 : f32 to vector<16x1xf32>
    %8 = arith.divf %6, %7 : vector<16x1xf32>
    %9 = vector.broadcast %8 : vector<16x1xf32> to vector<16x32xf32>
    %10 = arith.subf %4, %9 : vector<16x32xf32>
    %11 = arith.mulf %10, %10 : vector<16x32xf32>
    %cst_4 = arith.constant dense<0.000000e+00> : vector<16xf32>
    %12 = vector.multi_reduction <add>, %11, %cst_4 [1] : vector<16x32xf32> to vector<16xf32>
    %13 = vector.shape_cast %12 : vector<16xf32> to vector<16x1xf32>
    %cst_5 = arith.constant 3.200000e+01 : f32
    %14 = vector.broadcast %cst_5 : f32 to vector<16x1xf32>
    %15 = arith.divf %13, %14 : vector<16x1xf32>
    %16 = vector.broadcast %8 : vector<16x1xf32> to vector<16x32xf32>
    %17 = arith.subf %4, %16 : vector<16x32xf32>
    %cst_6 = arith.constant 9.99999974E-6 : f32
    %18 = vector.broadcast %cst_6 : f32 to vector<16x1xf32>
    %19 = arith.addf %15, %18 : vector<16x1xf32>
    %20 = math.rsqrt %19 : vector<16x1xf32>
    %21 = vector.broadcast %20 : vector<16x1xf32> to vector<16x32xf32>
    %22 = arith.mulf %17, %21 : vector<16x32xf32>
    %c0_7 = arith.constant 0 : index
    %c0_8 = arith.constant 0 : index
    %23 = vector.load %arg7[%c0_7, %c0_8] : memref<1x32xf32, #tpu.memory_space<vmem>>, vector<1x32xf32>
    %24 = vector.broadcast %23 : vector<1x32xf32> to vector<16x32xf32>
    %25 = arith.mulf %22, %24 : vector<16x32xf32>
    %c0_9 = arith.constant 0 : index
    %c0_10 = arith.constant 0 : index
    %26 = vector.load %arg8[%c0_9, %c0_10] : memref<1x32xf32, #tpu.memory_space<vmem>>, vector<1x32xf32>
    %27 = vector.broadcast %26 : vector<1x32xf32> to vector<16x32xf32>
    %28 = arith.addf %25, %27 : vector<16x32xf32>
    %29 = arith.truncf %28 : vector<16x32xf32> to vector<16x32xbf16>
    %c0_11 = arith.constant 0 : index
    %c0_12 = arith.constant 0 : index
    %30 = vector.load %arg9[%c0_11, %c0_12] : memref<32x32xbf16, #tpu.memory_space<vmem>>, vector<32x32xbf16>
    %cst_13 = arith.constant dense<0.000000e+00> : vector<16x32xf32>
    %31 = tpu.matmul %29, %30, %cst_13 {dimension_numbers = #tpu.dot_dimension_numbers<[1], [0], [0], [1], [0, 0, 1, 1], [], []>} : vector<16x32xbf16>, vector<32x32xbf16>, vector<16x32xf32> -> vector<16x32xf32>
    %32 = arith.truncf %31 : vector<16x32xf32> to vector<16x32xbf16>
    %33 = vector.extract_strided_slice %32 {offsets = [0, 0], sizes = [16, 16], strides = [1, 1]} : vector<16x32xbf16> to vector<16x16xbf16>
    %c0_14 = arith.constant 0 : index
    %c0_15 = arith.constant 0 : index
    %c0_16 = arith.constant 0 : index
    %34 = vector.load %arg15[%c0_14, %c0_15, %c0_16] : memref<2x24x16xbf16, #tpu.memory_space<vmem>>, vector<1x24x16xbf16>
    %35 = vector.shape_cast %34 : vector<1x24x16xbf16> to vector<24x16xbf16>
    "tpu.trace_start"() <{level = 10 : i32, message = "qd,kd->qk"}> : () -> ()
    %cst_17 = arith.constant dense<0.000000e+00> : vector<16x24xf32>
    %36 = tpu.matmul %33, %35, %cst_17 {dimension_numbers = #tpu.dot_dimension_numbers<[1], [1], [0], [0], [0, 0, 1, 0], [], []>} : vector<16x16xbf16>, vector<24x16xbf16>, vector<16x24xf32> -> vector<16x24xf32>
    "tpu.trace_stop"() : () -> ()
    %cst_18 = arith.constant dense<0xFF800000> : vector<16xf32>
    %37 = vector.multi_reduction <maximumf>, %36, %cst_18 [1] : vector<16x24xf32> to vector<16xf32>
    %38 = vector.shape_cast %37 : vector<16xf32> to vector<16x1xf32>
    %39 = vector.broadcast %38 : vector<16x1xf32> to vector<16x24xf32>
    %40 = arith.subf %36, %39 : vector<16x24xf32>
    %41 = math.exp %40 : vector<16x24xf32>
    %cst_19 = arith.constant dense<0.000000e+00> : vector<16xf32>
    %42 = vector.multi_reduction <add>, %41, %cst_19 [1] : vector<16x24xf32> to vector<16xf32>
    %43 = vector.shape_cast %42 : vector<16xf32> to vector<16x1xf32>
    %44 = tpu.reciprocal %43 {approx = true} : vector<16x1xf32> -> vector<16x1xf32>
    %45 = arith.truncf %41 : vector<16x24xf32> to vector<16x24xbf16>
    %c0_20 = arith.constant 0 : index
    %c0_21 = arith.constant 0 : index
    %c0_22 = arith.constant 0 : index
    %46 = vector.load %arg16[%c0_20, %c0_21, %c0_22] : memref<2x24x16xbf16, #tpu.memory_space<vmem>>, vector<1x24x16xbf16>
    %47 = vector.shape_cast %46 : vector<1x24x16xbf16> to vector<24x16xbf16>
    "tpu.trace_start"() <{level = 10 : i32, message = "qk,kd->qd"}> : () -> ()
    %cst_23 = arith.constant dense<0.000000e+00> : vector<16x16xf32>
    %48 = tpu.matmul %45, %47, %cst_23 {dimension_numbers = #tpu.dot_dimension_numbers<[1], [0], [0], [1], [0, 0, 1, 1], [], []>} : vector<16x24xbf16>, vector<24x16xbf16>, vector<16x16xf32> -> vector<16x16xf32>
    "tpu.trace_stop"() : () -> ()
    %49 = vector.broadcast %44 : vector<16x1xf32> to vector<16x16xf32>
    %50 = arith.mulf %48, %49 : vector<16x16xf32>
    %51 = arith.truncf %50 : vector<16x16xf32> to vector<16x16xbf16>
    %c0_24 = arith.constant 0 : index
    %c0_25 = arith.constant 0 : index
    %52 = vector.load %arg17[%c0_24, %c0_25] : memref<16x32xbf16, #tpu.memory_space<vmem>>, vector<16x16xbf16>
    tpu.vector_store %arg17[%c0_24, %c0_25], %51 {strides = array<i32>} : memref<16x32xbf16, #tpu.memory_space<vmem>>, vector<16x16xbf16>,
    %53 = vector.extract_strided_slice %32 {offsets = [0, 16], sizes = [16, 16], strides = [1, 1]} : vector<16x32xbf16> to vector<16x16xbf16>
    %c1 = arith.constant 1 : index
    %c0_26 = arith.constant 0 : index
    %c0_27 = arith.constant 0 : index
    %54 = vector.load %arg15[%c1, %c0_26, %c0_27] : memref<2x24x16xbf16, #tpu.memory_space<vmem>>, vector<1x24x16xbf16>
    %55 = vector.shape_cast %54 : vector<1x24x16xbf16> to vector<24x16xbf16>
    "tpu.trace_start"() <{level = 10 : i32, message = "qd,kd->qk"}> : () -> ()
    %cst_28 = arith.constant dense<0.000000e+00> : vector<16x24xf32>
    %56 = tpu.matmul %53, %55, %cst_28 {dimension_numbers = #tpu.dot_dimension_numbers<[1], [1], [0], [0], [0, 0, 1, 0], [], []>} : vector<16x16xbf16>, vector<24x16xbf16>, vector<16x24xf32> -> vector<16x24xf32>
    "tpu.trace_stop"() : () -> ()
    %cst_29 = arith.constant dense<0xFF800000> : vector<16xf32>
    %57 = vector.multi_reduction <maximumf>, %56, %cst_29 [1] : vector<16x24xf32> to vector<16xf32>
    %58 = vector.shape_cast %57 : vector<16xf32> to vector<16x1xf32>
    %59 = vector.broadcast %58 : vector<16x1xf32> to vector<16x24xf32>
    %60 = arith.subf %56, %59 : vector<16x24xf32>
    %61 = math.exp %60 : vector<16x24xf32>
    %cst_30 = arith.constant dense<0.000000e+00> : vector<16xf32>
    %62 = vector.multi_reduction <add>, %61, %cst_30 [1] : vector<16x24xf32> to vector<16xf32>
    %63 = vector.shape_cast %62 : vector<16xf32> to vector<16x1xf32>
    %64 = tpu.reciprocal %63 {approx = true} : vector<16x1xf32> -> vector<16x1xf32>
    %65 = arith.truncf %61 : vector<16x24xf32> to vector<16x24xbf16>
    %c1_31 = arith.constant 1 : index
    %c0_32 = arith.constant 0 : index
    %c0_33 = arith.constant 0 : index
    %66 = vector.load %arg16[%c1_31, %c0_32, %c0_33] : memref<2x24x16xbf16, #tpu.memory_space<vmem>>, vector<1x24x16xbf16>
    %67 = vector.shape_cast %66 : vector<1x24x16xbf16> to vector<24x16xbf16>
    "tpu.trace_start"() <{level = 10 : i32, message = "qk,kd->qd"}> : () -> ()
    %cst_34 = arith.constant dense<0.000000e+00> : vector<16x16xf32>
    %68 = tpu.matmul %65, %67, %cst_34 {dimension_numbers = #tpu.dot_dimension_numbers<[1], [0], [0], [1], [0, 0, 1, 1], [], []>} : vector<16x24xbf16>, vector<24x16xbf16>, vector<16x16xf32> -> vector<16x16xf32>
    "tpu.trace_stop"() : () -> ()
    %69 = vector.broadcast %64 : vector<16x1xf32> to vector<16x16xf32>
    %70 = arith.mulf %68, %69 : vector<16x16xf32>
    %71 = arith.truncf %70 : vector<16x16xf32> to vector<16x16xbf16>
    %c0_35 = arith.constant 0 : index
    %c16 = arith.constant 16 : index
    %72 = vector.load %arg17[%c0_35, %c16] : memref<16x32xbf16, #tpu.memory_space<vmem>>, vector<16x16xbf16>
    tpu.vector_store %arg17[%c0_35, %c16], %71 {strides = array<i32>} : memref<16x32xbf16, #tpu.memory_space<vmem>>, vector<16x16xbf16>,
    %c0_36 = arith.constant 0 : index
    %c0_37 = arith.constant 0 : index
    %73 = vector.load %arg17[%c0_36, %c0_37] : memref<16x32xbf16, #tpu.memory_space<vmem>>, vector<16x32xbf16>
    %c0_38 = arith.constant 0 : index
    %c0_39 = arith.constant 0 : index
    %74 = vector.load %arg11[%c0_38, %c0_39] : memref<32x32xbf16, #tpu.memory_space<vmem>>, vector<32x32xbf16>
    %cst_40 = arith.constant dense<0.000000e+00> : vector<16x32xf32>
    %75 = tpu.matmul %73, %74, %cst_40 {dimension_numbers = #tpu.dot_dimension_numbers<[1], [0], [0], [1], [0, 0, 1, 1], [], []>} : vector<16x32xbf16>, vector<32x32xbf16>, vector<16x32xf32> -> vector<16x32xf32>
    %c0_41 = arith.constant 0 : index
    %c0_42 = arith.constant 0 : index
    %76 = vector.load %arg12[%c0_41, %c0_42] : memref<1x32xf32, #tpu.memory_space<vmem>>, vector<1x32xf32>
    %77 = vector.broadcast %76 : vector<1x32xf32> to vector<16x32xf32>
    %78 = arith.addf %75, %77 : vector<16x32xf32>
    %c0_43 = arith.constant 0 : index
    %c0_44 = arith.constant 0 : index
    %c0_45 = arith.constant 0 : index
    %79 = vector.load %arg2[%c0_43, %c0_44, %c0_45] : memref<1x16x32xf32, #tpu.memory_space<vmem>>, vector<1x16x32xf32>
    %80 = vector.shape_cast %79 : vector<1x16x32xf32> to vector<16x32xf32>
    %c0_46 = arith.constant 0 : index
    %c0_47 = arith.constant 0 : index
    %81 = memref.load %arg13[%c0_46, %c0_47] : memref<1x1xf32, #tpu.memory_space<smem>>
    %82 = vector.broadcast %81 : f32 to vector<16x32xf32>
    %83 = arith.mulf %82, %78 : vector<16x32xf32>
    %84 = arith.addf %80, %83 : vector<16x32xf32>
    %c0_48 = arith.constant 0 : index
    %c0_49 = arith.constant 0 : index
    %c0_50 = arith.constant 0 : index
    %85 = vector.load %arg14[%c0_48, %c0_49, %c0_50] : memref<1x16x32xf32, #tpu.memory_space<vmem>>, vector<1x16x32xf32>
    %86 = vector.shape_cast %85 : vector<1x16x32xf32> to vector<16x32xf32>
    %87 = vector.shape_cast %84 : vector<16x32xf32> to vector<1x16x32xf32>
    tpu.vector_store %arg14[%c0_48, %c0_49, %c0_50], %87 {strides = array<i32>} : memref<1x16x32xf32, #tpu.memory_space<vmem>>, vector<1x16x32xf32>,
    return
  }
  func.func @transform_0(%arg0: i32, %arg1: i32) -> (i32, i32, i32) {
    %c0_i32 = arith.constant 0 : i32
    %c0_i32_0 = arith.constant 0 : i32
    return %arg0, %arg1, %c0_i32 : i32, i32, i32
  }
  func.func @transform_1(%arg0: i32, %arg1: i32) -> (i32, i32, i32) {
    %c0_i32 = arith.constant 0 : i32
    %c0_i32_0 = arith.constant 0 : i32
    %c0_i32_1 = arith.constant 0 : i32
    return %arg0, %c0_i32, %c0_i32_0 : i32, i32, i32
  }
  func.func @transform_2(%arg0: i32, %arg1: i32) -> (i32, i32, i32) {
    %c0_i32 = arith.constant 0 : i32
    %c0_i32_0 = arith.constant 0 : i32
    %c0_i32_1 = arith.constant 0 : i32
    return %arg0, %c0_i32, %c0_i32_0 : i32, i32, i32
  }
  func.func @transform_3(%arg0: i32, %arg1: i32) -> (i32, i32) {
    %c0_i32 = arith.constant 0 : i32
    %c0_i32_0 = arith.constant 0 : i32
    %c0_i32_1 = arith.constant 0 : i32
    return %c0_i32, %c0_i32_0 : i32, i32
  }
  func.func @transform_4(%arg0: i32, %arg1: i32) -> (i32, i32) {
    %c0_i32 = arith.constant 0 : i32
    %c0_i32_0 = arith.constant 0 : i32
    %c0_i32_1 = arith.constant 0 : i32
    return %c0_i32, %c0_i32_0 : i32, i32
  }
  func.func @transform_5(%arg0: i32, %arg1: i32) -> (i32, i32) {
    %c0_i32 = arith.constant 0 : i32
    %c0_i32_0 = arith.constant 0 : i32
    %c0_i32_1 = arith.constant 0 : i32
    return %c0_i32, %c0_i32_0 : i32, i32
  }
  func.func @transform_6(%arg0: i32, %arg1: i32) -> (i32, i32) {
    %c0_i32 = arith.constant 0 : i32
    %c0_i32_0 = arith.constant 0 : i32
    %c0_i32_1 = arith.constant 0 : i32
    return %c0_i32, %c0_i32_0 : i32, i32
  }
  func.func @transform_7(%arg0: i32, %arg1: i32) -> (i32, i32) {
    %c0_i32 = arith.constant 0 : i32
    %c0_i32_0 = arith.constant 0 : i32
    %c0_i32_1 = arith.constant 0 : i32
    return %c0_i32, %c0_i32_0 : i32, i32
  }
  func.func @transform_8(%arg0: i32, %arg1: i32) -> (i32, i32) {
    %c0_i32 = arith.constant 0 : i32
    %c0_i32_0 = arith.constant 0 : i32
    %c0_i32_1 = arith.constant 0 : i32
    return %c0_i32, %c0_i32_0 : i32, i32
  }
  func.func @transform_9(%arg0: i32, %arg1: i32) -> (i32, i32) {
    %c0_i32 = arith.constant 0 : i32
    %c0_i32_0 = arith.constant 0 : i32
    %c0_i32_1 = arith.constant 0 : i32
    return %c0_i32, %c0_i32_0 : i32, i32
  }
  func.func @transform_10(%arg0: i32, %arg1: i32) -> (i32, i32) {
    %c0_i32 = arith.constant 0 : i32
    %c0_i32_0 = arith.constant 0 : i32
    %c0_i32_1 = arith.constant 0 : i32
    return %c0_i32, %c0_i32_0 : i32, i32
  }
  func.func @transform_11(%arg0: i32, %arg1: i32) -> (i32, i32) {
    %c0_i32 = arith.constant 0 : i32
    %c0_i32_0 = arith.constant 0 : i32
    %c0_i32_1 = arith.constant 0 : i32
    return %c0_i32, %c0_i32_0 : i32, i32
  }
  func.func @transform_12(%arg0: i32, %arg1: i32) -> (i32, i32, i32) {
    %c0_i32 = arith.constant 0 : i32
    %c0_i32_0 = arith.constant 0 : i32
    return %arg0, %arg1, %c0_i32 : i32, i32, i32
  }
}

module attributes {stable_mosaic.version = 11 : i64} {
  func.func @_attn_kernel(%arg0: i32, %arg1: i32, %arg2: memref<1x16x32xf32, #tpu.memory_space<vmem>>, %arg3: memref<1x16x32xf32, #tpu.memory_space<vmem>>, %arg4: memref<1x8x16xf32, #tpu.memory_space<vmem>>, %arg5: memref<16x32xbf16, #tpu.memory_space<vmem>>, %arg6: memref<1x32xf32, #tpu.memory_space<vmem>>, %arg7: memref<1x32xf32, #tpu.memory_space<vmem>>, %arg8: memref<1x32xf32, #tpu.memory_space<vmem>>, %arg9: memref<32x32xbf16, #tpu.memory_space<vmem>>, %arg10: memref<32x64xbf16, #tpu.memory_space<vmem>>, %arg11: memref<32x32xbf16, #tpu.memory_space<vmem>>, %arg12: memref<1x32xf32, #tpu.memory_space<vmem>>, %arg13: memref<1x1xf32, #tpu.memory_space<smem>>, %arg14: memref<1x16x32xf32, #tpu.memory_space<vmem>>, %arg15: memref<2x24x16xbf16, #tpu.memory_space<vmem>>, %arg16: memref<2x24x16xbf16, #tpu.memory_space<vmem>>, %arg17: memref<16x32xbf16, #tpu.memory_space<vmem>>) attributes {dimension_semantics = [#tpu.dimension_semantics<parallel>, #tpu.dimension_semantics<arbitrary>], iteration_bounds = array<i64: 2, 1>, scalar_prefetch = 0 : i64, scratch_operands = 3 : i64, tpu.core_type = #tpu.core_type<tc>, window_params = [{transform_indices = @transform_0, window_bounds = array<i64: 1, 16, 32>}, {transform_indices = @transform_1, window_bounds = array<i64: 1, 16, 32>}, {transform_indices = @transform_2, window_bounds = array<i64: 1, 8, 16>}, {pipeline_mode = #tpu.pipeline_mode<synchronous>, transform_indices = @transform_3, window_bounds = array<i64: 16, 32>}, {pipeline_mode = #tpu.pipeline_mode<synchronous>, transform_indices = @transform_4, window_bounds = array<i64: 1, 32>}, {pipeline_mode = #tpu.pipeline_mode<synchronous>, transform_indices = @transform_5, window_bounds = array<i64: 1, 32>}, {pipeline_mode = #tpu.pipeline_mode<synchronous>, transform_indices = @transform_6, window_bounds = array<i64: 1, 32>}, {pipeline_mode = #tpu.pipeline_mode<synchronous>, transform_indices = @transform_7, window_bounds = array<i64: 32, 32>}, {pipeline_mode = #tpu.pipeline_mode<synchronous>, transform_indices = @transform_8, window_bounds = array<i64: 32, 64>}, {pipeline_mode = #tpu.pipeline_mode<synchronous>, transform_indices = @transform_9, window_bounds = array<i64: 32, 32>}, {pipeline_mode = #tpu.pipeline_mode<synchronous>, transform_indices = @transform_10, window_bounds = array<i64: 1, 32>}, {transform_indices = @transform_11, window_bounds = array<i64: 1, 1>}, {transform_indices = @transform_12, window_bounds = array<i64: 1, 16, 32>}]} {
    %c0_i32 = arith.constant 0 : i32
    %0 = arith.cmpi eq, %arg1, %c0_i32 : i32
    %1 = arith.extui %0 : i1 to i32
    %c0_i32_0 = arith.constant 0 : i32
    %2 = arith.cmpi ne, %1, %c0_i32_0 : i32
    scf.if %2 {
      %c0_51 = arith.constant 0 : index
      %c0_52 = arith.constant 0 : index
      %c0_53 = arith.constant 0 : index
      %88 = vector.load %arg4[%c0_51, %c0_52, %c0_53] : memref<1x8x16xf32, #tpu.memory_space<vmem>>, vector<1x8x16xf32>
      %89 = vector.shape_cast %88 : vector<1x8x16xf32> to vector<8x16xf32>
      %90 = arith.truncf %89 : vector<8x16xf32> to vector<8x16xbf16>
      %c0_54 = arith.constant 0 : index
      %c0_55 = arith.constant 0 : index
      %91 = vector.load %arg5[%c0_54, %c0_55] : memref<16x32xbf16, #tpu.memory_space<vmem>>, vector<16x32xbf16>
      %cst_56 = arith.constant dense<0.000000e+00> : vector<8x32xf32>
      %92 = tpu.matmul %90, %91, %cst_56 {dimension_numbers = #tpu.dot_dimension_numbers<[1], [0], [0], [1], [0, 0, 1, 1], [], []>} : vector<8x16xbf16>, vector<16x32xbf16>, vector<8x32xf32> -> vector<8x32xf32>
      %c0_57 = arith.constant 0 : index
      %c0_58 = arith.constant 0 : index
      %93 = vector.load %arg6[%c0_57, %c0_58] : memref<1x32xf32, #tpu.memory_space<vmem>>, vector<1x32xf32>
      %94 = vector.broadcast %93 : vector<1x32xf32> to vector<8x32xf32>
      %95 = arith.addf %92, %94 : vector<8x32xf32>
      %cst_59 = arith.constant dense<0.000000e+00> : vector<8xf32>
      %96 = vector.multi_reduction <add>, %95, %cst_59 [1] : vector<8x32xf32> to vector<8xf32>
      %97 = vector.shape_cast %96 : vector<8xf32> to vector<8x1xf32>
      %cst_60 = arith.constant 3.200000e+01 : f32
      %98 = vector.broadcast %cst_60 : f32 to vector<8x1xf32>
      %99 = arith.divf %97, %98 : vector<8x1xf32>
      %100 = vector.broadcast %99 : vector<8x1xf32> to vector<8x32xf32>
      %101 = arith.subf %95, %100 : vector<8x32xf32>
      %102 = arith.mulf %101, %101 : vector<8x32xf32>
      %cst_61 = arith.constant dense<0.000000e+00> : vector<8xf32>
      %103 = vector.multi_reduction <add>, %102, %cst_61 [1] : vector<8x32xf32> to vector<8xf32>
      %104 = vector.shape_cast %103 : vector<8xf32> to vector<8x1xf32>
      %cst_62 = arith.constant 3.200000e+01 : f32
      %105 = vector.broadcast %cst_62 : f32 to vector<8x1xf32>
      %106 = arith.divf %104, %105 : vector<8x1xf32>
      %107 = vector.broadcast %99 : vector<8x1xf32> to vector<8x32xf32>
      %108 = arith.subf %95, %107 : vector<8x32xf32>
      %cst_63 = arith.constant 9.99999974E-6 : f32
      %109 = vector.broadcast %cst_63 : f32 to vector<8x1xf32>
      %110 = arith.addf %106, %109 : vector<8x1xf32>
      %111 = math.rsqrt %110 : vector<8x1xf32>
      %112 = vector.broadcast %111 : vector<8x1xf32> to vector<8x32xf32>
      %113 = arith.mulf %108, %112 : vector<8x32xf32>
      %c0_64 = arith.constant 0 : index
      %c0_65 = arith.constant 0 : index
      %114 = vector.load %arg7[%c0_64, %c0_65] : memref<1x32xf32, #tpu.memory_space<vmem>>, vector<1x32xf32>
      %115 = vector.broadcast %114 : vector<1x32xf32> to vector<8x32xf32>
      %116 = arith.mulf %113, %115 : vector<8x32xf32>
      %c0_66 = arith.constant 0 : index
      %c0_67 = arith.constant 0 : index
      %117 = vector.load %arg8[%c0_66, %c0_67] : memref<1x32xf32, #tpu.memory_space<vmem>>, vector<1x32xf32>
      %118 = vector.broadcast %117 : vector<1x32xf32> to vector<8x32xf32>
      %119 = arith.addf %116, %118 : vector<8x32xf32>
      %120 = arith.truncf %119 : vector<8x32xf32> to vector<8x32xbf16>
      %c0_68 = arith.constant 0 : index
      %c0_69 = arith.constant 0 : index
      %121 = vector.load %arg10[%c0_68, %c0_69] : memref<32x64xbf16, #tpu.memory_space<vmem>>, vector<32x64xbf16>
      %cst_70 = arith.constant dense<0.000000e+00> : vector<8x64xf32>
      %122 = tpu.matmul %120, %121, %cst_70 {dimension_numbers = #tpu.dot_dimension_numbers<[1], [0], [0], [1], [0, 0, 1, 1], [], []>} : vector<8x32xbf16>, vector<32x64xbf16>, vector<8x64xf32> -> vector<8x64xf32>
      %123 = vector.extract_strided_slice %122 {offsets = [0, 0], sizes = [8, 16], strides = [1, 1]} : vector<8x64xf32> to vector<8x16xf32>
      %124 = arith.truncf %123 : vector<8x16xf32> to vector<8x16xbf16>
      %c0_71 = arith.constant 0 : index
      %c16_72 = arith.constant 16 : index
      %c0_73 = arith.constant 0 : index
      %125 = vector.load %arg15[%c0_71, %c16_72, %c0_73] : memref<2x24x16xbf16, #tpu.memory_space<vmem>>, vector<1x8x16xbf16>
      %126 = vector.shape_cast %125 : vector<1x8x16xbf16> to vector<8x16xbf16>
      %127 = vector.shape_cast %124 : vector<8x16xbf16> to vector<1x8x16xbf16>
      tpu.vector_store %arg15[%c0_71, %c16_72, %c0_73], %127 {strides = array<i32>} : memref<2x24x16xbf16, #tpu.memory_space<vmem>>, vector<1x8x16xbf16>,
      %128 = vector.extract_strided_slice %122 {offsets = [0, 32], sizes = [8, 16], strides = [1, 1]} : vector<8x64xf32> to vector<8x16xf32>
      %129 = arith.truncf %128 : vector<8x16xf32> to vector<8x16xbf16>
      %c0_74 = arith.constant 0 : index
      %c16_75 = arith.constant 16 : index
      %c0_76 = arith.constant 0 : index
      %130 = vector.load %arg16[%c0_74, %c16_75, %c0_76] : memref<2x24x16xbf16, #tpu.memory_space<vmem>>, vector<1x8x16xbf16>
      %131 = vector.shape_cast %130 : vector<1x8x16xbf16> to vector<8x16xbf16>
      %132 = vector.shape_cast %129 : vector<8x16xbf16> to vector<1x8x16xbf16>
      tpu.vector_store %arg16[%c0_74, %c16_75, %c0_76], %132 {strides = array<i32>} : memref<2x24x16xbf16, #tpu.memory_space<vmem>>, vector<1x8x16xbf16>,
      %133 = vector.extract_strided_slice %122 {offsets = [0, 16], sizes = [8, 16], strides = [1, 1]} : vector<8x64xf32> to vector<8x16xf32>
      %134 = arith.truncf %133 : vector<8x16xf32> to vector<8x16xbf16>
      %c1_77 = arith.constant 1 : index
      %c16_78 = arith.constant 16 : index
      %c0_79 = arith.constant 0 : index
      %135 = vector.load %arg15[%c1_77, %c16_78, %c0_79] : memref<2x24x16xbf16, #tpu.memory_space<vmem>>, vector<1x8x16xbf16>
      %136 = vector.shape_cast %135 : vector<1x8x16xbf16> to vector<8x16xbf16>
      %137 = vector.shape_cast %134 : vector<8x16xbf16> to vector<1x8x16xbf16>
      tpu.vector_store %arg15[%c1_77, %c16_78, %c0_79], %137 {strides = array<i32>} : memref<2x24x16xbf16, #tpu.memory_space<vmem>>, vector<1x8x16xbf16>,
      %138 = vector.extract_strided_slice %122 {offsets = [0, 48], sizes = [8, 16], strides = [1, 1]} : vector<8x64xf32> to vector<8x16xf32>
      %139 = arith.truncf %138 : vector<8x16xf32> to vector<8x16xbf16>
      %c1_80 = arith.constant 1 : index
      %c16_81 = arith.constant 16 : index
      %c0_82 = arith.constant 0 : index
      %140 = vector.load %arg16[%c1_80, %c16_81, %c0_82] : memref<2x24x16xbf16, #tpu.memory_space<vmem>>, vector<1x8x16xbf16>
      %141 = vector.shape_cast %140 : vector<1x8x16xbf16> to vector<8x16xbf16>
      %142 = vector.shape_cast %139 : vector<8x16xbf16> to vector<1x8x16xbf16>
      tpu.vector_store %arg16[%c1_80, %c16_81, %c0_82], %142 {strides = array<i32>} : memref<2x24x16xbf16, #tpu.memory_space<vmem>>, vector<1x8x16xbf16>,
      %c0_83 = arith.constant 0 : index
      %c0_84 = arith.constant 0 : index
      %c0_85 = arith.constant 0 : index
      %143 = vector.load %arg3[%c0_83, %c0_84, %c0_85] : memref<1x16x32xf32, #tpu.memory_space<vmem>>, vector<1x16x32xf32>
      %144 = vector.shape_cast %143 : vector<1x16x32xf32> to vector<16x32xf32>
      %cst_86 = arith.constant dense<0.000000e+00> : vector<16xf32>
      %145 = vector.multi_reduction <add>, %144, %cst_86 [1] : vector<16x32xf32> to vector<16xf32>
      %146 = vector.shape_cast %145 : vector<16xf32> to vector<16x1xf32>
      %cst_87 = arith.constant 3.200000e+01 : f32
      %147 = vector.broadcast %cst_87 : f32 to vector<16x1xf32>
      %148 = arith.divf %146, %147 : vector<16x1xf32>
      %149 = vector.broadcast %148 : vector<16x1xf32> to vector<16x32xf32>
      %150 = arith.subf %144, %149 : vector<16x32xf32>
      %151 = arith.mulf %150, %150 : vector<16x32xf32>
      %cst_88 = arith.constant dense<0.000000e+00> : vector<16xf32>
      %152 = vector.multi_reduction <add>, %151, %cst_88 [1] : vector<16x32xf32> to vector<16xf32>
      %153 = vector.shape_cast %152 : vector<16xf32> to vector<16x1xf32>
      %cst_89 = arith.constant 3.200000e+01 : f32
      %154 = vector.broadcast %cst_89 : f32 to vector<16x1xf32>
      %155 = arith.divf %153, %154 : vector<16x1xf32>
      %156 = vector.broadcast %148 : vector<16x1xf32> to vector<16x32xf32>
      %157 = arith.subf %144, %156 : vector<16x32xf32>
      %cst_90 = arith.constant 9.99999974E-6 : f32
      %158 = vector.broadcast %cst_90 : f32 to vector<16x1xf32>
      %159 = arith.addf %155, %158 : vector<16x1xf32>
      %160 = math.rsqrt %159 : vector<16x1xf32>
      %161 = vector.broadcast %160 : vector<16x1xf32> to vector<16x32xf32>
      %162 = arith.mulf %157, %161 : vector<16x32xf32>
      %c0_91 = arith.constant 0 : index
      %c0_92 = arith.constant 0 : index
      %163 = vector.load %arg7[%c0_91, %c0_92] : memref<1x32xf32, #tpu.memory_space<vmem>>, vector<1x32xf32>
      %164 = vector.broadcast %163 : vector<1x32xf32> to vector<16x32xf32>
      %165 = arith.mulf %162, %164 : vector<16x32xf32>
      %c0_93 = arith.constant 0 : index
      %c0_94 = arith.constant 0 : index
      %166 = vector.load %arg8[%c0_93, %c0_94] : memref<1x32xf32, #tpu.memory_space<vmem>>, vector<1x32xf32>
      %167 = vector.broadcast %166 : vector<1x32xf32> to vector<16x32xf32>
      %168 = arith.addf %165, %167 : vector<16x32xf32>
      %169 = arith.truncf %168 : vector<16x32xf32> to vector<16x32xbf16>
      %c0_95 = arith.constant 0 : index
      %c0_96 = arith.constant 0 : index
      %170 = vector.load %arg10[%c0_95, %c0_96] : memref<32x64xbf16, #tpu.memory_space<vmem>>, vector<32x64xbf16>
      %cst_97 = arith.constant dense<0.000000e+00> : vector<16x64xf32>
      %171 = tpu.matmul %169, %170, %cst_97 {dimension_numbers = #tpu.dot_dimension_numbers<[1], [0], [0], [1], [0, 0, 1, 1], [], []>} : vector<16x32xbf16>, vector<32x64xbf16>, vector<16x64xf32> -> vector<16x64xf32>
      %172 = vector.extract_strided_slice %171 {offsets = [0, 0], sizes = [16, 16], strides = [1, 1]} : vector<16x64xf32> to vector<16x16xf32>
      %173 = arith.truncf %172 : vector<16x16xf32> to vector<16x16xbf16>
      %c0_98 = arith.constant 0 : index
      %c0_99 = arith.constant 0 : index
      %c0_100 = arith.constant 0 : index
      %174 = vector.load %arg15[%c0_98, %c0_99, %c0_100] : memref<2x24x16xbf16, #tpu.memory_space<vmem>>, vector<1x16x16xbf16>
      %175 = vector.shape_cast %174 : vector<1x16x16xbf16> to vector<16x16xbf16>
      %176 = vector.shape_cast %173 : vector<16x16xbf16> to vector<1x16x16xbf16>
      tpu.vector_store %arg15[%c0_98, %c0_99, %c0_100], %176 {strides = array<i32>} : memref<2x24x16xbf16, #tpu.memory_space<vmem>>, vector<1x16x16xbf16>,
      %177 = vector.extract_strided_slice %171 {offsets = [0, 32], sizes = [16, 16], strides = [1, 1]} : vector<16x64xf32> to vector<16x16xf32>
      %178 = arith.truncf %177 : vector<16x16xf32> to vector<16x16xbf16>
      %c0_101 = arith.constant 0 : index
      %c0_102 = arith.constant 0 : index
      %c0_103 = arith.constant 0 : index
      %179 = vector.load %arg16[%c0_101, %c0_102, %c0_103] : memref<2x24x16xbf16, #tpu.memory_space<vmem>>, vector<1x16x16xbf16>
      %180 = vector.shape_cast %179 : vector<1x16x16xbf16> to vector<16x16xbf16>
      %181 = vector.shape_cast %178 : vector<16x16xbf16> to vector<1x16x16xbf16>
      tpu.vector_store %arg16[%c0_101, %c0_102, %c0_103], %181 {strides = array<i32>} : memref<2x24x16xbf16, #tpu.memory_space<vmem>>, vector<1x16x16xbf16>,
      %182 = vector.extract_strided_slice %171 {offsets = [0, 16], sizes = [16, 16], strides = [1, 1]} : vector<16x64xf32> to vector<16x16xf32>
      %183 = arith.truncf %182 : vector<16x16xf32> to vector<16x16xbf16>
      %c1_104 = arith.constant 1 : index
      %c0_105 = arith.constant 0 : index
      %c0_106 = arith.constant 0 : index
      %184 = vector.load %arg15[%c1_104, %c0_105, %c0_106] : memref<2x24x16xbf16, #tpu.memory_space<vmem>>, vector<1x16x16xbf16>
      %185 = vector.shape_cast %184 : vector<1x16x16xbf16> to vector<16x16xbf16>
      %186 = vector.shape_cast %183 : vector<16x16xbf16> to vector<1x16x16xbf16>
      tpu.vector_store %arg15[%c1_104, %c0_105, %c0_106], %186 {strides = array<i32>} : memref<2x24x16xbf16, #tpu.memory_space<vmem>>, vector<1x16x16xbf16>,
      %187 = vector.extract_strided_slice %171 {offsets = [0, 48], sizes = [16, 16], strides = [1, 1]} : vector<16x64xf32> to vector<16x16xf32>
      %188 = arith.truncf %187 : vector<16x16xf32> to vector<16x16xbf16>
      %c1_107 = arith.constant 1 : index
      %c0_108 = arith.constant 0 : index
      %c0_109 = arith.constant 0 : index
      %189 = vector.load %arg16[%c1_107, %c0_108, %c0_109] : memref<2x24x16xbf16, #tpu.memory_space<vmem>>, vector<1x16x16xbf16>
      %190 = vector.shape_cast %189 : vector<1x16x16xbf16> to vector<16x16xbf16>
      %191 = vector.shape_cast %188 : vector<16x16xbf16> to vector<1x16x16xbf16>
      tpu.vector_store %arg16[%c1_107, %c0_108, %c0_109], %191 {strides = array<i32>} : memref<2x24x16xbf16, #tpu.memory_space<vmem>>, vector<1x16x16xbf16>,
    } else {
    }
    %c0 = arith.constant 0 : index
    %c0_1 = arith.constant 0 : index
    %c0_2 = arith.constant 0 : index
    %3 = vector.load %arg2[%c0, %c0_1, %c0_2] : memref<1x16x32xf32, #tpu.memory_space<vmem>>, vector<1x16x32xf32>
    %4 = vector.shape_cast %3 : vector<1x16x32xf32> to vector<16x32xf32>
    %cst = arith.constant dense<0.000000e+00> : vector<16xf32>
    %5 = vector.multi_reduction <add>, %4, %cst [1] : vector<16x32xf32> to vector<16xf32>
    %6 = vector.shape_cast %5 : vector<16xf32> to vector<16x1xf32>
    %cst_3 = arith.constant 3.200000e+01 : f32
    %7 = vector.broadcast %cst_3 : f32 to vector<16x1xf32>
    %8 = arith.divf %6, %7 : vector<16x1xf32>
    %9 = vector.broadcast %8 : vector<16x1xf32> to vector<16x32xf32>
    %10 = arith.subf %4, %9 : vector<16x32xf32>
    %11 = arith.mulf %10, %10 : vector<16x32xf32>
    %cst_4 = arith.constant dense<0.000000e+00> : vector<16xf32>
    %12 = vector.multi_reduction <add>, %11, %cst_4 [1] : vector<16x32xf32> to vector<16xf32>
    %13 = vector.shape_cast %12 : vector<16xf32> to vector<16x1xf32>
    %cst_5 = arith.constant 3.200000e+01 : f32
    %14 = vector.broadcast %cst_5 : f32 to vector<16x1xf32>
    %15 = arith.divf %13, %14 : vector<16x1xf32>
    %16 = vector.broadcast %8 : vector<16x1xf32> to vector<16x32xf32>
    %17 = arith.subf %4, %16 : vector<16x32xf32>
    %cst_6 = arith.constant 9.99999974E-6 : f32
    %18 = vector.broadcast %cst_6 : f32 to vector<16x1xf32>
    %19 = arith.addf %15, %18 : vector<16x1xf32>
    %20 = math.rsqrt %19 : vector<16x1xf32>
    %21 = vector.broadcast %20 : vector<16x1xf32> to vector<16x32xf32>
    %22 = arith.mulf %17, %21 : vector<16x32xf32>
    %c0_7 = arith.constant 0 : index
    %c0_8 = arith.constant 0 : index
    %23 = vector.load %arg7[%c0_7, %c0_8] : memref<1x32xf32, #tpu.memory_space<vmem>>, vector<1x32xf32>
    %24 = vector.broadcast %23 : vector<1x32xf32> to vector<16x32xf32>
    %25 = arith.mulf %22, %24 : vector<16x32xf32>
    %c0_9 = arith.constant 0 : index
    %c0_10 = arith.constant 0 : index
    %26 = vector.load %arg8[%c0_9, %c0_10] : memref<1x32xf32, #tpu.memory_space<vmem>>, vector<1x32xf32>
    %27 = vector.broadcast %26 : vector<1x32xf32> to vector<16x32xf32>
    %28 = arith.addf %25, %27 : vector<16x32xf32>
    %29 = arith.truncf %28 : vector<16x32xf32> to vector<16x32xbf16>
    %c0_11 = arith.constant 0 : index
    %c0_12 = arith.constant 0 : index
    %30 = vector.load %arg9[%c0_11, %c0_12] : memref<32x32xbf16, #tpu.memory_space<vmem>>, vector<32x32xbf16>
    %cst_13 = arith.constant dense<0.000000e+00> : vector<16x32xf32>
    %31 = tpu.matmul %29, %30, %cst_13 {dimension_numbers = #tpu.dot_dimension_numbers<[1], [0], [0], [1], [0, 0, 1, 1], [], []>} : vector<16x32xbf16>, vector<32x32xbf16>, vector<16x32xf32> -> vector<16x32xf32>
    %32 = arith.truncf %31 : vector<16x32xf32> to vector<16x32xbf16>
    %33 = vector.extract_strided_slice %32 {offsets = [0, 0], sizes = [16, 16], strides = [1, 1]} : vector<16x32xbf16> to vector<16x16xbf16>
    %c0_14 = arith.constant 0 : index
    %c0_15 = arith.constant 0 : index
    %c0_16 = arith.constant 0 : index
    %34 = vector.load %arg15[%c0_14, %c0_15, %c0_16] : memref<2x24x16xbf16, #tpu.memory_space<vmem>>, vector<1x24x16xbf16>
    %35 = vector.shape_cast %34 : vector<1x24x16xbf16> to vector<24x16xbf16>
    "tpu.trace_start"() <{level = 10 : i32, message = "qd,kd->qk"}> : () -> ()
    %cst_17 = arith.constant dense<0.000000e+00> : vector<16x24xf32>
    %36 = tpu.matmul %33, %35, %cst_17 {dimension_numbers = #tpu.dot_dimension_numbers<[1], [1], [0], [0], [0, 0, 1, 0], [], []>} : vector<16x16xbf16>, vector<24x16xbf16>, vector<16x24xf32> -> vector<16x24xf32>
    "tpu.trace_stop"() : () -> ()
    %cst_18 = arith.constant dense<0xFF800000> : vector<16xf32>
    %37 = vector.multi_reduction <maximumf>, %36, %cst_18 [1] : vector<16x24xf32> to vector<16xf32>
    %38 = vector.shape_cast %37 : vector<16xf32> to vector<16x1xf32>
    %39 = vector.broadcast %38 : vector<16x1xf32> to vector<16x24xf32>
    %40 = arith.subf %36, %39 : vector<16x24xf32>
    %41 = math.exp %40 : vector<16x24xf32>
    %cst_19 = arith.constant dense<0.000000e+00> : vector<16xf32>
    %42 = vector.multi_reduction <add>, %41, %cst_19 [1] : vector<16x24xf32> to vector<16xf32>
    %43 = vector.shape_cast %42 : vector<16xf32> to vector<16x1xf32>
    %44 = tpu.reciprocal %43 {approx = true} : vector<16x1xf32> -> vector<16x1xf32>
    %45 = arith.truncf %41 : vector<16x24xf32> to vector<16x24xbf16>
    %c0_20 = arith.constant 0 : index
    %c0_21 = arith.constant 0 : index
    %c0_22 = arith.constant 0 : index
    %46 = vector.load %arg16[%c0_20, %c0_21, %c0_22] : memref<2x24x16xbf16, #tpu.memory_space<vmem>>, vector<1x24x16xbf16>
    %47 = vector.shape_cast %46 : vector<1x24x16xbf16> to vector<24x16xbf16>
    "tpu.trace_start"() <{level = 10 : i32, message = "qk,kd->qd"}> : () -> ()
    %cst_23 = arith.constant dense<0.000000e+00> : vector<16x16xf32>
    %48 = tpu.matmul %45, %47, %cst_23 {dimension_numbers = #tpu.dot_dimension_numbers<[1], [0], [0], [1], [0, 0, 1, 1], [], []>} : vector<16x24xbf16>, vector<24x16xbf16>, vector<16x16xf32> -> vector<16x16xf32>
    "tpu.trace_stop"() : () -> ()
    %49 = vector.broadcast %44 : vector<16x1xf32> to vector<16x16xf32>
    %50 = arith.mulf %48, %49 : vector<16x16xf32>
    %51 = arith.truncf %50 : vector<16x16xf32> to vector<16x16xbf16>
    %c0_24 = arith.constant 0 : index
    %c0_25 = arith.constant 0 : index
    %52 = vector.load %arg17[%c0_24, %c0_25] : memref<16x32xbf16, #tpu.memory_space<vmem>>, vector<16x16xbf16>
    tpu.vector_store %arg17[%c0_24, %c0_25], %51 {strides = array<i32>} : memref<16x32xbf16, #tpu.memory_space<vmem>>, vector<16x16xbf16>,
    %53 = vector.extract_strided_slice %32 {offsets = [0, 16], sizes = [16, 16], strides = [1, 1]} : vector<16x32xbf16> to vector<16x16xbf16>
    %c1 = arith.constant 1 : index
    %c0_26 = arith.constant 0 : index
    %c0_27 = arith.constant 0 : index
    %54 = vector.load %arg15[%c1, %c0_26, %c0_27] : memref<2x24x16xbf16, #tpu.memory_space<vmem>>, vector<1x24x16xbf16>
    %55 = vector.shape_cast %54 : vector<1x24x16xbf16> to vector<24x16xbf16>
    "tpu.trace_start"() <{level = 10 : i32, message = "qd,kd->qk"}> : () -> ()
    %cst_28 = arith.constant dense<0.000000e+00> : vector<16x24xf32>
    %56 = tpu.matmul %53, %55, %cst_28 {dimension_numbers = #tpu.dot_dimension_numbers<[1], [1], [0], [0], [0, 0, 1, 0], [], []>} : vector<16x16xbf16>, vector<24x16xbf16>, vector<16x24xf32> -> vector<16x24xf32>
    "tpu.trace_stop"() : () -> ()
    %cst_29 = arith.constant dense<0xFF800000> : vector<16xf32>
    %57 = vector.multi_reduction <maximumf>, %56, %cst_29 [1] : vector<16x24xf32> to vector<16xf32>
    %58 = vector.shape_cast %57 : vector<16xf32> to vector<16x1xf32>
    %59 = vector.broadcast %58 : vector<16x1xf32> to vector<16x24xf32>
    %60 = arith.subf %56, %59 : vector<16x24xf32>
    %61 = math.exp %60 : vector<16x24xf32>
    %cst_30 = arith.constant dense<0.000000e+00> : vector<16xf32>
    %62 = vector.multi_reduction <add>, %61, %cst_30 [1] : vector<16x24xf32> to vector<16xf32>
    %63 = vector.shape_cast %62 : vector<16xf32> to vector<16x1xf32>
    %64 = tpu.reciprocal %63 {approx = true} : vector<16x1xf32> -> vector<16x1xf32>
    %65 = arith.truncf %61 : vector<16x24xf32> to vector<16x24xbf16>
    %c1_31 = arith.constant 1 : index
    %c0_32 = arith.constant 0 : index
    %c0_33 = arith.constant 0 : index
    %66 = vector.load %arg16[%c1_31, %c0_32, %c0_33] : memref<2x24x16xbf16, #tpu.memory_space<vmem>>, vector<1x24x16xbf16>
    %67 = vector.shape_cast %66 : vector<1x24x16xbf16> to vector<24x16xbf16>
    "tpu.trace_start"() <{level = 10 : i32, message = "qk,kd->qd"}> : () -> ()
    %cst_34 = arith.constant dense<0.000000e+00> : vector<16x16xf32>
    %68 = tpu.matmul %65, %67, %cst_34 {dimension_numbers = #tpu.dot_dimension_numbers<[1], [0], [0], [1], [0, 0, 1, 1], [], []>} : vector<16x24xbf16>, vector<24x16xbf16>, vector<16x16xf32> -> vector<16x16xf32>
    "tpu.trace_stop"() : () -> ()
    %69 = vector.broadcast %64 : vector<16x1xf32> to vector<16x16xf32>
    %70 = arith.mulf %68, %69 : vector<16x16xf32>
    %71 = arith.truncf %70 : vector<16x16xf32> to vector<16x16xbf16>
    %c0_35 = arith.constant 0 : index
    %c16 = arith.constant 16 : index
    %72 = vector.load %arg17[%c0_35, %c16] : memref<16x32xbf16, #tpu.memory_space<vmem>>, vector<16x16xbf16>
    tpu.vector_store %arg17[%c0_35, %c16], %71 {strides = array<i32>} : memref<16x32xbf16, #tpu.memory_space<vmem>>, vector<16x16xbf16>,
    %c0_36 = arith.constant 0 : index
    %c0_37 = arith.constant 0 : index
    %73 = vector.load %arg17[%c0_36, %c0_37] : memref<16x32xbf16, #tpu.memory_space<vmem>>, vector<16x32xbf16>
    %c0_38 = arith.constant 0 : index
    %c0_39 = arith.constant 0 : index
    %74 = vector.load %arg11[%c0_38, %c0_39] : memref<32x32xbf16, #tpu.memory_space<vmem>>, vector<32x32xbf16>
    %cst_40 = arith.constant dense<0.000000e+00> : vector<16x32xf32>
    %75 = tpu.matmul %73, %74, %cst_40 {dimension_numbers = #tpu.dot_dimension_numbers<[1], [0], [0], [1], [0, 0, 1, 1], [], []>} : vector<16x32xbf16>, vector<32x32xbf16>, vector<16x32xf32> -> vector<16x32xf32>
    %c0_41 = arith.constant 0 : index
    %c0_42 = arith.constant 0 : index
    %76 = vector.load %arg12[%c0_41, %c0_42] : memref<1x32xf32, #tpu.memory_space<vmem>>, vector<1x32xf32>
    %77 = vector.broadcast %76 : vector<1x32xf32> to vector<16x32xf32>
    %78 = arith.addf %75, %77 : vector<16x32xf32>
    %c0_43 = arith.constant 0 : index
    %c0_44 = arith.constant 0 : index
    %c0_45 = arith.constant 0 : index
    %79 = vector.load %arg2[%c0_43, %c0_44, %c0_45] : memref<1x16x32xf32, #tpu.memory_space<vmem>>, vector<1x16x32xf32>
    %80 = vector.shape_cast %79 : vector<1x16x32xf32> to vector<16x32xf32>
    %c0_46 = arith.constant 0 : index
    %c0_47 = arith.constant 0 : index
    %81 = memref.load %arg13[%c0_46, %c0_47] : memref<1x1xf32, #tpu.memory_space<smem>>
    %82 = vector.broadcast %81 : f32 to vector<16x32xf32>
    %83 = arith.mulf %82, %78 : vector<16x32xf32>
    %84 = arith.addf %80, %83 : vector<16x32xf32>
    %c0_48 = arith.constant 0 : index
    %c0_49 = arith.constant 0 : index
    %c0_50 = arith.constant 0 : index
    %85 = vector.load %arg14[%c0_48, %c0_49, %c0_50] : memref<1x16x32xf32, #tpu.memory_space<vmem>>, vector<1x16x32xf32>
    %86 = vector.shape_cast %85 : vector<1x16x32xf32> to vector<16x32xf32>
    %87 = vector.shape_cast %84 : vector<16x32xf32> to vector<1x16x32xf32>
    tpu.vector_store %arg14[%c0_48, %c0_49, %c0_50], %87 {strides = array<i32>} : memref<1x16x32xf32, #tpu.memory_space<vmem>>, vector<1x16x32xf32>,
    return
  }
  func.func @transform_0(%arg0: i32, %arg1: i32) -> (i32, i32, i32) {
    %c0_i32 = arith.constant 0 : i32
    %c0_i32_0 = arith.constant 0 : i32
    return %arg0, %arg1, %c0_i32 : i32, i32, i32
  }
  func.func @transform_1(%arg0: i32, %arg1: i32) -> (i32, i32, i32) {
    %c0_i32 = arith.constant 0 : i32
    %c0_i32_0 = arith.constant 0 : i32
    %c0_i32_1 = arith.constant 0 : i32
    return %arg0, %c0_i32, %c0_i32_0 : i32, i32, i32
  }
  func.func @transform_2(%arg0: i32, %arg1: i32) -> (i32, i32, i32) {
    %c0_i32 = arith.constant 0 : i32
    %c0_i32_0 = arith.constant 0 : i32
    %c0_i32_1 = arith.constant 0 : i32
    return %arg0, %c0_i32, %c0_i32_0 : i32, i32, i32
  }
  func.func @transform_3(%arg0: i32, %arg1: i32) -> (i32, i32) {
    %c0_i32 = arith.constant 0 : i32
    %c0_i32_0 = arith.constant 0 : i32
    %c0_i32_1 = arith.constant 0 : i32
    return %c0_i32, %c0_i32_0 : i32, i32
  }
  func.func @transform_4(%arg0: i32, %arg1: i32) -> (i32, i32) {
    %c0_i32 = arith.constant 0 : i32
    %c0_i32_0 = arith.constant 0 : i32
    %c0_i32_1 = arith.constant 0 : i32
    return %c0_i32, %c0_i32_0 : i32, i32
  }
  func.func @transform_5(%arg0: i32, %arg1: i32) -> (i32, i32) {
    %c0_i32 = arith.constant 0 : i32
    %c0_i32_0 = arith.constant 0 : i32
    %c0_i32_1 = arith.constant 0 : i32
    return %c0_i32, %c0_i32_0 : i32, i32
  }
  func.func @transform_6(%arg0: i32, %arg1: i32) -> (i32, i32) {
    %c0_i32 = arith.constant 0 : i32
    %c0_i32_0 = arith.constant 0 : i32
    %c0_i32_1 = arith.constant 0 : i32
    return %c0_i32, %c0_i32_0 : i32, i32
  }
  func.func @transform_7(%arg0: i32, %arg1: i32) -> (i32, i32) {
    %c0_i32 = arith.constant 0 : i32
    %c0_i32_0 = arith.constant 0 : i32
    %c0_i32_1 = arith.constant 0 : i32
    return %c0_i32, %c0_i32_0 : i32, i32
  }
  func.func @transform_8(%arg0: i32, %arg1: i32) -> (i32, i32) {
    %c0_i32 = arith.constant 0 : i32
    %c0_i32_0 = arith.constant 0 : i32
    %c0_i32_1 = arith.constant 0 : i32
    return %c0_i32, %c0_i32_0 : i32, i32
  }
  func.func @transform_9(%arg0: i32, %arg1: i32) -> (i32, i32) {
    %c0_i32 = arith.constant 0 : i32
    %c0_i32_0 = arith.constant 0 : i32
    %c0_i32_1 = arith.constant 0 : i32
    return %c0_i32, %c0_i32_0 : i32, i32
  }
  func.func @transform_10(%arg0: i32, %arg1: i32) -> (i32, i32) {
    %c0_i32 = arith.constant 0 : i32
    %c0_i32_0 = arith.constant 0 : i32
    %c0_i32_1 = arith.constant 0 : i32
    return %c0_i32, %c0_i32_0 : i32, i32
  }
  func.func @transform_11(%arg0: i32, %arg1: i32) -> (i32, i32) {
    %c0_i32 = arith.constant 0 : i32
    %c0_i32_0 = arith.constant 0 : i32
    %c0_i32_1 = arith.constant 0 : i32
    return %c0_i32, %c0_i32_0 : i32, i32
  }
  func.func @transform_12(%arg0: i32, %arg1: i32) -> (i32, i32, i32) {
    %c0_i32 = arith.constant 0 : i32
    %c0_i32_0 = arith.constant 0 : i32
    return %arg0, %arg1, %c0_i32 : i32, i32, i32
  }
}

</mosaic_0001>

<bundles_post_ra>
// kernel: tpu_custom_call.1
= control target key start
LH: loop header
LB: loop body
LE: loop exit
PB: predicated region body
PF: predicated region fallthrough
CT: control target
= control target key end

     0   :  { %s2397_s0 = inlined_call_operand.hbm [shape: f32[2,16,32], index: 0, kind: input, shape index: {}]   ;;  %s2398_s1 = inlined_call_operand.hbm [shape: f32[2,16,32], index: 1, kind: input, shape index: {}]   ;;  %s2399_s2 = inlined_call_operand.hbm [shape: f32[2,8,16], index: 2, kind: input, shape index: {}]   ;;  %s2400_s3 = inlined_call_operand.hbm [shape: bf16[16,32], index: 3, kind: input, shape index: {}]   ;;  %s2401_s4 = inlined_call_operand.vmem [shape: f32[1,32], index: 4, kind: input, shape index: {}]   ;;  %s2402_s5 = inlined_call_operand.vmem [shape: f32[1,32], index: 5, kind: input, shape index: {}]   ;;  %s2403_s6 = inlined_call_operand.vmem [shape: f32[1,32], index: 6, kind: input, shape index: {}]   ;;  %s2404_s7 = inlined_call_operand.hbm [shape: bf16[32,32], index: 7, kind: input, shape index: {}]   ;;  %s2405_s8 = inlined_call_operand.hbm [shape: bf16[32,64], index: 8, kind: input, shape index: {}]   ;;  %s2406_s9 = inlined_call_operand.hbm [shape: bf16[32,32], index: 9, kind: input, shape index: {}]   ;;  %s2407_s10 = inlined_call_operand.vmem [shape: f32[1,32], index: 10, kind: input, shape index: {}]   ;;  %s2408_s11 = inlined_call_operand.<no memory space> [shape: f32[1,1], index: 11, kind: input, shape index: {}]   ;;  %s2409_s12 = inlined_call_operand.hbm [shape: f32[2,16,32], index: 12, kind: output, shape index: {}]  }
   0x1   :  { %2418 = sst [smem:[#allocation26_spill]] %s2398_s1 }
   0x2   :  { %2419 = sst [smem:[#allocation27_spill]] %s2400_s3 }
   0x3   :  { %2420 = sst [smem:[#allocation28_spill]] %s2403_s6 }
   0x4   :  { %2421 = sst [smem:[#allocation29_spill]] %s2405_s8 }
   0x5   :  { %2422 = sst [smem:[#allocation30_spill]] %s2407_s10 }
   0x6   :  { %2423 = sst [smem:[#allocation31_spill]] %s2409_s12 }
   0x7   :  { %17 = sst [smem:[#allocation5]] %s2408_s11 }
   0x8   :  { %18 = vsyncpa [#allocation7], 0 }
   0x9   :  { %20 = vsyncpa [#allocation7 + $0x1], 0 }
   0xa   :  { %21 = vsyncpa [#allocation10], 0 }
   0xb   :  { %22 = vsyncpa [#allocation13], 0 }
   0xc   :  { %23 = vsyncpa [#allocation16], 0 }
   0xd   :  { %24 = vsyncpa [#allocation8], 0 }
   0xe   :  { %26 = vsyncpa [#allocation8 + $0x1], 0  ;;  %s2007_s23 = smov 0   ;;  %s2009_s24 = smov 0  }
   0xf   :  { %s2011_s25 = smov 0   ;;  %s2013_s26 = smov 0  }
  0x10   :  { %s2015_s27 = smov 0   ;;  %s2017_s28 = smov 0  }
  0x11 LB: > { %2424 = sst [smem:[#allocation24_spill]] %s1900_s23  ;;  %s2411_s11 = sadd.s32 4294967295, %s1920_s28   ;;  %s1920_s28 = sphi %s2017_s28, %s32_s28   ;;  %s1916_s27 = sphi %s2015_s27, %s2452_s27   ;;  %s1912_s26 = sphi %s2013_s26, %s2451_s26   ;;  %s1908_s25 = sphi %s2011_s25, %s2450_s25   ;;  %s1904_s24 = sphi %s2009_s24, %s2449_s24   ;;  %s1900_s23 = sphi %s2007_s23, %s2448_s23  }
  0x12   : > { %s1347_s29 = sadd.s32 4294967294, %s1920_s28   ;;  %p66_p0 = scmp.ne.s32.totalorder %s1904_s24, %s1900_s23 }
  0x13   : > { %p2043_p1 = scmp.eq.s32.totalorder %s2411_s11, 0  ;;  %p339_p2 = scmp.eq.s32.totalorder %s1347_s29, 1 }
  0x14   : > { %p1348_p4 = scmp.ge.s32.totalorder %s1920_s28, 1  ;;  %p346_p6 = scmp.lt.s32.totalorder %s1920_s28, 3 }
  0x15   : > { %p2049_p3 = por %p2043_p1, %p66_p0  ;;  %p2054_p5 = por %p339_p2, %p66_p0 }
  0x16   : > { %s2410_s15 = sshll.u32 %s1912_s26, 4  ;;  %p2060_p7 = pnand %p1348_p4, %p346_p6 }
  0x17   : > { %s2427_s14 = scalar_select %p2054_p5, 1, 0 }
  0x18   : > { %s2430_s1 = sld [smem:[#allocation26_spill]]  ;;  %s1922_s21 = smov [#allocation9]  }
  0x19   : > { %2428 = sst [smem:[#allocation25_spill]] %s2427_s14  ;;  %s362_s22 = sshll.u32 %s1922_s21, 4  ;;  %s363_s22 = int_to_ptr.vmem [resolvable:$true] %s362_s22 }
  0x1a   : > { %p1478_p8 = pneg %p2060_p7  ;;  %s2432_s3 = sld [smem:[#allocation27_spill]] }
  0x1c   : > { %p2076_p9 = pnand %p1478_p8, %p2049_p3 }
  0x1e   : > { %s359_s19 = scalar_lea.hbm %s2430_s1, %s2410_s15  ;;  %p1620_p12 = pneg %p2076_p9 }
  0x1f   : > { %s360_s20 = sshll.u32 %s359_s19, 4  ;;  %s1623_s23 = scalar_lea.hbm %s2430_s1, 32  ;;  %s361_s20 = int_to_ptr.hbm [resolvable:$true] %s360_s20 }
  0x20   : > { %s388_s19 = sshll.u32 %s2432_s3, 4  ;;  %s1616_s15 = sshra.s32 %s361_s20, 4  ;;  %s1617_s15 = int_to_ptr.hbm [resolvable:$true] %s1616_s15  ;;  %s389_s19 = int_to_ptr.hbm [resolvable:$true] %s388_s19 }
  0x21   : > { %s1618_s21 = scalar_lea.hbm %s1617_s15, 16  ;;  %p1624_p2 = scmp.lt.s32.totalorder %s1617_s15, %s2430_s1 }
  0x22   : > { %p1619_p11 = scmp.ne.s32.totalorder %s1617_s15, %s1618_s21  ;;  %p1625_p4 = scmp.lt.s32.totalorder %s1623_s23, %s1618_s21 }
  0x24   : > { %p1621_p13 = pnand %p1620_p12, %p1619_p11  ;;  %p1626_p6 = por %p1625_p4, %p1624_p2 }
  0x26   : > { %p1622_p0 = pneg %p1621_p13 }
  0x28   : > { %p1627_p10 = pnand %p1626_p6, %p1622_p0 }
  0x2a   : > { %1630 = shalt.err (!%p1627_p10)
}
  0x2b   : > { %s2415_s17 = smov 128   ;;  %s2416_s18 = smov 8  }
  0x2c   : > { %1481 = dma.hbm_to_vmem [thread:$0]  (!%p2076_p9), %s361_s20, 256, %s363_s22, [#allocation10], %s2415_s17, %s2415_s17, %s2416_s18  }
  0x2d   : > { %s1925_s11 = smov [#allocation12]   ;;  %p2105_p11 = pnand %p1478_p8, %p2043_p1 }
  0x2e   : > { %s390_s14 = sshll.u32 %s1925_s11, 4  ;;  %s1926_s12 = smov 64   ;;  %s391_s14 = int_to_ptr.vmem [resolvable:$true] %s390_s14 }
  0x2f   : > { %s1927_s23 = smov 4   ;;  %s2434_s8 = sld [smem:[#allocation29_spill]] }
  0x30   : > { %1487 = dma.hbm_to_vmem [thread:$0]  (!%p2105_p11), %s389_s19, 128, %s391_s14, [#allocation13], %s1926_s12, %s1926_s12, %s1927_s23  }
  0x31   : > { %s1928_s21 = smov [#allocation15]   ;;  %s1351_s17 = sshll.u32 %s1912_s26, 3 }
  0x32   : > { %s427_s11 = sshll.u32 %s1928_s21, 4  ;;  %s375_s3 = scalar_lea.hbm %s2399_s2, %s1351_s17  ;;  %s428_s11 = int_to_ptr.vmem [resolvable:$true] %s427_s11 }
  0x33   : > { %s377_s19 = sshll.u32 %s375_s3, 4  ;;  %s1929_s14 = smov [#allocation11]   ;;  %s378_s19 = int_to_ptr.hbm [resolvable:$true] %s377_s19 }
  0x34   : > { %s379_s6 = sshll.u32 %s1929_s14, 4  ;;  %s1706_s15 = sshra.s32 %s378_s19, 4  ;;  %s380_s6 = int_to_ptr.vmem [resolvable:$true] %s379_s6  ;;  %s1707_s15 = int_to_ptr.hbm [resolvable:$true] %s1706_s15 }
  0x35   : > { %s425_s22 = sshll.u32 %s2434_s8, 4  ;;  %s1708_s20 = scalar_lea.hbm %s1707_s15, 8  ;;  %s426_s22 = int_to_ptr.hbm [resolvable:$true] %s425_s22 }
  0x36   : > { %1493 = dma.hbm_to_vmem [thread:$0]  (!%p2105_p11), %s426_s22, 256, %s428_s11, [#allocation16], %s1926_s12, %s1926_s12, %s1927_s23  }
  0x37   : > { %p1709_p8 = scmp.ne.s32.totalorder %s1707_s15, %s1708_s20  ;;  %s1713_s22 = scalar_lea.hbm %s2399_s2, 16 }
  0x38   : > { %p1714_p0 = scmp.lt.s32.totalorder %s1707_s15, %s2399_s2  ;;  %p1715_p2 = scmp.lt.s32.totalorder %s1713_s22, %s1708_s20 }
  0x39   : > { %p1711_p10 = pnand %p1709_p8, %p1620_p12 }
  0x3a   : > { %p1716_p4 = por %p1715_p2, %p1714_p0 }
  0x3b   : > { %p1712_p13 = pneg %p1711_p10 }
  0x3d   : > { %p1717_p6 = pnand %p1716_p4, %p1712_p13 }
  0x3f   : > { %1720 = shalt.err (!%p1717_p6)
}
  0x40   : > { %1484 = dma.hbm_to_vmem [thread:$0]  (!%p2076_p9), %s378_s19, 128, %s380_s6, [#allocation10]  }
  0x41   : > { %s411_s8 = sshll.u32 %s2404_s7, 4  ;;  %s1930_s18 = smov [#allocation14]   ;;  %s412_s8 = int_to_ptr.hbm [resolvable:$true] %s411_s8 }
  0x42   : > { %s413_s14 = sshll.u32 %s1930_s18, 4  ;;  %s439_s29 = sshll.u32 %s2406_s9, 4  ;;  %s414_s14 = int_to_ptr.vmem [resolvable:$true] %s413_s14  ;;  %s440_s29 = int_to_ptr.hbm [resolvable:$true] %s439_s29 }
  0x43   : > { %1490 = dma.hbm_to_vmem [thread:$0]  (!%p2105_p11), %s412_s8, 256, %s414_s14, [#allocation13], %s1926_s12, %s1926_s12, %s1927_s23  }
  0x44   : > { %s1931_s6 = smov [#allocation17]   ;;  %s2435_s21 = sadd.s32 4294967295, %s1920_s28  }
  0x45   : > { %s441_s19 = sshll.u32 %s1931_s6, 4  ;;  %p333_p9 = scmp.eq.s32.totalorder %s2435_s21, 1  ;;  %s442_s19 = int_to_ptr.vmem [resolvable:$true] %s441_s19 }
  0x46   : > { %1496 = dma.hbm_to_vmem [thread:$0]  (!%p2105_p11), %s440_s29, 256, %s442_s19, [#allocation16], %s1926_s12, %s1926_s12, %s1927_s23  }
  0x47   : > { %s44_s22 = sadd.s32 1, %s1916_s27  ;;  %s53_s11 = sadd.s32 1, %s1908_s25 }
  0x48   : > { %p46_p12 = scmp.ge.s32.totalorder %s44_s22, 2  ;;  %p60_p8 = scmp.ne.s32.totalorder %s1908_s25, %s1904_s24 }
  0x49   : > { %p61_p10 = scmp.eq.s32.totalorder %s1920_s28, 0  ;;  %p1509_p0 = scmp.lt.s32.totalorder %s1920_s28, 2 }
  0x4a   : > { %s2454_s22 = smov (%p46_p12, %s44_s22), 0  ;;  %p2162_p13 = por %p333_p9, %p60_p8 }
  0x4b   : > { %s48_s10 = ssub.s32 %s1916_s27, %s2454_s22  ;;  %s461_s3 = sand.u32 1, %s1908_s25  }
  0x4c   : > { %p51_p11 = scmp.eq.s32.totalorder %s48_s10, 0  ;;  %p62_p2 = por %p61_p10, %p60_p8 }
  0x4d   : > { %s1357_s12 = sshll.u32 %s461_s3, 4  ;;  %s1438_s23 = sshll.u32 %s1916_s27, 4 }
  0x4e   : > { %s2172_s17 = scalar_select %p51_p11, %s1908_s25, %s53_s11  }
  0x4f   : > { %s472_s14 = scalar_lea.hbm %s2397_s0, %s1438_s23  ;;  %s465_s20 = scalar_lea.vmem [#allocation6], %s1357_s12 }
  0x50   : > { %s473_s15 = sshll.u32 %s472_s14, 4  ;;  %s475_s29 = sshll.u32 %s465_s20, 4  ;;  %s474_s15 = int_to_ptr.hbm [resolvable:$true] %s473_s15  ;;  %s476_s29 = int_to_ptr.vmem [resolvable:$true] %s475_s29 }
  0x51   : > { %p1498_p4 = pnand %p1509_p0, %p62_p2  ;;  %s462_s6 = scalar_lea.sflag [#allocation7], %s461_s3 }
  0x52   : > { %s2437_s19 = smov 8   ;;  %s2438_s21 = smov 128  }
  0x53   : > { %1500 = dma.hbm_to_vmem [thread:$0]  (!%p1498_p4), %s474_s15, 256, %s476_s29, %s462_s6, %s2438_s21, %s2438_s21, %s2437_s19  }
  0x54   : > { %487 = sbr.rel (%p2060_p7) target bundleno = 1442 (0x5a2), region = 68  ;;  %s2185_s11 = sand.u32 (!%p2060_p7), 1, %s1904_s24  }
  0x55   : > { %s1361_s10 = sshll.u32 (!%p2060_p7), %s2185_s11, 4  ;;  %s490_s12 = scalar_lea.sflag (!%p2060_p7), [#allocation7], %s2185_s11 }
  0x56   : > { %s2191_s23 = scalar_lea.vmem (!%p2060_p7), [#allocation6], %s1361_s10 }
  0x59   : > { %1879 = dma.done.wait (%p2049_p3), %s490_s12, 256  }
  0x5a   : > { %1881 = vsyncadd (%p2049_p3), %s490_s12, 4294967040 }
  0x5b   : > { %1883 = dma.done.wait (%p2049_p3), [#allocation10], 384  }
  0x5c   : > { %1885 = vsyncadd (%p2049_p3), [#allocation10], 4294966912 }
  0x5d   : > { %1887 = dma.done.wait (%p2043_p1), [#allocation13], 384  }
  0x5e   : > { %1889 = vsyncadd (%p2043_p1), [#allocation13], 4294966912 }
  0x5f   : > { %1891 = dma.done.wait (%p2043_p1), [#allocation16], 512  }
  0x60   : > { %1893 = vsyncadd (%p2043_p1), [#allocation16], 4294966784  ;;  %vm603_vm0 = vcmask 261120   ;;  %v694_v0 = vld [vmem:[#allocation9] sm:$0xff]  ;;  %v1439_v1 = vld [vmem:[#allocation12] sm:$0xff]  ;;  %vm586_vm1 = vcmask 130048  }
  0x61   : > { %v572_v2 = vld [vmem:[#allocation11] sm:$0xff]  ;;  %v696_v3 = vsel %vm603_vm0, %v694_v0, 0.0  ;;  %v2211_v5 = vld [vmem:[%s2191_s23 + $0x8] sm:$0xff]  ;;  %597 = vmatpush.bf16.msra.mxu0 %v1439_v1  ;;  %v1932_v9 = vmov 32.0   ;;  %s2439_s14 = sld [smem:[#allocation28_spill]]  ;;  %s1933_s30 = smov 112  }
  0x62   : > { %v573_v4 = vpack.c.bf16 %v572_v2, %v572_v2  ;;  %697 = vadd.xlane.f32.xlu0 %v696_v3  ;;  %v822_v6 = vsel %vm603_vm0, %v2211_v5, 0.0  ;;  %v695_v7 = vld [vmem:[#allocation9 + $0x8] sm:$0xff]  ;;  %1588 = vrcp.f32 %v1932_v9  ;;  %v2242_v34 = vld [vmem:[%s2191_s23] sm:$0xff]  ;;  %v1443_v38 = vld [vmem:[#allocation15 + $0x8] sm:$0xff]  ;;  %s1934_s13 = smov 80   ;;  %s1935_s16 = smov 96  }
  0x63   : > { %823 = vadd.xlane.f32.xlu2 %v822_v6  ;;  %v699_v8 = vsel %vm603_vm0, %v695_v7, 0.0  ;;  %v1580_v25 = vld [vmem:[%s2401_s4] ss:$0 sm:$0xff]  ;;  %v819_v37 = vsel %vm603_vm0, %v2242_v34, 0.0  ;;  %778 = vmatpush.bf16.msra.mxu2 %v1443_v38  ;;  %v1442_v41 = vld [vmem:[#allocation15] sm:$0xff]  ;;  %s1936_s3 = smov 16  }
  0x64   : > { %1371 = vmatmul.msk.bf16.vlgmr.msra.gmra.mxu0 %vm586_vm1, %v573_v4  ;;  %v1581_v6 = vld [vmem:[%s2402_s5] ss:$0 sm:$0xff]  ;;  %s1172_s8 = sld [smem:[#allocation5]]  ;;  %s2443_s29 = sshll.u32 %s1912_s26, 4 }
  0x65   : > { %s2442_s20 = sld [smem:[#allocation30_spill]]  ;;  %s564_s23 = scalar_lea.vmem [#allocation18], %s1361_s10 }
  0x66   : > { %s2444_s21 = sld [smem:[#allocation31_spill]]  ;;  %s1181_s26 = scalar_lea.sflag [#allocation8], %s2185_s11 }
  0x67   : > { %779 = vmatpush.bf16.msra.mxu2 %v1442_v41 }
  0x68   : > { %v1589_v10 = vpop.eup %1588 }
  0x69   : > { %v608_v11 = vmul.f32 32.0, %v1589_v10  ;;  %vm612_vm2 = vweird.f32 %v1589_v10 }
  0x6a   : > { %700 = vadd.xlane.f32.xlu0 %v699_v8 }
  0x6b   : > { %v609_v12 = vsub.f32 1.0, %v608_v11  ;;  %v1582_v11 = vld [vmem:[%s2439_s14] ss:$0 sm:$0xff] }
  0x6c   : > { %s1194_s12 = scalar_lea.hbm %s2444_s21, %s2443_s29  ;;  %s1846_s18 = scalar_lea.hbm %s2444_s21, 32 }
  0x6d   : > { %v610_v13 = vmul.f32 %v1589_v10, %v609_v12 }
  0x6f   : > { %v611_v14 = vadd.f32 %v1589_v10, %v610_v13 }
  0x71   : > { %v2217_v15 = vsel %vm612_vm2, %v1589_v10, %v611_v14 }
  0xd5   : > { %v698_v16 = vpop.xlane.xlu0 %697 }
  0xd6   : > { %v702_v17 = vmul.f32 %v698_v16, %v2217_v15  ;;  %v824_v20 = vpop.xlane.xlu2 %823 }
  0xd7   : > { %v833_v24 = vmul.f32 %v824_v20, %v2217_v15 }
  0xd8   : > { %v2220_v18 = vsub.f32 %v694_v0, %v702_v17 }
  0xd9   : > { %v2235_v29 = vsub.f32 %v2211_v5, %v833_v24  ;;  %v1444_v24 = vld [vmem:[#allocation14] sm:$0xff] }
  0xda   : > { %v706_v19 = vmul.f32 %v2220_v18, %v2220_v18 }
  0xdb   : > { %v837_v33 = vmul.f32 %v2235_v29, %v2235_v29 }
  0xdc   : > { %v708_v21 = vsel %vm603_vm0, %v706_v19, 0.0  ;;  %v1441_v19 = vld [vmem:[#allocation15 + $0x8] sm:$0xff] }
  0xdd   : > { %709 = vadd.xlane.f32.xlu2 %v708_v21  ;;  %v701_v22 = vpop.xlane.xlu0 %700  ;;  %v841_v36 = vsel %vm603_vm0, %v837_v33, 0.0  ;;  %669 = vmatpush.bf16.msra.mxu1 %v1441_v19  ;;  %v1440_v21 = vld [vmem:[#allocation15] sm:$0xff] }
  0xde   : > { %v703_v23 = vmul.f32 %v701_v22, %v2217_v15  ;;  %v1445_v22 = vld [vmem:[#allocation14 + $0x8] sm:$0xff] }
  0xdf   : > { %908 = vmatpush.bf16.msra.mxu3 %v1445_v22 }
  0xe0   : > { %v2230_v26 = vsub.f32 %v695_v7, %v703_v23 }
  0xe1   : > { %v599_v27 = vpop.f32.mrf.mxu0  ;;  %670 = vmatpush.bf16.msra.mxu1 %v1440_v21 }
  0xe2   : > { %v707_v28 = vmul.f32 %v2230_v26, %v2230_v26  ;;  %v600_v30 = vadd.f32 %v1580_v25, %v599_v27 }
  0xe3   : > { %909 = vmatpush.bf16.msra.mxu3 %v1444_v24 }
  0xe4   : > { %v711_v31 = vsel %vm603_vm0, %v707_v28, 0.0  ;;  %v604_v32 = vsel %vm603_vm0, %v600_v30, 0.0 }
  0xe5   : > { %712 = vadd.xlane.f32.xlu0 %v711_v31  ;;  %605 = vadd.xlane.f32.xlu1 %v604_v32 }
  0xe9   : > { %v601_v35 = vpop.f32.mrf.mxu0 }
  0xed   : > { %842 = vadd.xlane.f32.xlu0 %v841_v36  ;;  %820 = vadd.xlane.f32.xlu1 %v819_v37 }
 0x150   : > { %v710_v39 = vpop.xlane.xlu2 %709 }
 0x151   : > { %v714_v40 = vmul.f32 %v710_v39, %v2217_v15 }
 0x153   : > { %v716_v42 = vadd.f32 1e-05, %v714_v40 }
 0x155   : > { %1590 = vrsqrt.f32 %v716_v42  ;;  %vm724_vm3 = vweird.f32 %v716_v42 }
 0x158   : > { %v713_v43 = vpop.xlane.xlu0 %712  ;;  %v606_v45 = vpop.xlane.xlu1 %605 }
 0x159   : > { %v715_v44 = vmul.f32 %v713_v43, %v2217_v15  ;;  %v614_v46 = vmul.f32 %v2217_v15, %v606_v45 }
 0x15b   : > { %v1591_v47 = vpop.eup %1590  ;;  %v717_v48 = vadd.f32 1e-05, %v715_v44  ;;  %v2250_v50 = vsub.f32 %v600_v30, %v614_v46  ;;  %v1583_v46 = vld [vmem:[%s2402_s5] ss:$0 sm:$0xff] }
 0x15c   : > { %v719_v49 = vmul.f32 %v1591_v47, %v716_v42  ;;  %vm725_vm4 = vweird.f32 %v1591_v47 }
 0x15d   : > { %1592 = vrsqrt.f32 %v717_v48  ;;  %v616_v52 = vmul.f32 %v2250_v50, %v2250_v50  ;;  %vm726_vm5 = vmor %vm724_vm3, %vm725_vm4  ;;  %vm734_vm6 = vweird.f32 %v717_v48  ;;  %vm677_vm4 = vcmask 125952  }
 0x15e   : > { %v720_v51 = vmul.f32 %v1591_v47, %v719_v49 }
 0x15f   : > { %v617_v54 = vsel %vm603_vm0, %v616_v52, 0.0 }
 0x160   : > { %v721_v53 = vmul.f32 0.5, %v720_v51  ;;  %618 = vadd.xlane.f32.xlu1 %v617_v54  ;;  %v821_v55 = vpop.xlane.xlu1 %820  ;;  %v843_v17 = vpop.xlane.xlu0 %842  ;;  %v1584_v51 = vld [vmem:[%s2439_s14] ss:$0 sm:$0xff] }
 0x161   : > { %v832_v57 = vmul.f32 %v821_v55, %v2217_v15 }
 0x162   : > { %v722_v56 = vsub.f32 1.5, %v721_v53 }
 0x163   : > { %v1593_v58 = vpop.eup %1592  ;;  %v2257_v61 = vsub.f32 %v2242_v34, %v832_v57 }
 0x164   : > { %v723_v59 = vmul.f32 %v1591_v47, %v722_v56  ;;  %v729_v60 = vmul.f32 %v1593_v58, %v717_v48  ;;  %vm735_vm7 = vweird.f32 %v1593_v58 }
 0x165   : > { %v836_v63 = vmul.f32 %v2257_v61, %v2257_v61  ;;  %vm736_vm8 = vmor %vm734_vm6, %vm735_vm7  ;;  %vm958_vm6 = vcmask 195584  }
 0x166   : > { %v730_v62 = vmul.f32 %v1593_v58, %v729_v60  ;;  %v727_v0 = vsel %vm726_vm5, %v1591_v47, %v723_v59  ;;  %vm995_vm5 = vcmask 1043456  }
 0x167   : > { %v838_v2 = vsel %vm603_vm0, %v836_v63, 0.0  ;;  %v738_v4 = vmul.f32 %v727_v0, %v2220_v18  ;;  %v845_v18 = vmul.f32 %v843_v17, %v2217_v15  ;;  %v1586_v0 = vld [vmem:[%s2439_s14] ss:$0 sm:$0xff] }
 0x168   : > { %v731_v1 = vmul.f32 0.5, %v730_v62  ;;  %839 = vadd.xlane.f32.xlu2 %v838_v2 }
 0x169   : > { %v744_v10 = vmul.f32 %v1581_v6, %v738_v4  ;;  %v847_v20 = vadd.f32 1e-05, %v845_v18 }
 0x16a   : > { %v732_v3 = vsub.f32 1.5, %v731_v1 }
 0x16b   : > { %v750_v13 = vadd.f32 %v1582_v11, %v744_v10  ;;  %1594 = vrsqrt.f32 %v847_v20  ;;  %vm864_vm9 = vweird.f32 %v847_v20 }
 0x16c   : > { %v733_v7 = vmul.f32 %v1593_v58, %v732_v3 }
 0x16e   : > { %v737_v8 = vsel %vm736_vm8, %v1593_v58, %v733_v7 }
 0x16f   : > { %v739_v9 = vmul.f32 %v737_v8, %v2230_v26 }
 0x171   : > { %v745_v12 = vmul.f32 %v1581_v6, %v739_v9  ;;  %v1595_v25 = vpop.eup %1594 }
 0x172   : > { %v859_v28 = vmul.f32 %v1595_v25, %v847_v20  ;;  %vm865_vm10 = vweird.f32 %v1595_v25 }
 0x173   : > { %v751_v14 = vadd.f32 %v1582_v11, %v745_v12  ;;  %vm2274_vm12 = vmor %vm864_vm9, %vm865_vm10 }
 0x174   : > { %v860_v30 = vmul.f32 %v1595_v25, %v859_v28 }
 0x175   : > { %v752_v16 = vpack.c.bf16 %v751_v14, %v750_v13 }
 0x176   : > { %v861_v36 = vmul.f32 0.5, %v860_v30 }
 0x177   : > { %1389 = vmatmul.msk.bf16.vlgmr.msra.gmra.mxu2 %vm603_vm0, %v752_v16 }
 0x178   : > { %v862_v39 = vsub.f32 1.5, %v861_v36 }
 0x17a   : > { %v863_v43 = vmul.f32 %v1595_v25, %v862_v39 }
 0x17c   : > { %v867_v52 = vsel %vm2274_vm12, %v1595_v25, %v863_v43 }
 0x17d   : > { %v869_v56 = vmul.f32 %v867_v52, %v2235_v29 }
 0x1d3   : > { %v619_v23 = vpop.xlane.xlu1 %618 }
 0x1d4   : > { %v620_v26 = vmul.f32 %v619_v23, %v2217_v15 }
 0x1d6   : > { %v621_v27 = vadd.f32 1e-05, %v620_v26 }
 0x1d8   : > { %1596 = vrsqrt.f32 %v621_v27  ;;  %vm628_vm13 = vweird.f32 %v621_v27 }
 0x1db   : > { %v840_v31 = vpop.xlane.xlu2 %839 }
 0x1dc   : > { %v844_v32 = vmul.f32 %v840_v31, %v2217_v15 }
 0x1de   : > { %v1597_v33 = vpop.eup %1596  ;;  %v846_v35 = vadd.f32 1e-05, %v844_v32 }
 0x1df   : > { %v623_v37 = vmul.f32 %v1597_v33, %v621_v27  ;;  %vm629_vm11 = vweird.f32 %v1597_v33 }
 0x1e0   : > { %1598 = vrsqrt.f32 %v846_v35  ;;  %vm630_vm14 = vmor %vm628_vm13, %vm629_vm11  ;;  %vm854_vm15 = vweird.f32 %v846_v35 }
 0x1e1   : > { %v624_v38 = vmul.f32 %v1597_v33, %v623_v37 }
 0x1e3   : > { %v625_v40 = vmul.f32 0.5, %v624_v38 }
 0x1e5   : > { %v626_v41 = vsub.f32 1.5, %v625_v40 }
 0x1e6   : > { %v1599_v42 = vpop.eup %1598 }
 0x1e7   : > { %v627_v45 = vmul.f32 %v1597_v33, %v626_v41  ;;  %v849_v15 = vmul.f32 %v1599_v42, %v846_v35  ;;  %vm855_vm2 = vweird.f32 %v1599_v42 }
 0x1e8   : > { %vm856_vm3 = vmor %vm854_vm15, %vm855_vm2 }
 0x1e9   : > { %v631_v47 = vsel %vm630_vm14, %v1597_v33, %v627_v45  ;;  %v850_v48 = vmul.f32 %v1599_v42, %v849_v15 }
 0x1ea   : > { %v632_v49 = vmul.f32 %v631_v47, %v2250_v50  ;;  %v1585_v50 = vld [vmem:[%s2402_s5] ss:$0 sm:$0xff] }
 0x1eb   : > { %v851_v53 = vmul.f32 0.5, %v850_v48  ;;  %v875_v63 = vmul.f32 %v1585_v50, %v869_v56 }
 0x1ec   : > { %v637_v54 = vmul.f32 %v1583_v46, %v632_v49 }
 0x1ed   : > { %v852_v55 = vsub.f32 1.5, %v851_v53  ;;  %v881_v2 = vadd.f32 %v1586_v0, %v875_v63 }
 0x1ee   : > { %v642_v57 = vadd.f32 %v1584_v51, %v637_v54 }
 0x1ef   : > { %v853_v58 = vmul.f32 %v1599_v42, %v852_v55 }
 0x1f0   : > { %v643_v59 = vpack.c.bf16 %v642_v57, %v642_v57 }
 0x1f1   : > { %v857_v60 = vsel %vm856_vm3, %v1599_v42, %v853_v58 }
 0x1f2   : > { %v868_v62 = vmul.f32 %v857_v60, %v2257_v61  ;;  %1380 = vmatmul.msk.bf16.vlgmr.msra.gmra.mxu1 %vm603_vm0, %v643_v59 }
 0x1f4   : > { %v874_v1 = vmul.f32 %v1585_v50, %v868_v62 }
 0x1f6   : > { %v880_v29 = vadd.f32 %v1586_v0, %v874_v1 }
 0x1f8   : > { %v882_v3 = vpack.c.bf16 %v881_v2, %v880_v29 }
 0x1fa   : > { %v781_v4 = vpop.f32.mrf.mxu2  ;;  %1398 = vmatmul.msk.bf16.vlgmr.msra.gmra.mxu3 %vm603_vm0, %v882_v3 }
 0x1fb   : > { %v2296_v6 = vpack.c.bf16 %v781_v4, %v781_v4 }
 0x1fd   : > { %788 = vst.msk [vmem:[#allocation2] sm:$0xf] %vm677_vm4, %v2296_v6  ;;  %800 = vrot.lane.b32.xlu2 %v2296_v6, %s1933_s30 }
 0x202   : > { %v783_v61 = vpop.f32.mrf.mxu2 }
 0x203   : > { %v2303_v7 = vpack.c.bf16 %v783_v61, %v783_v61 }
 0x205   : > { %789 = vst.msk [vmem:[#allocation2 + $0x4] sm:$0xf] %vm677_vm4, %v2303_v7  ;;  %802 = vrot.lane.b32.xlu0 %v2303_v7, %s1933_s30 }
 0x20c   : > { %v1446_v19 = vld [vmem:[#allocation2] sm:$0xff] }
 0x20d   : > { %v939_v23 = vsel %vm586_vm1, %v1446_v19, 0 }
 0x257   : > { %v801_v8 = vpop.permute.xlu2 %800 }
 0x258   : > { %806 = vst.msk [vmem:[#allocation2 + $0xc] sm:$0xf] %vm677_vm4, %v801_v8 }
 0x26f   : > { %v672_v9 = vpop.f32.mrf.mxu1 }
 0x270   : > { %v676_v10 = vpack.c.bf16 %v672_v9, %v672_v9 }
 0x272   : > { %678 = vst.msk [vmem:[#allocation2 + $0x8] sm:$0xf] %vm677_vm4, %v676_v10  ;;  %684 = vrot.lane.b32.xlu1 %v676_v10, %s1933_s30 }
 0x277   : > { %v803_v11 = vpop.permute.xlu0 %802  ;;  %v674_v12 = vpop.f32.mrf.mxu1 }
 0x278   : > { %807 = vst.msk [vmem:[#allocation2 + $0x10] sm:$0xf] %vm677_vm4, %v803_v11 }
 0x279   : > { %v920_v13 = vld [vmem:[#allocation2 + $0x8] sm:$0xf] }
 0x27a   : > { %689 = vrot.lane.b32.xlu1 %v676_v10, %s1934_s13  ;;  %v931_v14 = vunpack.c.l.b16 %v920_v13 }
 0x27c   : > { %v933_v16 = vpack.c.b16 %v931_v14, %v931_v14 }
 0x27d   : > { %v911_v17 = vpop.f32.mrf.mxu3 }
 0x27e   : > { %v942_v18 = vsel %vm586_vm1, %v933_v16, 0  ;;  %v916_v20 = vpack.c.bf16 %v911_v17, %v911_v17 }
 0x27f   : > { %950 = vmatpush.bf16.xpose.msrb.mxu0 %v942_v18  ;;  %v1448_v37 = vld [vmem:[#allocation2 + $0xc] sm:$0xff] }
 0x280   : > { %v923_v24 = vunpack.c.l.b16 %v916_v20  ;;  %v1038_v40 = vsel %vm586_vm1, %v1448_v37, 0 }
 0x282   : > { %808 = vrot.lane.b32.xlu1 %v2296_v6, %s1934_s13 }
 0x285   : > { %v913_v21 = vpop.f32.mrf.mxu3 }
 0x286   : > { %v917_v22 = vpack.c.bf16 %v913_v21, %v913_v21 }
 0x287   : > { %951 = vmatpush.bf16.xpose.msrb.mxu0 %v939_v23 }
 0x288   : > { %v924_v25 = vunpack.c.l.b16 %v917_v22 }
 0x28a   : > { %v925_v26 = vpack.c.b16 %v924_v25, %v923_v24  ;;  %810 = vrot.lane.b32.xlu1 %v2303_v7, %s1934_s13  ;;  %s1197_s13 = sshll.u32 %s1194_s12, 4  ;;  %s1198_s13 = int_to_ptr.hbm [resolvable:$true] %s1197_s13 }
 0x28c   : > { %1024 = vrot.lane.b32.xlu2 %v925_v26, %s1933_s30  ;;  %s1195_s30 = sshll.u32 %s564_s23, 4  ;;  %s1196_s30 = int_to_ptr.vmem [resolvable:$true] %s1195_s30 }
 0x28e   : > { %1403 = vmatmul.msk.bf16.vlgmr.msrb.gmra.mxu0 %vm586_vm1, %v925_v26 }
 0x292   : > { %680 = vrot.lane.b32.xlu1 %v676_v10, %s1935_s16 }
 0x2e4   : > { %v685_v27 = vpop.permute.xlu1 %684 }
 0x2e5   : > { %688 = vst.msk [vmem:[#allocation2 + $0x14] sm:$0xf] %vm677_vm4, %v685_v27 }
 0x2e6   : > { %v1025_v43 = vpop.permute.xlu2 %1024 }
 0x2ec   : > { %v690_v28 = vpop.permute.xlu1 %689  ;;  %v1023_v30 = vld [vmem:[#allocation2 + $0x14] sm:$0xf] }
 0x2ed   : > { %693 = vst.msk [vmem:[#allocation3 + $0x14] sm:$0xf] %vm677_vm4, %v690_v28  ;;  %v1031_v31 = vunpack.c.l.b16 %v1023_v30 }
 0x2ef   : > { %v1033_v32 = vpack.c.b16 %v1031_v31, %v1031_v31 }
 0x2f1   : > { %v1041_v33 = vsel %vm586_vm1, %v1033_v32, 0 }
 0x2f2   : > { %1049 = vmatpush.bf16.xpose.msrb.mxu2 %v1041_v33 }
 0x2f4   : > { %v809_v35 = vpop.permute.xlu1 %808  ;;  %v1081_v36 = vld [vmem:[#allocation3 + $0x14] sm:$0xf] }
 0x2f5   : > { %814 = vst.msk [vmem:[#allocation3 + $0xc] sm:$0xf] %vm677_vm4, %v809_v35  ;;  %v1087_v38 = vunpack.c.l.b16 %v1081_v36 }
 0x2f7   : > { %v1089_v39 = vpack.c.b16 %v1087_v38, %v1087_v38 }
 0x2f9   : > { %v1095_v41 = vsel %vm995_vm5, %v1089_v39, 0 }
 0x2fa   : > { %1050 = vmatpush.bf16.xpose.msrb.mxu2 %v1038_v40  ;;  %1103 = vmatpush.bf16.msrb.mxu3 %v1095_v41  ;;  %v1452_v41 = vld [vmem:[#allocation17 + $0x8] sm:$0xff] }
 0x2fb   : > { %1162 = vmatpush.bf16.msra.mxu0 %v1452_v41 }
 0x2fc   : > { %v811_v42 = vpop.permute.xlu1 %810 }
 0x2fd   : > { %815 = vst.msk [vmem:[#allocation3 + $0x10] sm:$0xf] %vm677_vm4, %v811_v42  ;;  %v1451_v42 = vld [vmem:[#allocation17] sm:$0xff] }
 0x2ff   : > { %1163 = vmatpush.bf16.msra.mxu0 %v1451_v42 }
 0x301   : > { %1413 = vmatmul.msk.bf16.vlgmr.msrb.gmra.mxu2 %vm586_vm1, %v1025_v43  ;;  %vm1123_vm1 = vcmask 257152  }
 0x304   : > { %v681_v44 = vpop.permute.xlu1 %680  ;;  %v1449_v45 = vld [vmem:[#allocation3 + $0xc] sm:$0xff] }
 0x305   : > { %683 = vst.msk [vmem:[#allocation3 + $0x8] sm:$0xf] %vm677_vm4, %v681_v44  ;;  %1104 = vmatpush.bf16.msrb.mxu3 %v1449_v45 }
 0x30b   : > { %v953_v15 = vpop.f32.mrf.mxu0 }
 0x30c   : > { %v959_v46 = vsel %vm958_vm6, %v953_v15, -inf  ;;  %v982_v47 = vld [vmem:[#allocation3 + $0x8] sm:$0xf] }
 0x30d   : > { %960 = vmax.xlane.f32.xlu1 %v959_v46  ;;  %v988_v48 = vunpack.c.l.b16 %v982_v47  ;;  %v1173_v47 = vstv %s1172_s8 }
 0x30f   : > { %v990_v49 = vpack.c.b16 %v988_v48, %v988_v48 }
 0x311   : > { %v997_v51 = vsel %vm995_vm5, %v990_v49, 0 }
 0x312   : > { %1005 = vmatpush.bf16.msrb.mxu1 %v997_v51 }
 0x313   : > { %v955_v57 = vpop.f32.mrf.mxu0 }
 0x314   : > { %v962_v62 = vsel %vm958_vm6, %v955_v57, -inf }
 0x380   : > { %v961_v52 = vpop.xlane.xlu1 %960 }
 0x381   : > { %v965_v53 = vsub.f32 %v953_v15, %v961_v52  ;;  %v1587_v15 = vld [vmem:[%s2442_s20] ss:$0 sm:$0xff] }
 0x383   : > { %v967_v54 = vmul.f32 1.442695, %v965_v53 }
 0x384   : > { %v1052_v55 = vpop.f32.mrf.mxu2 }
 0x385   : > { %1600 = vpow2.f32 %v967_v54  ;;  %v1057_v56 = vsel %vm958_vm6, %v1052_v55, -inf }
 0x386   : > { %1058 = vmax.xlane.f32.xlu0 %v1057_v56 }
 0x38b   : > { %v1601_v50 = vpop.eup %1600 }
 0x38c   : > { %v1054_v58 = vpop.f32.mrf.mxu2  ;;  %v971_v59 = vsel %vm958_vm6, %v1601_v50, 0.0 }
 0x38d   : > { %972 = vadd.xlane.f32.xlu1 %v971_v59  ;;  %v1060_v60 = vsel %vm958_vm6, %v1054_v58, -inf }
 0x38e   : > { %1061 = vmax.xlane.f32.xlu2 %v1060_v60  ;;  %963 = vmax.xlane.f32.xlu0 %v962_v62 }
 0x3a2   : > { %794 = vrot.lane.b32.xlu0 %v2303_v7, %s1935_s16 }
 0x3a6   : > { %792 = vrot.lane.b32.xlu2 %v2296_v6, %s1935_s16  ;;  %s1840_s16 = sshra.s32 %s1198_s13, 4  ;;  %s1841_s16 = int_to_ptr.hbm [resolvable:$true] %s1840_s16 }
 0x3a7   : > { %p1847_p6 = scmp.lt.s32.totalorder %s1841_s16, %s2444_s21 }
 0x3f9   : > { %v1059_v63 = vpop.xlane.xlu0 %1058 }
 0x3fa   : > { %v1063_v0 = vsub.f32 %v1052_v55, %v1059_v63 }
 0x3fc   : > { %v1065_v1 = vmul.f32 1.442695, %v1063_v0 }
 0x3fe   : > { %1602 = vpow2.f32 %v1065_v1 }
 0x400   : > { %v973_v24 = vpop.xlane.xlu1 %972 }
 0x401   : > { %v1062_v29 = vpop.xlane.xlu2 %1061  ;;  %v964_v2 = vpop.xlane.xlu0 %963 }
 0x402   : > { %v1064_v3 = vsub.f32 %v1054_v58, %v1062_v29  ;;  %v966_v4 = vsub.f32 %v955_v57, %v964_v2 }
 0x404   : > { %v1603_v61 = vpop.eup %1602  ;;  %v1067_v8 = vmul.f32 1.442695, %v1064_v3  ;;  %v969_v9 = vmul.f32 1.442695, %v966_v4 }
 0x405   : > { %v1069_v10 = vsel %vm958_vm6, %v1603_v61, 0.0 }
 0x406   : > { %1604 = vpow2.f32 %v1067_v8  ;;  %1070 = vadd.xlane.f32.xlu2 %v1069_v10 }
 0x407   : > { %1606 = vpow2.f32 %v969_v9 }
 0x409   : > { %v793_v7 = vpop.permute.xlu2 %792 }
 0x40a   : > { %798 = vst.msk [vmem:[#allocation3] sm:$0xf] %vm677_vm4, %v793_v7 }
 0x40c   : > { %v1605_v6 = vpop.eup %1604 }
 0x40d   : > { %v1607_v11 = vpop.eup %1606  ;;  %v1072_v12 = vsel %vm958_vm6, %v1605_v6, 0.0  ;;  %v1077_v13 = vpack.c.bf16 %v1605_v6, %v1603_v61 }
 0x40e   : > { %1073 = vadd.xlane.f32.xlu0 %v1072_v12  ;;  %v974_v14 = vsel %vm958_vm6, %v1607_v11, 0.0  ;;  %v979_v18 = vpack.c.bf16 %v1607_v11, %v1601_v50 }
 0x40f   : > { %975 = vadd.xlane.f32.xlu1 %v974_v14  ;;  %1418 = vmatmul.msk.bf16.vlgmr.msrb.gmra.mxu3 %vm958_vm6, %v1077_v13 }
 0x414   : > { %v795_v16 = vpop.permute.xlu0 %794 }
 0x415   : > { %799 = vst.msk [vmem:[#allocation3 + $0x4] sm:$0xf] %vm677_vm4, %v795_v16 }
 0x41c   : > { %v1447_v17 = vld [vmem:[#allocation3] sm:$0xff] }
 0x41d   : > { %1006 = vmatpush.bf16.msrb.mxu1 %v1447_v17 }
 0x420   : > { %1408 = vmatmul.msk.bf16.vlgmr.msrb.gmra.mxu1 %vm958_vm6, %v979_v18 }
 0x479   : > { %v1071_v19 = vpop.xlane.xlu2 %1070 }
 0x47a   : > { %1608 = vrcp.f32 %v1071_v19 }
 0x480   : > { %v1609_v21 = vpop.eup %1608 }
 0x481   : > { %v1074_v20 = vpop.xlane.xlu0 %1073 }
 0x482   : > { %1610 = vrcp.f32 %v1074_v20  ;;  %v976_v30 = vpop.xlane.xlu1 %975 }
 0x483   : > { %1612 = vrcp.f32 %v973_v24 }
 0x484   : > { %1614 = vrcp.f32 %v976_v30 }
 0x488   : > { %v1611_v26 = vpop.eup %1610 }
 0x489   : > { %v1613_v32 = vpop.eup %1612 }
 0x48a   : > { %v1615_v37 = vpop.eup %1614 }
 0x492   : > { %v1106_v22 = vpop.f32.mrf.mxu3 }
 0x493   : > { %v1111_v23 = vmul.f32 %v1609_v21, %v1106_v22 }
 0x495   : > { %v1113_v25 = vpack.c.bf16 %v1111_v23, %v1111_v23 }
 0x497   : > { %1117 = vrot.lane.b32.xlu1 %v1113_v25, %s1936_s3 }
 0x49a   : > { %v1108_v27 = vpop.f32.mrf.mxu3 }
 0x49b   : > { %v1112_v28 = vmul.f32 %v1611_v26, %v1108_v27 }
 0x49d   : > { %v1114_v31 = vpack.c.bf16 %v1112_v28, %v1112_v28  ;;  %v1008_v33 = vpop.f32.mrf.mxu1 }
 0x49e   : > { %v1013_v35 = vmul.f32 %v1613_v32, %v1008_v33 }
 0x49f   : > { %1119 = vrot.lane.b32.xlu2 %v1114_v31, %s1936_s3  ;;  %s1842_s3 = scalar_lea.hbm %s1841_s16, 16 }
 0x4a0   : > { %v1015_v36 = vpack.c.bf16 %v1013_v35, %v1013_v35  ;;  %p1843_p1 = scmp.ne.s32.totalorder %s1841_s16, %s1842_s3  ;;  %p1848_p9 = scmp.lt.s32.totalorder %s1846_s18, %s1842_s3 }
 0x4a2   : > { %1018 = vst.msk [vmem:[#allocation4] sm:$0xf] %vm677_vm4, %v1015_v36  ;;  %p1844_p3 = pnand %p1843_p1, %p2162_p13  ;;  %p1849_p12 = por %p1848_p9, %p1847_p6 }
 0x4a4   : > { %p1845_p7 = pneg %p1844_p3 }
 0x4a5   : > { %v1010_v38 = vpop.f32.mrf.mxu1 }
 0x4a6   : > { %v1014_v39 = vmul.f32 %v1615_v37, %v1010_v38  ;;  %p1850_p8 = pnand %p1849_p12, %p1845_p7 }
 0x4a8   : > { %v1016_v40 = vpack.c.bf16 %v1014_v39, %v1014_v39 }
 0x4aa   : > { %1019 = vst.msk [vmem:[#allocation4 + $0x4] sm:$0xf] %vm677_vm4, %v1016_v40 }
 0x4f9   : > { %v1120_v43 = vpop.permute.xlu2 %1119 }
 0x4fa   : > { %1125 = vst.msk [vmem:[#allocation4 + $0x4] sm:$0xf] %vm1123_vm1, %v1120_v43 }
 0x509   : > { %v1118_v44 = vpop.permute.xlu1 %1117 }
 0x50a   : > { %1124 = vst.msk [vmem:[#allocation4] sm:$0xf] %vm1123_vm1, %v1118_v44 }
 0x511   : > { %v1450_v45 = vld [vmem:[#allocation4] sm:$0xff] }
 0x512   : > { %1431 = vmatmul.msk.bf16.vlgmr.msra.gmra.mxu0 %vm603_vm0, %v1450_v45 }
 0x58f   : > { %v1165_v46 = vpop.f32.mrf.mxu0 }
 0x590   : > { %v1166_v48 = vadd.f32 %v1587_v15, %v1165_v46 }
 0x592   : > { %v1174_v49 = vmul.f32 %v1173_v47, %v1166_v48 }
 0x594   : > { %v1176_v51 = vadd.f32 %v1174_v49, %v2242_v34 }
 0x596   : > { %1178 = vst.msk [vmem:[%s564_s23] sm:$0xff] %vm603_vm0, %v1176_v51 }
 0x597   : > { %v1167_v52 = vpop.f32.mrf.mxu0 }
 0x598   : > { %v1168_v53 = vadd.f32 %v1587_v15, %v1167_v52 }
 0x59a   : > { %v1175_v54 = vmul.f32 %v1173_v47, %v1168_v53 }
 0x59c   : > { %v1177_v55 = vadd.f32 %v1175_v54, %v2211_v5 }
 0x59e   : > { %1179 = vst.msk [vmem:[%s564_s23 + $0x8] sm:$0xff] %vm603_vm0, %v1177_v55 }
 0x59f   : > { %1853 = shalt.err (!%p1850_p8)
}
 0x5a0   : > { %s1937_s11 = smov 128   ;;  %s1938_s29 = smov 8  }
 0x5a1   : > { %1476 = dma.vmem_to_hbm [thread:$0]  (%p2162_p13), %s1196_s30, 256, %s1198_s13, %s1181_s26, %s1937_s11, %s1937_s11, %s1938_s29  }
 0x5a2 PF: > { %s2445_s6 = sld [smem:[#allocation24_spill]]  ;;  %p2447_p10 = scmp.ge.s32.totalorder %s1920_s28, 2 }
 0x5a4   : > { %p1502_p0 = pnand %p2447_p10, %p2054_p5 }
 0x5a6   : > { %p1503_p11 = pneg %p1502_p0 }
 0x5a8   : > { %s1212_s12 = sand.u32 1, %s2445_s6  }
 0x5a9   : > { %s1213_s23 = scalar_lea.sflag [#allocation8], %s1212_s12 }
 0x5aa   : > { %1895 = dma.done.wait (%p1503_p11), %s1213_s23, 256  }
 0x5ab   : > { %1897 = vsyncadd (%p1503_p11), %s1213_s23, 4294967040  ;;  %s32_s28 = sadd.s32 1, %s1920_s28   ;;  %s2448_s23 = smov %s1904_s24 }
 0x5ac   : > { %p29_p2 = scmp.ge.s32.totalorder %s32_s28, 4   ;;  %s2449_s24 = smov %s1908_s25 }
 0x5ad   : > { %s2450_s25 = smov %s2172_s17  ;;  %s2451_s26 = smov %s1916_s27 }
 0x5ae   : > { %s2452_s27 = smov %s2454_s22  ;;  %31 = sbr.rel (!%p29_p2) target bundleno = 17 (0x11), region = 147 }
 0x5b3   :  { %1219 = vsyncpa [#allocation7], 1 }
 0x5b4   :  { %1221 = vsyncpa [#allocation7 + $0x1], 1 }
 0x5b5   :  { %1222 = vsyncpa [#allocation10], 1 }
 0x5b6   :  { %1223 = vsyncpa [#allocation13], 1 }
 0x5b7   :  { %1224 = vsyncpa [#allocation16], 1 }
 0x5b8   :  { %1225 = vsyncpa [#allocation8], 1 }
 0x5b9   :  { %1227 = vsyncpa [#allocation8 + $0x1], 1 }

// kernel: tpu_custom_call.1
= control target key start
LH: loop header
LB: loop body
LE: loop exit
PB: predicated region body
PF: predicated region fallthrough
CT: control target
= control target key end

     0   :  { %s2426_s0 = inlined_call_operand.hbm [shape: f32[2,16,32], index: 0, kind: input, shape index: {}]   ;;  %s2427_s1 = inlined_call_operand.hbm [shape: f32[2,16,32], index: 1, kind: input, shape index: {}]   ;;  %s2428_s2 = inlined_call_operand.hbm [shape: f32[2,8,16], index: 2, kind: input, shape index: {}]   ;;  %s2429_s3 = inlined_call_operand.hbm [shape: bf16[16,32], index: 3, kind: input, shape index: {}]   ;;  %s2430_s4 = inlined_call_operand.vmem [shape: f32[1,32], index: 4, kind: input, shape index: {}]   ;;  %s2431_s5 = inlined_call_operand.vmem [shape: f32[1,32], index: 5, kind: input, shape index: {}]   ;;  %s2432_s6 = inlined_call_operand.vmem [shape: f32[1,32], index: 6, kind: input, shape index: {}]   ;;  %s2433_s7 = inlined_call_operand.hbm [shape: bf16[32,32], index: 7, kind: input, shape index: {}]   ;;  %s2434_s8 = inlined_call_operand.hbm [shape: bf16[32,64], index: 8, kind: input, shape index: {}]   ;;  %s2435_s9 = inlined_call_operand.hbm [shape: bf16[32,32], index: 9, kind: input, shape index: {}]   ;;  %s2436_s10 = inlined_call_operand.vmem [shape: f32[1,32], index: 10, kind: input, shape index: {}]   ;;  %s2437_s11 = inlined_call_operand.<no memory space> [shape: f32[1,1], index: 11, kind: input, shape index: {}]   ;;  %s2438_s12 = inlined_call_operand.hbm [shape: f32[2,16,32], index: 12, kind: output, shape index: {}]  }
   0x1   :  { %2452 = sst [smem:[#allocation30_spill]] %s2426_s0 }
   0x2   :  { %2453 = sst [smem:[#allocation31_spill]] %s2427_s1 }
   0x3   :  { %2454 = sst [smem:[#allocation32_spill]] %s2429_s3 }
   0x4   :  { %2455 = sst [smem:[#allocation33_spill]] %s2431_s5 }
   0x5   :  { %2456 = sst [smem:[#allocation34_spill]] %s2432_s6 }
   0x6   :  { %2457 = sst [smem:[#allocation35_spill]] %s2433_s7 }
   0x7   :  { %2458 = sst [smem:[#allocation36_spill]] %s2434_s8 }
   0x8   :  { %2459 = sst [smem:[#allocation37_spill]] %s2435_s9 }
   0x9   :  { %2460 = sst [smem:[#allocation38_spill]] %s2436_s10 }
   0xa   :  { %2461 = sst [smem:[#allocation39_spill]] %s2438_s12 }
   0xb   :  { %17 = sst [smem:[#allocation5]] %s2437_s11 }
   0xc   :  { %18 = vsyncpa [#allocation7], 0 }
   0xd   :  { %20 = vsyncpa [#allocation7 + $0x1], 0 }
   0xe   :  { %21 = vsyncpa [#allocation10], 0 }
   0xf   :  { %23 = vsyncpa [#allocation10 + $0x1], 0 }
  0x10   :  { %24 = vsyncpa [#allocation13], 0 }
  0x11   :  { %25 = vsyncpa [#allocation16], 0 }
  0x12   :  { %26 = vsyncpa [#allocation8], 0 }
  0x13   :  { %28 = vsyncpa [#allocation8 + $0x1], 0  ;;  %s2059_s23 = smov 0   ;;  %s2061_s24 = smov 0  }
  0x14   :  { %s2063_s25 = smov 0   ;;  %s2065_s26 = smov 0  }
  0x15   :  { %s2067_s27 = smov 0   ;;  %s2069_s28 = smov 0  }
  0x16 LB: > { %2462 = sst [smem:[#allocation24_spill]] %s1954_s23  ;;  %s2090_s11 = sadd.s32 4294967295, %s1974_s28   ;;  %s1974_s28 = sphi %s2069_s28, %s34_s28   ;;  %s1970_s27 = sphi %s2067_s27, %s2500_s27   ;;  %s1966_s26 = sphi %s2065_s26, %s2499_s26   ;;  %s1962_s25 = sphi %s2063_s25, %s2498_s25   ;;  %s1958_s24 = sphi %s2061_s24, %s2497_s24   ;;  %s1954_s23 = sphi %s2059_s23, %s2496_s23  }
  0x17   : > { %2463 = sst [smem:[#allocation25_spill]] %s1966_s26  ;;  %s1399_s29 = sadd.s32 4294967294, %s1974_s28  }
  0x18   : > { %p68_p0 = scmp.ne.s32.totalorder %s1958_s24, %s1954_s23  ;;  %p69_p1 = scmp.eq.s32.totalorder %s2090_s11, 0 }
  0x19   : > { %p335_p2 = scmp.eq.s32.totalorder %s2090_s11, 1  ;;  %p341_p3 = scmp.eq.s32.totalorder %s1399_s29, 1 }
  0x1a   : > { %p2099_p4 = por %p69_p1, %p68_p0  ;;  %p1400_p5 = scmp.ge.s32.totalorder %s1974_s28, 1 }
  0x1b   : > { %p2104_p6 = por %p341_p3, %p68_p0  ;;  %p348_p7 = scmp.lt.s32.totalorder %s1974_s28, 3 }
  0x1c   : > { %s2467_s3 = sld [smem:[#allocation32_spill]]  ;;  %s1976_s18 = smov [#allocation12]  }
  0x1d   : > { %s2465_s13 = scalar_select %p2104_p6, 1, 0 }
  0x1e   : > { %p2112_p8 = pnand %p1400_p5, %p348_p7  ;;  %s361_s19 = sshll.u32 %s1976_s18, 4  ;;  %s362_s19 = int_to_ptr.vmem [resolvable:$true] %s361_s19 }
  0x1f   : > { %2466 = sst [smem:[#allocation26_spill]] %s2465_s13  ;;  %s2439_s14 = smov 64  }
  0x20   : > { %p1534_p9 = pneg %p2112_p8  ;;  %s2470_s8 = sld [smem:[#allocation36_spill]] }
  0x21   : > { %s2441_s15 = smov 4   ;;  %s1979_s18 = smov [#allocation15]  }
  0x22   : > { %s359_s16 = sshll.u32 %s2467_s3, 4  ;;  %p2120_p10 = pnand %p1534_p9, %p69_p1  ;;  %s360_s16 = int_to_ptr.hbm [resolvable:$true] %s359_s16 }
  0x23   : > { %s398_s3 = sshll.u32 %s1979_s18, 4  ;;  %s46_s21 = sadd.s32 1, %s1970_s27  ;;  %s399_s3 = int_to_ptr.vmem [resolvable:$true] %s398_s3 }
  0x24   : > { %1537 = dma.hbm_to_vmem [thread:$0]  (!%p2120_p10), %s360_s16, 128, %s362_s19, [#allocation13], %s2439_s14, %s2439_s14, %s2441_s15  }
  0x25   : > { %s55_s22 = sadd.s32 1, %s1962_s25  ;;  %p48_p12 = scmp.ge.s32.totalorder %s46_s21, 2 }
  0x26   : > { %s396_s29 = sshll.u32 %s2470_s8, 4  ;;  %p62_p13 = scmp.ne.s32.totalorder %s1962_s25, %s1958_s24  ;;  %s397_s29 = int_to_ptr.hbm [resolvable:$true] %s396_s29 }
  0x27   : > { %1543 = dma.hbm_to_vmem [thread:$0]  (!%p2120_p10), %s397_s29, 256, %s399_s3, [#allocation16], %s2439_s14, %s2439_s14, %s2441_s15  }
  0x28   : > { %p63_p0 = scmp.eq.s32.totalorder %s1974_s28, 0  ;;  %p1565_p3 = scmp.lt.s32.totalorder %s1974_s28, 2 }
  0x29   : > { %s2502_s21 = smov (%p48_p12, %s46_s21), 0  ;;  %p2148_p7 = por %p335_p2, %p62_p13 }
  0x2a   : > { %2471 = sst [smem:[#allocation27_spill]] %s2502_s21  ;;  %p64_p5 = por %p63_p0, %p62_p13 }
  0x2b   : > { %s2472_s16 = scalar_select %p2148_p7, 1, 0 }
  0x2c   : > { %s50_s19 = ssub.s32 %s1970_s27, %s2502_s21  ;;  %s2155_s18 = sand.u32 1, %s1962_s25  }
  0x2d   : > { %2473 = sst [smem:[#allocation28_spill]] %s2472_s16  ;;  %p53_p9 = scmp.eq.s32.totalorder %s50_s19, 0 }
  0x2e   : > { %s2451_s3 = sshll.u32 %s2155_s18, 4  ;;  %s1493_s29 = sshll.u32 %s1970_s27, 4 }
  0x2f   : > { %p2159_p11 = pnand %p1565_p3, %p64_p5  ;;  %s456_s8 = sand.u32 1, %s1974_s28  }
  0x30   : > { %s2164_s15 = scalar_select %p53_p9, %s1962_s25, %s55_s22  }
  0x31   : > { %s2476_s1 = sld [smem:[#allocation31_spill]]  ;;  %s460_s21 = scalar_lea.vmem [#allocation9], %s2451_s3 }
  0x32   : > { %2475 = sst [smem:[#allocation29_spill]] %s2164_s15  ;;  %s468_s12 = sshll.u32 %s460_s21, 4  ;;  %s469_s12 = int_to_ptr.vmem [resolvable:$true] %s468_s12 }
  0x33   : > { %s2477_s7 = sld [smem:[#allocation35_spill]]  ;;  %s2175_s5 = scalar_lea.sflag [#allocation10], %s456_s8 }
  0x34   : > { %s1980_s22 = smov 128   ;;  %s1981_s15 = smov 8  }
  0x35   : > { %s1982_s23 = smov [#allocation14]   ;;  %s2478_s9 = sld [smem:[#allocation37_spill]] }
  0x36   : > { %s384_s13 = sshll.u32 %s1982_s23, 4  ;;  %s2479_s8 = smov 4   ;;  %s385_s13 = int_to_ptr.vmem [resolvable:$true] %s384_s13 }
  0x37   : > { %s465_s16 = scalar_lea.hbm %s2476_s1, %s1493_s29  ;;  %s2480_s26 = smov 64  }
  0x38   : > { %s466_s10 = sshll.u32 %s465_s16, 4  ;;  %s1983_s19 = smov [#allocation17]   ;;  %s467_s10 = int_to_ptr.hbm [resolvable:$true] %s466_s10 }
  0x39   : > { %s382_s6 = sshll.u32 %s2477_s7, 4  ;;  %s2481_s0 = sld [smem:[#allocation30_spill]]  ;;  %s383_s6 = int_to_ptr.hbm [resolvable:$true] %s382_s6 }
  0x3a   : > { %1553 = dma.hbm_to_vmem [thread:$0]  (!%p2159_p11), %s467_s10, 256, %s469_s12, %s2175_s5, %s1980_s22, %s1980_s22, %s1981_s15  }
  0x3b   : > { %s410_s3 = sshll.u32 %s2478_s9, 4  ;;  %s412_s10 = sshll.u32 %s1983_s19, 4  ;;  %s411_s3 = int_to_ptr.hbm [resolvable:$true] %s410_s3  ;;  %s413_s10 = int_to_ptr.vmem [resolvable:$true] %s412_s10 }
  0x3c   : > { %1540 = dma.hbm_to_vmem [thread:$0]  (!%p2120_p10), %s383_s6, 256, %s385_s13, [#allocation13], %s2480_s26, %s2480_s26, %s2479_s8  }
  0x3d   : > { %1546 = dma.hbm_to_vmem [thread:$0]  (!%p2120_p10), %s411_s3, 256, %s413_s10, [#allocation16], %s2480_s26, %s2480_s26, %s2479_s8  }
  0x3e   : > { %s2482_s16 = sshll.u32 %s2155_s18, 4  ;;  %s433_s6 = scalar_lea.sflag [#allocation7], %s2155_s18 }
  0x3f   : > { %s443_s23 = scalar_lea.hbm %s2481_s0, %s1493_s29  ;;  %s436_s7 = scalar_lea.vmem [#allocation6], %s2482_s16 }
  0x40   : > { %s444_s21 = sshll.u32 %s443_s23, 4  ;;  %s446_s9 = sshll.u32 %s436_s7, 4  ;;  %s445_s21 = int_to_ptr.hbm [resolvable:$true] %s444_s21  ;;  %s447_s9 = int_to_ptr.vmem [resolvable:$true] %s446_s9 }
  0x41   : > { %1550 = dma.hbm_to_vmem [thread:$0]  (!%p2159_p11), %s445_s21, 256, %s447_s9, %s433_s6, %s1980_s22, %s1980_s22, %s1981_s15  }
  0x42   : > { %s1412_s13 = sshll.u32 %s2155_s18, 3  ;;  %s1413_s19 = sshll.u32 %s1970_s27, 3 }
  0x43   : > { %s486_s20 = scalar_lea.hbm %s2428_s2, %s1413_s19  ;;  %s482_s0 = scalar_lea.vmem [#allocation11], %s1412_s13 }
  0x44   : > { %s488_s12 = sshll.u32 %s486_s20, 4  ;;  %s490_s3 = sshll.u32 %s482_s0, 4  ;;  %s489_s12 = int_to_ptr.hbm [resolvable:$true] %s488_s12  ;;  %s491_s3 = int_to_ptr.vmem [resolvable:$true] %s490_s3 }
  0x45   : > { %1556 = dma.hbm_to_vmem [thread:$0]  (!%p2159_p11), %s489_s12, 128, %s491_s3, %s2175_s5  }
  0x46   : > { %499 = sbr.rel (%p2112_p8) target bundleno = 1431 (0x597), region = 68  ;;  %s2212_s7 = sand.u32 (!%p2112_p8), 1, %s1958_s24  }
  0x47   : > { %s2215_s9 = sshll.u32 (!%p2112_p8), %s2212_s7, 4  ;;  %s502_s15 = scalar_lea.sflag (!%p2112_p8), [#allocation7], %s2212_s7 }
  0x48   : > { %s505_s18 = scalar_lea.vmem (!%p2112_p8), [#allocation6], %s2215_s9 }
  0x4b   : > { %1933 = dma.done.wait (%p2099_p4), %s502_s15, 256  }
  0x4c   : > { %1935 = vsyncadd (%p2099_p4), %s502_s15, 4294967040  ;;  %s511_s0 = sand.u32 1, %s2090_s11   ;;  %s515_s17 = scalar_lea.vmem [#allocation9], %s2215_s9 }
  0x4d   : > { %s512_s5 = scalar_lea.sflag [#allocation10], %s511_s0 }
  0x4e   : > { %1937 = dma.done.wait (%p2099_p4), %s512_s5, 384  }
  0x4f   : > { %1939 = vsyncadd (%p2099_p4), %s512_s5, 4294966912  ;;  %s1417_s14 = sshll.u32 %s2212_s7, 3 }
  0x50   : > { %s525_s22 = scalar_lea.vmem [#allocation11], %s1417_s14 }
  0x51   : > { %1941 = dma.done.wait (%p69_p1), [#allocation13], 384  }
  0x52   : > { %1943 = vsyncadd (%p69_p1), [#allocation13], 4294966912 }
  0x53   : > { %1945 = dma.done.wait (%p69_p1), [#allocation16], 512  }
  0x54   : > { %1947 = vsyncadd (%p69_p1), [#allocation16], 4294966784  ;;  %vm635_vm0 = vcmask 261120   ;;  %v726_v0 = vld [vmem:[%s515_s17] sm:$0xff]  ;;  %v2241_v5 = vld [vmem:[%s505_s18 + $0x8] sm:$0xff]  ;;  %vm618_vm1 = vcmask 130048  }
  0x55   : > { %v1495_v1 = vld [vmem:[#allocation12] sm:$0xff]  ;;  %v604_v2 = vld [vmem:[%s525_s22] sm:$0xff]  ;;  %v728_v3 = vsel %vm635_vm0, %v726_v0, 0.0  ;;  %v854_v6 = vsel %vm635_vm0, %v2241_v5, 0.0  ;;  %v727_v7 = vld [vmem:[%s515_s17 + $0x8] sm:$0xff]  ;;  %v1984_v9 = vmov 32.0  }
  0x56   : > { %v605_v4 = vpack.c.bf16 %v604_v2, %v604_v2  ;;  %729 = vadd.xlane.f32.xlu0 %v728_v3  ;;  %629 = vmatpush.bf16.msra.mxu0 %v1495_v1  ;;  %v731_v8 = vsel %vm635_vm0, %v727_v7, 0.0  ;;  %1642 = vrcp.f32 %v1984_v9  ;;  %v1634_v25 = vld [vmem:[%s2430_s4] ss:$0 sm:$0xff]  ;;  %v2273_v34 = vld [vmem:[%s505_s18] sm:$0xff]  ;;  %s2483_s10 = sld [smem:[#allocation33_spill]]  ;;  %s1985_s15 = smov 112  }
  0x57   : > { %855 = vadd.xlane.f32.xlu2 %v854_v6  ;;  %v851_v37 = vsel %vm635_vm0, %v2273_v34, 0.0  ;;  %v1499_v38 = vld [vmem:[#allocation15 + $0x8] sm:$0xff]  ;;  %v1498_v41 = vld [vmem:[#allocation15] sm:$0xff]  ;;  %s2484_s16 = sld [smem:[#allocation34_spill]]  ;;  %s1986_s18 = smov 80  }
  0x58   : > { %810 = vmatpush.bf16.msra.mxu2 %v1499_v38  ;;  %s1987_s0 = smov 96   ;;  %s1988_s5 = smov 16  }
  0x59   : > { %1427 = vmatmul.msk.bf16.vlgmr.msra.gmra.mxu0 %vm618_vm1, %v605_v4  ;;  %s2487_s17 = sld [smem:[#allocation25_spill]]  ;;  %s596_s13 = scalar_lea.vmem [#allocation18], %s2215_s9 }
  0x5a   : > { %s1204_s14 = sld [smem:[#allocation5]]  ;;  %s1227_s1 = sshll.u32 %s596_s13, 4  ;;  %s1228_s1 = int_to_ptr.vmem [resolvable:$true] %s1227_s1 }
  0x5b   : > { %s2488_s30 = sld [smem:[#allocation38_spill]]  ;;  %s1213_s20 = scalar_lea.sflag [#allocation8], %s2212_s7 }
  0x5c   : > { %v1643_v10 = vpop.eup %1642  ;;  %811 = vmatpush.bf16.msra.mxu2 %v1498_v41  ;;  %v1635_v6 = vld [vmem:[%s2483_s10] ss:$0 sm:$0xff]  ;;  %s2489_s21 = sld [smem:[#allocation39_spill]] }
  0x5d   : > { %v640_v11 = vmul.f32 32.0, %v1643_v10  ;;  %vm644_vm2 = vweird.f32 %v1643_v10 }
  0x5e   : > { %732 = vadd.xlane.f32.xlu0 %v731_v8 }
  0x5f   : > { %v641_v12 = vsub.f32 1.0, %v640_v11  ;;  %v1636_v11 = vld [vmem:[%s2484_s16] ss:$0 sm:$0xff]  ;;  %s1509_s8 = sshll.u32 %s2487_s17, 4 }
  0x61   : > { %v642_v13 = vmul.f32 %v1643_v10, %v641_v12 }
  0x62   : > { %s1226_s6 = scalar_lea.hbm %s2489_s21, %s1509_s8 }
  0x63   : > { %v643_v14 = vadd.f32 %v1643_v10, %v642_v13  ;;  %s1229_s29 = sshll.u32 %s1226_s6, 4  ;;  %s1230_s29 = int_to_ptr.hbm [resolvable:$true] %s1229_s29 }
  0x64   : > { %s1894_s12 = sshra.s32 %s1230_s29, 4  ;;  %s1895_s12 = int_to_ptr.hbm [resolvable:$true] %s1894_s12 }
  0x65   : > { %v2247_v15 = vsel %vm644_vm2, %v1643_v10, %v643_v14  ;;  %s1896_s3 = scalar_lea.hbm %s1895_s12, 16  ;;  %p1901_p8 = scmp.lt.s32.totalorder %s1895_s12, %s2489_s21 }
  0x66   : > { %p1897_p1 = scmp.ne.s32.totalorder %s1895_s12, %s1896_s3 }
  0x68   : > { %p1898_p2 = pnand %p1897_p1, %p2148_p7 }
  0x6a   : > { %p1899_p4 = pneg %p1898_p2 }
  0xc9   : > { %v730_v16 = vpop.xlane.xlu0 %729 }
  0xca   : > { %v734_v17 = vmul.f32 %v730_v16, %v2247_v15  ;;  %v856_v20 = vpop.xlane.xlu2 %855 }
  0xcb   : > { %v865_v24 = vmul.f32 %v856_v20, %v2247_v15 }
  0xcc   : > { %v2250_v18 = vsub.f32 %v726_v0, %v734_v17 }
  0xcd   : > { %v2265_v29 = vsub.f32 %v2241_v5, %v865_v24  ;;  %v1500_v24 = vld [vmem:[#allocation14] sm:$0xff] }
  0xce   : > { %v738_v19 = vmul.f32 %v2250_v18, %v2250_v18 }
  0xcf   : > { %v869_v33 = vmul.f32 %v2265_v29, %v2265_v29 }
  0xd0   : > { %v740_v21 = vsel %vm635_vm0, %v738_v19, 0.0  ;;  %v1497_v19 = vld [vmem:[#allocation15 + $0x8] sm:$0xff] }
  0xd1   : > { %741 = vadd.xlane.f32.xlu2 %v740_v21  ;;  %v733_v22 = vpop.xlane.xlu0 %732  ;;  %v873_v36 = vsel %vm635_vm0, %v869_v33, 0.0  ;;  %701 = vmatpush.bf16.msra.mxu1 %v1497_v19  ;;  %v1496_v21 = vld [vmem:[#allocation15] sm:$0xff] }
  0xd2   : > { %v735_v23 = vmul.f32 %v733_v22, %v2247_v15  ;;  %v1501_v22 = vld [vmem:[#allocation14 + $0x8] sm:$0xff] }
  0xd3   : > { %940 = vmatpush.bf16.msra.mxu3 %v1501_v22 }
  0xd4   : > { %v2260_v26 = vsub.f32 %v727_v7, %v735_v23 }
  0xd5   : > { %702 = vmatpush.bf16.msra.mxu1 %v1496_v21 }
  0xd6   : > { %v631_v27 = vpop.f32.mrf.mxu0  ;;  %v739_v28 = vmul.f32 %v2260_v26, %v2260_v26 }
  0xd7   : > { %v632_v30 = vadd.f32 %v1634_v25, %v631_v27  ;;  %941 = vmatpush.bf16.msra.mxu3 %v1500_v24 }
  0xd8   : > { %v743_v31 = vsel %vm635_vm0, %v739_v28, 0.0 }
  0xd9   : > { %744 = vadd.xlane.f32.xlu0 %v743_v31  ;;  %v636_v32 = vsel %vm635_vm0, %v632_v30, 0.0 }
  0xda   : > { %637 = vadd.xlane.f32.xlu1 %v636_v32 }
  0xde   : > { %v633_v35 = vpop.f32.mrf.mxu0 }
  0xe1   : > { %874 = vadd.xlane.f32.xlu0 %v873_v36 }
  0xe2   : > { %852 = vadd.xlane.f32.xlu1 %v851_v37 }
 0x144   : > { %v742_v39 = vpop.xlane.xlu2 %741 }
 0x145   : > { %v746_v40 = vmul.f32 %v742_v39, %v2247_v15 }
 0x147   : > { %v748_v42 = vadd.f32 1e-05, %v746_v40 }
 0x149   : > { %1644 = vrsqrt.f32 %v748_v42  ;;  %vm756_vm3 = vweird.f32 %v748_v42 }
 0x14c   : > { %v745_v43 = vpop.xlane.xlu0 %744 }
 0x14d   : > { %v747_v44 = vmul.f32 %v745_v43, %v2247_v15  ;;  %v638_v45 = vpop.xlane.xlu1 %637 }
 0x14e   : > { %v646_v46 = vmul.f32 %v2247_v15, %v638_v45 }
 0x14f   : > { %v1645_v47 = vpop.eup %1644  ;;  %v749_v48 = vadd.f32 1e-05, %v747_v44 }
 0x150   : > { %v751_v49 = vmul.f32 %v1645_v47, %v748_v42  ;;  %v2281_v50 = vsub.f32 %v632_v30, %v646_v46  ;;  %vm757_vm4 = vweird.f32 %v1645_v47  ;;  %v1637_v46 = vld [vmem:[%s2483_s10] ss:$0 sm:$0xff] }
 0x151   : > { %1646 = vrsqrt.f32 %v749_v48  ;;  %vm758_vm5 = vmor %vm756_vm3, %vm757_vm4  ;;  %vm766_vm6 = vweird.f32 %v749_v48  ;;  %vm709_vm4 = vcmask 125952  }
 0x152   : > { %v752_v51 = vmul.f32 %v1645_v47, %v751_v49  ;;  %v648_v52 = vmul.f32 %v2281_v50, %v2281_v50 }
 0x154   : > { %v753_v53 = vmul.f32 0.5, %v752_v51  ;;  %v649_v54 = vsel %vm635_vm0, %v648_v52, 0.0  ;;  %v875_v17 = vpop.xlane.xlu0 %874  ;;  %v1638_v51 = vld [vmem:[%s2484_s16] ss:$0 sm:$0xff] }
 0x155   : > { %650 = vadd.xlane.f32.xlu1 %v649_v54  ;;  %v853_v55 = vpop.xlane.xlu1 %852 }
 0x156   : > { %v754_v56 = vsub.f32 1.5, %v753_v53  ;;  %v864_v57 = vmul.f32 %v853_v55, %v2247_v15 }
 0x157   : > { %v1647_v58 = vpop.eup %1646 }
 0x158   : > { %v755_v59 = vmul.f32 %v1645_v47, %v754_v56  ;;  %v761_v60 = vmul.f32 %v1647_v58, %v749_v48  ;;  %v2288_v61 = vsub.f32 %v2273_v34, %v864_v57  ;;  %vm767_vm7 = vweird.f32 %v1647_v58 }
 0x159   : > { %vm768_vm8 = vmor %vm766_vm6, %vm767_vm7  ;;  %vm990_vm6 = vcmask 195584  }
 0x15a   : > { %v762_v62 = vmul.f32 %v1647_v58, %v761_v60  ;;  %v868_v63 = vmul.f32 %v2288_v61, %v2288_v61  ;;  %v759_v0 = vsel %vm758_vm5, %v1645_v47, %v755_v59  ;;  %vm1027_vm5 = vcmask 1043456  }
 0x15b   : > { %v770_v4 = vmul.f32 %v759_v0, %v2250_v18  ;;  %v877_v18 = vmul.f32 %v875_v17, %v2247_v15  ;;  %v1640_v0 = vld [vmem:[%s2484_s16] ss:$0 sm:$0xff] }
 0x15c   : > { %v763_v1 = vmul.f32 0.5, %v762_v62  ;;  %v870_v2 = vsel %vm635_vm0, %v868_v63, 0.0 }
 0x15d   : > { %871 = vadd.xlane.f32.xlu2 %v870_v2  ;;  %v776_v10 = vmul.f32 %v1635_v6, %v770_v4  ;;  %v879_v20 = vadd.f32 1e-05, %v877_v18 }
 0x15e   : > { %v764_v3 = vsub.f32 1.5, %v763_v1 }
 0x15f   : > { %v782_v13 = vadd.f32 %v1636_v11, %v776_v10  ;;  %1648 = vrsqrt.f32 %v879_v20  ;;  %vm896_vm9 = vweird.f32 %v879_v20 }
 0x160   : > { %v765_v7 = vmul.f32 %v1647_v58, %v764_v3 }
 0x162   : > { %v769_v8 = vsel %vm768_vm8, %v1647_v58, %v765_v7 }
 0x163   : > { %v771_v9 = vmul.f32 %v769_v8, %v2260_v26 }
 0x165   : > { %v777_v12 = vmul.f32 %v1635_v6, %v771_v9  ;;  %v1649_v25 = vpop.eup %1648 }
 0x166   : > { %v891_v28 = vmul.f32 %v1649_v25, %v879_v20  ;;  %vm897_vm10 = vweird.f32 %v1649_v25 }
 0x167   : > { %v783_v14 = vadd.f32 %v1636_v11, %v777_v12  ;;  %vm2305_vm12 = vmor %vm896_vm9, %vm897_vm10 }
 0x168   : > { %v892_v30 = vmul.f32 %v1649_v25, %v891_v28 }
 0x169   : > { %v784_v16 = vpack.c.bf16 %v783_v14, %v782_v13 }
 0x16a   : > { %v893_v36 = vmul.f32 0.5, %v892_v30 }
 0x16b   : > { %1445 = vmatmul.msk.bf16.vlgmr.msra.gmra.mxu2 %vm635_vm0, %v784_v16 }
 0x16c   : > { %v894_v39 = vsub.f32 1.5, %v893_v36 }
 0x16e   : > { %v895_v43 = vmul.f32 %v1649_v25, %v894_v39 }
 0x170   : > { %v899_v52 = vsel %vm2305_vm12, %v1649_v25, %v895_v43 }
 0x171   : > { %v901_v56 = vmul.f32 %v899_v52, %v2265_v29 }
 0x1c8   : > { %v651_v23 = vpop.xlane.xlu1 %650 }
 0x1c9   : > { %v652_v26 = vmul.f32 %v651_v23, %v2247_v15 }
 0x1cb   : > { %v653_v27 = vadd.f32 1e-05, %v652_v26 }
 0x1cd   : > { %1650 = vrsqrt.f32 %v653_v27  ;;  %vm660_vm13 = vweird.f32 %v653_v27 }
 0x1d0   : > { %v872_v31 = vpop.xlane.xlu2 %871 }
 0x1d1   : > { %v876_v32 = vmul.f32 %v872_v31, %v2247_v15 }
 0x1d3   : > { %v1651_v33 = vpop.eup %1650  ;;  %v878_v35 = vadd.f32 1e-05, %v876_v32 }
 0x1d4   : > { %v655_v37 = vmul.f32 %v1651_v33, %v653_v27  ;;  %vm661_vm11 = vweird.f32 %v1651_v33 }
 0x1d5   : > { %1652 = vrsqrt.f32 %v878_v35  ;;  %vm662_vm14 = vmor %vm660_vm13, %vm661_vm11  ;;  %vm886_vm15 = vweird.f32 %v878_v35 }
 0x1d6   : > { %v656_v38 = vmul.f32 %v1651_v33, %v655_v37 }
 0x1d8   : > { %v657_v40 = vmul.f32 0.5, %v656_v38 }
 0x1da   : > { %v658_v41 = vsub.f32 1.5, %v657_v40 }
 0x1db   : > { %v1653_v42 = vpop.eup %1652 }
 0x1dc   : > { %v659_v45 = vmul.f32 %v1651_v33, %v658_v41  ;;  %v881_v15 = vmul.f32 %v1653_v42, %v878_v35  ;;  %vm887_vm2 = vweird.f32 %v1653_v42 }
 0x1dd   : > { %vm888_vm3 = vmor %vm886_vm15, %vm887_vm2 }
 0x1de   : > { %v663_v47 = vsel %vm662_vm14, %v1651_v33, %v659_v45  ;;  %v882_v48 = vmul.f32 %v1653_v42, %v881_v15 }
 0x1df   : > { %v664_v49 = vmul.f32 %v663_v47, %v2281_v50  ;;  %v1639_v50 = vld [vmem:[%s2483_s10] ss:$0 sm:$0xff] }
 0x1e0   : > { %v883_v53 = vmul.f32 0.5, %v882_v48  ;;  %v907_v63 = vmul.f32 %v1639_v50, %v901_v56 }
 0x1e1   : > { %v669_v54 = vmul.f32 %v1637_v46, %v664_v49 }
 0x1e2   : > { %v884_v55 = vsub.f32 1.5, %v883_v53  ;;  %v913_v2 = vadd.f32 %v1640_v0, %v907_v63 }
 0x1e3   : > { %v674_v57 = vadd.f32 %v1638_v51, %v669_v54 }
 0x1e4   : > { %v885_v58 = vmul.f32 %v1653_v42, %v884_v55 }
 0x1e5   : > { %v675_v59 = vpack.c.bf16 %v674_v57, %v674_v57 }
 0x1e6   : > { %v889_v60 = vsel %vm888_vm3, %v1653_v42, %v885_v58 }
 0x1e7   : > { %v900_v62 = vmul.f32 %v889_v60, %v2288_v61  ;;  %1436 = vmatmul.msk.bf16.vlgmr.msra.gmra.mxu1 %vm635_vm0, %v675_v59 }
 0x1e9   : > { %v906_v1 = vmul.f32 %v1639_v50, %v900_v62 }
 0x1eb   : > { %v912_v29 = vadd.f32 %v1640_v0, %v906_v1 }
 0x1ed   : > { %v914_v3 = vpack.c.bf16 %v913_v2, %v912_v29 }
 0x1ee   : > { %v813_v4 = vpop.f32.mrf.mxu2 }
 0x1ef   : > { %v2327_v6 = vpack.c.bf16 %v813_v4, %v813_v4  ;;  %1454 = vmatmul.msk.bf16.vlgmr.msra.gmra.mxu3 %vm635_vm0, %v914_v3 }
 0x1f1   : > { %820 = vst.msk [vmem:[#allocation2] sm:$0xf] %vm709_vm4, %v2327_v6  ;;  %832 = vrot.lane.b32.xlu2 %v2327_v6, %s1985_s15 }
 0x1f6   : > { %v815_v61 = vpop.f32.mrf.mxu2 }
 0x1f7   : > { %v2334_v7 = vpack.c.bf16 %v815_v61, %v815_v61 }
 0x1f9   : > { %821 = vst.msk [vmem:[#allocation2 + $0x4] sm:$0xf] %vm709_vm4, %v2334_v7  ;;  %834 = vrot.lane.b32.xlu0 %v2334_v7, %s1985_s15 }
 0x200   : > { %v1502_v19 = vld [vmem:[#allocation2] sm:$0xff] }
 0x201   : > { %v971_v23 = vsel %vm618_vm1, %v1502_v19, 0 }
 0x24b   : > { %v833_v8 = vpop.permute.xlu2 %832 }
 0x24c   : > { %838 = vst.msk [vmem:[#allocation2 + $0xc] sm:$0xf] %vm709_vm4, %v833_v8 }
 0x264   : > { %v704_v9 = vpop.f32.mrf.mxu1 }
 0x265   : > { %v708_v10 = vpack.c.bf16 %v704_v9, %v704_v9 }
 0x267   : > { %710 = vst.msk [vmem:[#allocation2 + $0x8] sm:$0xf] %vm709_vm4, %v708_v10  ;;  %716 = vrot.lane.b32.xlu1 %v708_v10, %s1985_s15 }
 0x26b   : > { %v835_v11 = vpop.permute.xlu0 %834 }
 0x26c   : > { %839 = vst.msk [vmem:[#allocation2 + $0x10] sm:$0xf] %vm709_vm4, %v835_v11  ;;  %v706_v12 = vpop.f32.mrf.mxu1 }
 0x26e   : > { %v952_v13 = vld [vmem:[#allocation2 + $0x8] sm:$0xf] }
 0x26f   : > { %721 = vrot.lane.b32.xlu1 %v708_v10, %s1986_s18  ;;  %v963_v14 = vunpack.c.l.b16 %v952_v13 }
 0x271   : > { %v965_v16 = vpack.c.b16 %v963_v14, %v963_v14 }
 0x272   : > { %v943_v17 = vpop.f32.mrf.mxu3 }
 0x273   : > { %v974_v18 = vsel %vm618_vm1, %v965_v16, 0  ;;  %v948_v20 = vpack.c.bf16 %v943_v17, %v943_v17  ;;  %v1504_v37 = vld [vmem:[#allocation2 + $0xc] sm:$0xff] }
 0x274   : > { %982 = vmatpush.bf16.xpose.msrb.mxu0 %v974_v18  ;;  %v1070_v40 = vsel %vm618_vm1, %v1504_v37, 0 }
 0x275   : > { %v955_v24 = vunpack.c.l.b16 %v948_v20 }
 0x277   : > { %840 = vrot.lane.b32.xlu1 %v2327_v6, %s1986_s18 }
 0x27a   : > { %v945_v21 = vpop.f32.mrf.mxu3 }
 0x27b   : > { %v949_v22 = vpack.c.bf16 %v945_v21, %v945_v21 }
 0x27c   : > { %983 = vmatpush.bf16.xpose.msrb.mxu0 %v971_v23 }
 0x27d   : > { %v956_v25 = vunpack.c.l.b16 %v949_v22 }
 0x27f   : > { %v957_v26 = vpack.c.b16 %v956_v25, %v955_v24  ;;  %842 = vrot.lane.b32.xlu1 %v2334_v7, %s1986_s18  ;;  %s1900_s18 = scalar_lea.hbm %s2489_s21, 32 }
 0x280   : > { %p1902_p10 = scmp.lt.s32.totalorder %s1900_s18, %s1896_s3 }
 0x281   : > { %1056 = vrot.lane.b32.xlu2 %v957_v26, %s1985_s15 }
 0x282   : > { %p1903_p11 = por %p1902_p10, %p1901_p8 }
 0x283   : > { %1459 = vmatmul.msk.bf16.vlgmr.msrb.gmra.mxu0 %vm618_vm1, %v957_v26 }
 0x284   : > { %p1904_p12 = pnand %p1903_p11, %p1899_p4 }
 0x287   : > { %712 = vrot.lane.b32.xlu1 %v708_v10, %s1987_s0 }
 0x2d9   : > { %v717_v27 = vpop.permute.xlu1 %716 }
 0x2da   : > { %720 = vst.msk [vmem:[#allocation2 + $0x14] sm:$0xf] %vm709_vm4, %v717_v27 }
 0x2db   : > { %v1057_v43 = vpop.permute.xlu2 %1056 }
 0x2e1   : > { %v722_v28 = vpop.permute.xlu1 %721  ;;  %v1055_v30 = vld [vmem:[#allocation2 + $0x14] sm:$0xf] }
 0x2e2   : > { %725 = vst.msk [vmem:[#allocation3 + $0x14] sm:$0xf] %vm709_vm4, %v722_v28  ;;  %v1063_v31 = vunpack.c.l.b16 %v1055_v30 }
 0x2e4   : > { %v1065_v32 = vpack.c.b16 %v1063_v31, %v1063_v31 }
 0x2e6   : > { %v1073_v33 = vsel %vm618_vm1, %v1065_v32, 0 }
 0x2e7   : > { %1081 = vmatpush.bf16.xpose.msrb.mxu2 %v1073_v33 }
 0x2e9   : > { %v841_v35 = vpop.permute.xlu1 %840  ;;  %v1113_v36 = vld [vmem:[#allocation3 + $0x14] sm:$0xf] }
 0x2ea   : > { %846 = vst.msk [vmem:[#allocation3 + $0xc] sm:$0xf] %vm709_vm4, %v841_v35  ;;  %v1119_v38 = vunpack.c.l.b16 %v1113_v36 }
 0x2ec   : > { %v1121_v39 = vpack.c.b16 %v1119_v38, %v1119_v38 }
 0x2ee   : > { %v1127_v41 = vsel %vm1027_vm5, %v1121_v39, 0 }
 0x2ef   : > { %1082 = vmatpush.bf16.xpose.msrb.mxu2 %v1070_v40  ;;  %1135 = vmatpush.bf16.msrb.mxu3 %v1127_v41  ;;  %v1508_v41 = vld [vmem:[#allocation17 + $0x8] sm:$0xff] }
 0x2f0   : > { %1194 = vmatpush.bf16.msra.mxu0 %v1508_v41 }
 0x2f1   : > { %v843_v42 = vpop.permute.xlu1 %842 }
 0x2f2   : > { %847 = vst.msk [vmem:[#allocation3 + $0x10] sm:$0xf] %vm709_vm4, %v843_v42  ;;  %v1507_v42 = vld [vmem:[#allocation17] sm:$0xff] }
 0x2f4   : > { %1195 = vmatpush.bf16.msra.mxu0 %v1507_v42 }
 0x2f6   : > { %1469 = vmatmul.msk.bf16.vlgmr.msrb.gmra.mxu2 %vm618_vm1, %v1057_v43  ;;  %vm1155_vm1 = vcmask 257152  }
 0x2f9   : > { %v713_v44 = vpop.permute.xlu1 %712  ;;  %v1505_v45 = vld [vmem:[#allocation3 + $0xc] sm:$0xff] }
 0x2fa   : > { %715 = vst.msk [vmem:[#allocation3 + $0x8] sm:$0xf] %vm709_vm4, %v713_v44  ;;  %1136 = vmatpush.bf16.msrb.mxu3 %v1505_v45 }
 0x300   : > { %v985_v15 = vpop.f32.mrf.mxu0 }
 0x301   : > { %v991_v46 = vsel %vm990_vm6, %v985_v15, -inf  ;;  %v1014_v47 = vld [vmem:[#allocation3 + $0x8] sm:$0xf] }
 0x302   : > { %992 = vmax.xlane.f32.xlu1 %v991_v46  ;;  %v1020_v48 = vunpack.c.l.b16 %v1014_v47  ;;  %v1205_v47 = vstv %s1204_s14 }
 0x304   : > { %v1022_v49 = vpack.c.b16 %v1020_v48, %v1020_v48 }
 0x306   : > { %v1029_v51 = vsel %vm1027_vm5, %v1022_v49, 0 }
 0x307   : > { %1037 = vmatpush.bf16.msrb.mxu1 %v1029_v51 }
 0x308   : > { %v987_v57 = vpop.f32.mrf.mxu0 }
 0x309   : > { %v994_v62 = vsel %vm990_vm6, %v987_v57, -inf }
 0x375   : > { %v993_v52 = vpop.xlane.xlu1 %992 }
 0x376   : > { %v997_v53 = vsub.f32 %v985_v15, %v993_v52  ;;  %v1641_v15 = vld [vmem:[%s2488_s30] ss:$0 sm:$0xff] }
 0x378   : > { %v999_v54 = vmul.f32 1.442695, %v997_v53 }
 0x379   : > { %v1084_v55 = vpop.f32.mrf.mxu2 }
 0x37a   : > { %1654 = vpow2.f32 %v999_v54  ;;  %v1089_v56 = vsel %vm990_vm6, %v1084_v55, -inf }
 0x37b   : > { %1090 = vmax.xlane.f32.xlu0 %v1089_v56 }
 0x380   : > { %v1655_v50 = vpop.eup %1654 }
 0x381   : > { %v1086_v58 = vpop.f32.mrf.mxu2  ;;  %v1003_v59 = vsel %vm990_vm6, %v1655_v50, 0.0 }
 0x382   : > { %1004 = vadd.xlane.f32.xlu1 %v1003_v59  ;;  %v1092_v60 = vsel %vm990_vm6, %v1086_v58, -inf }
 0x383   : > { %1093 = vmax.xlane.f32.xlu2 %v1092_v60  ;;  %995 = vmax.xlane.f32.xlu0 %v994_v62 }
 0x397   : > { %826 = vrot.lane.b32.xlu0 %v2334_v7, %s1987_s0 }
 0x39b   : > { %824 = vrot.lane.b32.xlu2 %v2327_v6, %s1987_s0 }
 0x3ee   : > { %v1091_v63 = vpop.xlane.xlu0 %1090 }
 0x3ef   : > { %v1095_v0 = vsub.f32 %v1084_v55, %v1091_v63 }
 0x3f1   : > { %v1097_v1 = vmul.f32 1.442695, %v1095_v0 }
 0x3f3   : > { %1656 = vpow2.f32 %v1097_v1 }
 0x3f5   : > { %v1005_v24 = vpop.xlane.xlu1 %1004 }
 0x3f6   : > { %v1094_v29 = vpop.xlane.xlu2 %1093  ;;  %v996_v2 = vpop.xlane.xlu0 %995 }
 0x3f7   : > { %v1096_v3 = vsub.f32 %v1086_v58, %v1094_v29  ;;  %v998_v4 = vsub.f32 %v987_v57, %v996_v2 }
 0x3f9   : > { %v1657_v61 = vpop.eup %1656  ;;  %v1099_v8 = vmul.f32 1.442695, %v1096_v3  ;;  %v1001_v9 = vmul.f32 1.442695, %v998_v4 }
 0x3fa   : > { %v1101_v10 = vsel %vm990_vm6, %v1657_v61, 0.0 }
 0x3fb   : > { %1658 = vpow2.f32 %v1099_v8  ;;  %1102 = vadd.xlane.f32.xlu2 %v1101_v10 }
 0x3fc   : > { %1660 = vpow2.f32 %v1001_v9 }
 0x3fe   : > { %v825_v7 = vpop.permute.xlu2 %824 }
 0x3ff   : > { %830 = vst.msk [vmem:[#allocation3] sm:$0xf] %vm709_vm4, %v825_v7 }
 0x401   : > { %v1659_v6 = vpop.eup %1658 }
 0x402   : > { %v1661_v11 = vpop.eup %1660  ;;  %v1104_v12 = vsel %vm990_vm6, %v1659_v6, 0.0  ;;  %v1109_v13 = vpack.c.bf16 %v1659_v6, %v1657_v61 }
 0x403   : > { %1105 = vadd.xlane.f32.xlu0 %v1104_v12  ;;  %v1006_v14 = vsel %vm990_vm6, %v1661_v11, 0.0  ;;  %v1011_v18 = vpack.c.bf16 %v1661_v11, %v1655_v50 }
 0x404   : > { %1007 = vadd.xlane.f32.xlu1 %v1006_v14  ;;  %1474 = vmatmul.msk.bf16.vlgmr.msrb.gmra.mxu3 %vm990_vm6, %v1109_v13 }
 0x409   : > { %v827_v16 = vpop.permute.xlu0 %826 }
 0x40a   : > { %831 = vst.msk [vmem:[#allocation3 + $0x4] sm:$0xf] %vm709_vm4, %v827_v16 }
 0x411   : > { %v1503_v17 = vld [vmem:[#allocation3] sm:$0xff] }
 0x412   : > { %1038 = vmatpush.bf16.msrb.mxu1 %v1503_v17 }
 0x415   : > { %1464 = vmatmul.msk.bf16.vlgmr.msrb.gmra.mxu1 %vm990_vm6, %v1011_v18 }
 0x46e   : > { %v1103_v19 = vpop.xlane.xlu2 %1102 }
 0x46f   : > { %1662 = vrcp.f32 %v1103_v19 }
 0x475   : > { %v1663_v21 = vpop.eup %1662 }
 0x476   : > { %v1106_v20 = vpop.xlane.xlu0 %1105 }
 0x477   : > { %1664 = vrcp.f32 %v1106_v20  ;;  %v1008_v30 = vpop.xlane.xlu1 %1007 }
 0x478   : > { %1666 = vrcp.f32 %v1005_v24 }
 0x479   : > { %1668 = vrcp.f32 %v1008_v30 }
 0x47d   : > { %v1665_v26 = vpop.eup %1664 }
 0x47e   : > { %v1667_v32 = vpop.eup %1666 }
 0x47f   : > { %v1669_v37 = vpop.eup %1668 }
 0x487   : > { %v1138_v22 = vpop.f32.mrf.mxu3 }
 0x488   : > { %v1143_v23 = vmul.f32 %v1663_v21, %v1138_v22 }
 0x48a   : > { %v1145_v25 = vpack.c.bf16 %v1143_v23, %v1143_v23 }
 0x48c   : > { %1149 = vrot.lane.b32.xlu1 %v1145_v25, %s1988_s5 }
 0x48f   : > { %v1140_v27 = vpop.f32.mrf.mxu3 }
 0x490   : > { %v1144_v28 = vmul.f32 %v1665_v26, %v1140_v27 }
 0x492   : > { %v1146_v31 = vpack.c.bf16 %v1144_v28, %v1144_v28  ;;  %v1040_v33 = vpop.f32.mrf.mxu1 }
 0x493   : > { %v1045_v35 = vmul.f32 %v1667_v32, %v1040_v33 }
 0x494   : > { %1151 = vrot.lane.b32.xlu2 %v1146_v31, %s1988_s5 }
 0x495   : > { %v1047_v36 = vpack.c.bf16 %v1045_v35, %v1045_v35 }
 0x497   : > { %1050 = vst.msk [vmem:[#allocation4] sm:$0xf] %vm709_vm4, %v1047_v36 }
 0x49a   : > { %v1042_v38 = vpop.f32.mrf.mxu1 }
 0x49b   : > { %v1046_v39 = vmul.f32 %v1669_v37, %v1042_v38 }
 0x49d   : > { %v1048_v40 = vpack.c.bf16 %v1046_v39, %v1046_v39 }
 0x49f   : > { %1051 = vst.msk [vmem:[#allocation4 + $0x4] sm:$0xf] %vm709_vm4, %v1048_v40 }
 0x4ee   : > { %v1152_v43 = vpop.permute.xlu2 %1151 }
 0x4ef   : > { %1157 = vst.msk [vmem:[#allocation4 + $0x4] sm:$0xf] %vm1155_vm1, %v1152_v43 }
 0x4fe   : > { %v1150_v44 = vpop.permute.xlu1 %1149 }
 0x4ff   : > { %1156 = vst.msk [vmem:[#allocation4] sm:$0xf] %vm1155_vm1, %v1150_v44 }
 0x506   : > { %v1506_v45 = vld [vmem:[#allocation4] sm:$0xff] }
 0x507   : > { %1487 = vmatmul.msk.bf16.vlgmr.msra.gmra.mxu0 %vm635_vm0, %v1506_v45 }
 0x584   : > { %v1197_v46 = vpop.f32.mrf.mxu0 }
 0x585   : > { %v1198_v48 = vadd.f32 %v1641_v15, %v1197_v46 }
 0x587   : > { %v1206_v49 = vmul.f32 %v1205_v47, %v1198_v48 }
 0x589   : > { %v1208_v51 = vadd.f32 %v1206_v49, %v2273_v34 }
 0x58b   : > { %1210 = vst.msk [vmem:[%s596_s13] sm:$0xff] %vm635_vm0, %v1208_v51 }
 0x58c   : > { %v1199_v52 = vpop.f32.mrf.mxu0 }
 0x58d   : > { %v1200_v53 = vadd.f32 %v1641_v15, %v1199_v52 }
 0x58f   : > { %v1207_v54 = vmul.f32 %v1205_v47, %v1200_v53 }
 0x591   : > { %v1209_v55 = vadd.f32 %v1207_v54, %v2241_v5 }
 0x593   : > { %1211 = vst.msk [vmem:[%s596_s13 + $0x8] sm:$0xff] %vm635_vm0, %v1209_v55 }
 0x594   : > { %1907 = shalt.err (!%p1904_p12)
}
 0x595   : > { %s1989_s7 = smov 128   ;;  %s1990_s17 = smov 8  }
 0x596   : > { %1532 = dma.vmem_to_hbm [thread:$0]  (%p2148_p7), %s1228_s1, 256, %s1230_s29, %s1213_s20, %s1989_s7, %s1989_s7, %s1990_s17  }
 0x597 PF: > { %s2491_s14 = sld [smem:[#allocation24_spill]]  ;;  %p2493_p13 = scmp.ge.s32.totalorder %s1974_s28, 2 }
 0x599   : > { %p1558_p0 = pnand %p2493_p13, %p2104_p6 }
 0x59b   : > { %p1559_p3 = pneg %p1558_p0 }
 0x59d   : > { %s1244_s11 = sand.u32 1, %s2491_s14  }
 0x59e   : > { %s1245_s30 = scalar_lea.sflag [#allocation8], %s1244_s11 }
 0x59f   : > { %1949 = dma.done.wait (%p1559_p3), %s1245_s30, 256  }
 0x5a0   : > { %1951 = vsyncadd (%p1559_p3), %s1245_s30, 4294967040  ;;  %s34_s28 = sadd.s32 1, %s1974_s28   ;;  %s2494_s8 = sld [smem:[#allocation29_spill]] }
 0x5a1   : > { %p31_p5 = scmp.ge.s32.totalorder %s34_s28, 4   ;;  %s2495_s6 = sld [smem:[#allocation27_spill]] }
 0x5a2   : > { %s2496_s23 = smov %s1958_s24  ;;  %s2497_s24 = smov %s1962_s25 }
 0x5a3   : > { %s2499_s26 = smov %s1970_s27  ;;  %33 = sbr.rel (!%p31_p5) target bundleno = 22 (0x16), region = 161 }
 0x5a6   : > { %s2498_s25 = smov %s2494_s8 }
 0x5a7   : > { %s2500_s27 = smov %s2495_s6 }
 0x5a8   :  { %1251 = vsyncpa [#allocation7], 1 }
 0x5a9   :  { %1253 = vsyncpa [#allocation7 + $0x1], 1 }
 0x5aa   :  { %1254 = vsyncpa [#allocation10], 1 }
 0x5ab   :  { %1256 = vsyncpa [#allocation10 + $0x1], 1 }
 0x5ac   :  { %1257 = vsyncpa [#allocation13], 1 }
 0x5ad   :  { %1258 = vsyncpa [#allocation16], 1 }
 0x5ae   :  { %1259 = vsyncpa [#allocation8], 1 }
 0x5af   :  { %1261 = vsyncpa [#allocation8 + $0x1], 1 }

</bundles_post_ra>
